<compile_context>
chip_gen: v7x
topology: tpu7x:2x2x1
jax: 0.10.0
libtpu: 0.0.40
codegen_flags: <defaults>
</compile_context>

<pallas_src>
import functools

import jax
import jax.numpy as jnp
from jax import lax
from jax.experimental import pallas as pl
from jax.experimental.pallas import tpu as pltpu


def _round_up(x, m):
    return ((x + m - 1) // m) * m


def _cdiv(a, b):
    return (a + b - 1) // b


def _matern_kernel(x1_ref, x2_ref, o_ref, *, c, sv2, powfn):
    # x1_ref: (tm, D+2) augmented, x2_ref: (tn, D+2) augmented.
    # Single MXU contraction produces sqdist = n1 + n2 - 2 * x1 @ x2.T.
    sqdist = lax.dot_general(
        x1_ref[...], x2_ref[...],
        dimension_numbers=(((1,), (1,)), ((), ())),
        preferred_element_type=jnp.float32)                    # (tm, tn)
    sqdist = jnp.maximum(sqdist, 0.0)                          # fp-cancellation guard

    base = 1.0 + jnp.sqrt(sqdist * c)                          # c = 3 / ls^4 (hoisted)
    r = powfn(base)
    if sv2 != 1.0:                                             # static Python check
        r = sv2 * r
    o_ref[...] = r.astype(o_ref.dtype)


def matern_scalar_lengthscale(x1, x2, length_scale=1.0, signal_variance=1.0,
                              nu=2.5, *, tm=512, tn=1024, out_dtype=jnp.float32):
    """Compute the (N, M) Matern covariance matrix with a Pallas TPU kernel."""
    N, D = x1.shape
    M, D2 = x2.shape
    assert D == D2

    x1 = x1.astype(jnp.float32)
    x2 = x2.astype(jnp.float32)

    # ---- augmented operands: fold n1 + n2 - 2*cross into one matmul --------
    n1 = jnp.sum(x1 * x1, axis=1, keepdims=True)               # (N, 1)
    n2 = jnp.sum(x2 * x2, axis=1, keepdims=True)               # (M, 1)
    x1_aug = jnp.concatenate(
        [-2.0 * x1, n1, jnp.ones((N, 1), jnp.float32)], axis=1)   # (N, D+2)
    x2_aug = jnp.concatenate(
        [x2, jnp.ones((M, 1), jnp.float32), n2], axis=1)          # (M, D+2)
    Daug = D + 2

    # ---- tile selection (lane-dense, (8,128)-aligned, megacore-friendly) ---
    tm = max(8, min(tm, _round_up(N, 8)))
    tn = max(128, min(tn, _round_up(M, 128)))
    # Keep at least 2 grid steps so the "parallel" axes can span both
    # TensorCores on v7x (best effort; no-op when shapes are already big).
    if _cdiv(N, tm) * _cdiv(M, tn) < 2:
        if tn >= 256:
            tn = _round_up(tn // 2, 128)
        elif tm >= 16:
            tm = _round_up(tm // 2, 8)

    # ---- pad awkward shapes instead of shrinking tiles ----------------------
    N_pad = _round_up(N, tm)
    M_pad = _round_up(M, tn)
    if N_pad != N:
        x1_aug = jnp.pad(x1_aug, ((0, N_pad - N), (0, 0)))     # zero rows -> sqdist 0
    if M_pad != M:
        x2_aug = jnp.pad(x2_aug, ((0, M_pad - M), (0, 0)))

    # ---- static scalar math --------------------------------------------------
    ls = float(length_scale)
    sv = float(signal_variance)
    nu_f = float(nu)
    c = 3.0 / (ls ** 4)                                        # sqrt(3*d)/ls^2 == sqrt(d*c)
    sv2 = sv * sv

    # base**(-nu) == rsqrt(base)**(2*nu) when 2*nu is a positive integer
    # (nu = 0.5, 1.5, 2.5, ...): one EUP rsqrt + a few VPU multiplies.
    two_nu = 2.0 * nu_f
    if two_nu > 0 and two_nu == round(two_nu):
        p = int(round(two_nu))
        powfn = lambda b: lax.integer_pow(lax.rsqrt(b), p)
    else:
        powfn = lambda b: jnp.power(b, -nu_f)                  # generic fallback

    kernel = functools.partial(_matern_kernel, c=c, sv2=sv2, powfn=powfn)

    grid = (N_pad // tm, M_pad // tn)

    # ---- VMEM budget (double-buffered) --------------------------------------
    lane_pad_daug = _round_up(Daug, 128)
    vmem_est = 2 * (tm * tn * jnp.dtype(out_dtype).itemsize
                    + tm * lane_pad_daug * 4
                    + tn * lane_pad_daug * 4)
    cp_kwargs = dict(dimension_semantics=("parallel", "parallel"))
    if vmem_est > 12 * 1024 * 1024:                            # above v5e's 16 MiB default
        cp_kwargs["vmem_limit_bytes"] = min(int(vmem_est * 1.5) + (1 << 20),
                                            100 * 1024 * 1024)

    cost = pl.CostEstimate(
        flops=2 * N_pad * M_pad * Daug + 6 * N_pad * M_pad,
        transcendentals=2 * N_pad * M_pad,
        bytes_accessed=(jnp.dtype(out_dtype).itemsize * N_pad * M_pad
                        + 4 * (N_pad * Daug * grid[1] + M_pad * Daug * grid[0])),
    )

    out = pl.pallas_call(
        kernel,
        out_shape=jax.ShapeDtypeStruct((N_pad, M_pad), out_dtype),
        grid_spec=pltpu.PrefetchScalarGridSpec(
            num_scalar_prefetch=0,
            grid=grid,
            in_specs=[
                pl.BlockSpec((tm, Daug), lambda i, j: (i, 0)),  # x1_aug tile
                pl.BlockSpec((tn, Daug), lambda i, j: (j, 0)),  # x2_aug tile
            ],
            out_specs=pl.BlockSpec((tm, tn), lambda i, j: (i, j)),
        ),
        compiler_params=pltpu.CompilerParams(**cp_kwargs),
        cost_estimate=cost,
    )(x1_aug, x2_aug)

    if N_pad != N or M_pad != M:
        out = out[:N, :M]
    return out


def _reference(x1, x2, length_scale, signal_variance, nu):
    cross = jnp.matmul(x1, x2.T, precision=lax.Precision.HIGHEST)
    sqdist = (jnp.sum(x1 ** 2, 1).reshape(-1, 1) + jnp.sum(x2 ** 2, 1)
              - 2.0 * cross)
    # Clamp only to avoid NaN from fp cancellation in the *reference* (the
    # torch module would NaN here too); it does not change valid outputs.
    sqdist = jnp.maximum(sqdist, 0.0)
    return signal_variance ** 2 * jnp.power(
        1.0 + jnp.sqrt(3.0 * sqdist) / length_scale ** 2, -nu)


if __name__ == "__main__":
    key = jax.random.PRNGKey(0)
    k1, k2, k3, k4 = jax.random.split(key, 4)

    length_scale, signal_variance, nu = 1.0, 1.0, 2.5

    # Case 1: nicely shaped — N=512 vs M=512, D=32.
    N, M, D = 512, 512, 32
    x1 = jax.random.normal(k1, (N, D), dtype=jnp.float32)
    x2 = jax.random.normal(k2, (M, D), dtype=jnp.float32)
    out = matern_scalar_lengthscale(x1, x2, length_scale, signal_variance, nu)
    out = jax.block_until_ready(out)
    ref = _reference(x1, x2, length_scale, signal_variance, nu)
    assert out.shape == (N, M)
    assert jnp.allclose(out, ref, atol=1e-4, rtol=1e-4), (
        f"max abs err {jnp.max(jnp.abs(out - ref))}")

    # Case 2: awkward shapes exercising the padding path — N=300, M=200, D=17.
    N2, M2, D2 = 300, 200, 17
    y1 = jax.random.normal(k3, (N2, D2), dtype=jnp.float32)
    y2 = jax.random.normal(k4, (M2, D2), dtype=jnp.float32)
    out2 = matern_scalar_lengthscale(y1, y2, 1.3, 0.7, 1.5)
    out2 = jax.block_until_ready(out2)
    ref2 = _reference(y1, y2, 1.3, 0.7, 1.5)
    assert out2.shape == (N2, M2)
    assert jnp.allclose(out2, ref2, atol=1e-4, rtol=1e-4), (
        f"max abs err {jnp.max(jnp.abs(out2 - ref2))}")

    print("KERNEL_OK")
</pallas_src>

<mosaic_0001>
module attributes {stable_mosaic.version = 11 : i64} {
  func.func @_matern_kernel(%arg0: i32, %arg1: i32, %arg2: memref<512x34xf32, #tpu.memory_space<vmem>>, %arg3: memref<256x34xf32, #tpu.memory_space<vmem>>, %arg4: memref<512x256xf32, #tpu.memory_space<vmem>>) attributes {dimension_semantics = [#tpu.dimension_semantics<parallel>, #tpu.dimension_semantics<parallel>], iteration_bounds = array<i64: 1, 2>, scalar_prefetch = 0 : i64, scratch_operands = 0 : i64, tpu.core_type = #tpu.core_type<tc>, window_params = [{transform_indices = @transform_0, window_bounds = array<i64: 512, 34>}, {transform_indices = @transform_1, window_bounds = array<i64: 256, 34>}, {transform_indices = @transform_2, window_bounds = array<i64: 512, 256>}]} {
    %c0 = arith.constant 0 : index
    %c0_0 = arith.constant 0 : index
    %0 = vector.load %arg2[%c0, %c0_0] : memref<512x34xf32, #tpu.memory_space<vmem>>, vector<512x34xf32>
    %c0_1 = arith.constant 0 : index
    %c0_2 = arith.constant 0 : index
    %1 = vector.load %arg3[%c0_1, %c0_2] : memref<256x34xf32, #tpu.memory_space<vmem>>, vector<256x34xf32>
    %cst = arith.constant dense<0.000000e+00> : vector<512x256xf32>
    %2 = tpu.matmul %0, %1, %cst {dimension_numbers = #tpu.dot_dimension_numbers<[1], [1], [0], [0], [0, 0, 1, 0], [], []>} : vector<512x34xf32>, vector<256x34xf32>, vector<512x256xf32> -> vector<512x256xf32>
    %cst_3 = arith.constant 0.000000e+00 : f32
    %3 = vector.broadcast %cst_3 : f32 to vector<512x256xf32>
    %4 = arith.maximumf %2, %3 : vector<512x256xf32>
    %cst_4 = arith.constant 3.000000e+00 : f32
    %5 = vector.broadcast %cst_4 : f32 to vector<512x256xf32>
    %6 = arith.mulf %4, %5 : vector<512x256xf32>
    %7 = math.sqrt %6 : vector<512x256xf32>
    %cst_5 = arith.constant 1.000000e+00 : f32
    %8 = vector.broadcast %cst_5 : f32 to vector<512x256xf32>
    %9 = arith.addf %8, %7 : vector<512x256xf32>
    %10 = math.rsqrt %9 : vector<512x256xf32>
    %11 = arith.mulf %10, %10 : vector<512x256xf32>
    %12 = arith.mulf %11, %11 : vector<512x256xf32>
    %13 = arith.mulf %10, %12 : vector<512x256xf32>
    %c0_6 = arith.constant 0 : index
    %c0_7 = arith.constant 0 : index
    %14 = vector.load %arg4[%c0_6, %c0_7] : memref<512x256xf32, #tpu.memory_space<vmem>>, vector<512x256xf32>
    tpu.vector_store %arg4[%c0_6, %c0_7], %13 {strides = array<i32>} : memref<512x256xf32, #tpu.memory_space<vmem>>, vector<512x256xf32>,
    return
  }
  func.func @transform_0(%arg0: i32, %arg1: i32) -> (i32, i32) {
    %c0_i32 = arith.constant 0 : i32
    %c0_i32_0 = arith.constant 0 : i32
    return %arg0, %c0_i32 : i32, i32
  }
  func.func @transform_1(%arg0: i32, %arg1: i32) -> (i32, i32) {
    %c0_i32 = arith.constant 0 : i32
    %c0_i32_0 = arith.constant 0 : i32
    return %arg1, %c0_i32 : i32, i32
  }
  func.func @transform_2(%arg0: i32, %arg1: i32) -> (i32, i32) {
    %c0_i32 = arith.constant 0 : i32
    return %arg0, %arg1 : i32, i32
  }
}

</mosaic_0001>

<bundles_post_ra>
// kernel: tpu_custom_call.1
= control target key start
LH: loop header
LB: loop body
LE: loop exit
PB: predicated region body
PF: predicated region fallthrough
CT: control target
= control target key end

     0   :  { %7 = vsyncpa [#allocation3], 0  ;;  %s6551_s0 = inlined_call_operand.vmem [shape: f32[512,34], index: 0, kind: input, shape index: {}]   ;;  %s6552_s1 = inlined_call_operand.vmem [shape: f32[512,34], index: 1, kind: input, shape index: {}]   ;;  %s6553_s2 = inlined_call_operand.hbm [shape: f32[512,512], index: 2, kind: output, shape index: {}]  }
   0x1   :  { %9 = vsyncpa [#allocation3 + $0x1], 0  ;;  %s4045_s9 = smov 0   ;;  %s4047_s10 = smov 0  }
   0x2   :  { %s4049_s11 = smov 0   ;;  %s4051_s12 = smov 0  }
   0x3   :  { %s4053_s13 = smov 0   ;;  %s4055_s14 = smov 0  }
   0x4 LB: > { %s3041_s15 = sadd.s32 4294967295, %s4024_s14   ;;  %s3042_s16 = sadd.s32 4294967294, %s4024_s14   ;;  %s4024_s14 = sphi %s4055_s14, %s15_s14   ;;  %s4020_s13 = sphi %s4053_s13, %s6566_s13   ;;  %s4016_s12 = sphi %s4051_s12, %s6565_s12   ;;  %s4012_s11 = sphi %s4049_s11, %s6564_s11   ;;  %s4008_s10 = sphi %s4047_s10, %s6563_s10   ;;  %s4004_s9 = sphi %s4045_s9, %s6562_s9  }
   0x5   : > { %s24_s17 = sadd.s32 1, %s4020_s13  ;;  %s88_s18 = sadd.s32 1, %s4012_s11 }
   0x6   : > { %p25_p0 = scmp.ge.s32.totalorder %s24_s17, 2  ;;  %p98_p1 = scmp.ne.s32.totalorder %s4012_s11, %s4008_s10 }
   0x7   : > { %p99_p2 = scmp.eq.s32.totalorder %s3041_s15, 1  ;;  %p104_p3 = scmp.ne.s32.totalorder %s4008_s10, %s4004_s9 }
   0x8   : > { %s6568_s17 = smov (%p25_p0, %s24_s17), 0  ;;  %p105_p5 = scmp.eq.s32.totalorder %s3042_s16, 1 }
   0x9   : > { %p4085_p4 = por %p99_p2, %p98_p1  ;;  %s84_s20 = ssub.s32 %s4020_s13, %s6568_s17 }
   0xa   : > { %p3046_p6 = scmp.ge.s32.totalorder %s4024_s14, 1  ;;  %p86_p7 = scmp.eq.s32.totalorder %s84_s20, 0 }
   0xb   : > { %p4092_p8 = por %p105_p5, %p104_p3  ;;  %p141_p9 = scmp.lt.s32.totalorder %s4024_s14, 3 }
   0xc   : > { %s4098_s22 = scalar_select %p86_p7, %s4012_s11, %s88_s18  }
   0xd   : > { %p142_p10 = pnand %p3046_p6, %p141_p9 }
   0xf   : > { %145 = sbr.rel (%p142_p10) target bundleno = 796 (0x31c), region = 28 }
  0x16   : > { %s3048_s23 = sshll.u32 %s4016_s12, 5  ;;  %vm278_vm0 = vcmask 277504   ;;  %v4104_v0 = vld [vmem:[%s6551_s0] sm:$0xff]  ;;  %v183_v51 = vld [vmem:[%s6551_s0 + $0x8] sm:$0xff]  ;;  %v184_v53 = vld [vmem:[%s6551_s0 + $0x10] sm:$0xff]  ;;  %s165_s30 = sand.u32 1, %s4008_s10  }
  0x17   : > { %v4109_v1 = vld [vmem:[%s6551_s0 + $0x100] sm:$0xff]  ;;  %p175_p11 = scmp.lt.s32.totalorder %s3048_s23, 63  ;;  %3184 = vmatprep.mubr.msk.f32.mxu0 %vm278_vm0, %v4104_v0  ;;  %vm4122_vm1 = vmpackc.low %vm278_vm0, %vm278_vm0  ;;  %v215_v52 = vld [vmem:[%s6551_s0 + $0x108] sm:$0xff]  ;;  %s3151_s5 = sshll.u32 %s4016_s12, 8 }
  0x18   : > { %3248 = vmatprep.mubr.msk.f32.mxu1 %vm278_vm0, %v4109_v1  ;;  %v216_v54 = vld [vmem:[%s6551_s0 + $0x110] sm:$0xff]  ;;  %v185_v55 = vld [vmem:[%s6551_s0 + $0x18] sm:$0xff]  ;;  %v186_v57 = vld [vmem:[%s6551_s0 + $0x20] sm:$0xff]  ;;  %s6498_s15 = scalar_lea.hbm %s6553_s2, %s3151_s5  ;;  %s6505_s16 = scalar_lea.sflag [#allocation3], %s165_s30 }
  0x19   : > { %s6570_s23 = smov (!%p175_p11, %s3048_s23), 63  ;;  %v217_v56 = vld [vmem:[%s6551_s0 + $0x118] sm:$0xff]  ;;  %v218_v58 = vld [vmem:[%s6551_s0 + $0x120] sm:$0xff]  ;;  %v187_v59 = vld [vmem:[%s6551_s0 + $0x28] sm:$0xff]  ;;  %s4026_s12 = smov [#allocation2]  }
  0x1a   : > { %s3049_s28 = sshll.u32 %s6570_s23, 3  ;;  %v219_v60 = vld [vmem:[%s6551_s0 + $0x128] sm:$0xff]  ;;  %v188_v61 = vld [vmem:[%s6551_s0 + $0x30] sm:$0xff]  ;;  %v189_v63 = vld [vmem:[%s6551_s0 + $0x38] sm:$0xff]  ;;  %s3950_s20 = sshll.u32 %s4026_s12, 4  ;;  %s3951_s20 = int_to_ptr.vmem [resolvable:$false] %s3950_s20 }
  0x1b   : > { %s4118_s3 = scalar_lea.vmem %s6552_s1, %s3049_s28  ;;  %v220_v62 = vld [vmem:[%s6551_s0 + $0x130] sm:$0xff]  ;;  %v222_v2 = vld [vmem:[%s6551_s0 + $0x140] sm:$0xff]  ;;  %s3952_s23 = scalar_lea.vmem %s3951_s20, 32768 }
  0x1c   : > { %v262_v3 = vld [vmem:[%s4118_s3 + $0x80] sm:$0xff]  ;;  %v263_v4 = vld [vmem:[%s4118_s3 + $0x88] sm:$0xff]  ;;  %v264_v8 = vld [vmem:[%s4118_s3 + $0x90] sm:$0xff] }
  0x1d   : > { %v246_v5 = vld [vmem:[%s4118_s3] sm:$0xff]  ;;  %v3312_v6 = vpack.c.bf16 %v263_v4, %v262_v3  ;;  %v247_v7 = vld [vmem:[%s4118_s3 + $0x8] sm:$0xff]  ;;  %v265_v9 = vld [vmem:[%s4118_s3 + $0x98] sm:$0xff] }
  0x1e   : > { %v3315_v10 = vpack.c.bf16 %v247_v7, %v246_v5  ;;  %v3318_v11 = vpack.c.bf16 %v265_v9, %v264_v8  ;;  %v248_v12 = vld [vmem:[%s4118_s3 + $0x10] sm:$0xff]  ;;  %v249_v13 = vld [vmem:[%s4118_s3 + $0x18] sm:$0xff]  ;;  %v266_v14 = vld [vmem:[%s4118_s3 + $0xa0] sm:$0xff] }
  0x1f   : > { %3314 = vmatprep.subr.msk.bf16.mxu0 %vm4122_vm1, %v3312_v6  ;;  %3360 = vmatprep.subr.msk.bf16.mxu1 %vm4122_vm1, %v3312_v6  ;;  %v267_v15 = vld [vmem:[%s4118_s3 + $0xa8] sm:$0xff]  ;;  %v3321_v16 = vpack.c.bf16 %v249_v13, %v248_v12  ;;  %v250_v18 = vld [vmem:[%s4118_s3 + $0x20] sm:$0xff]  ;;  %v268_v20 = vld [vmem:[%s4118_s3 + $0xb0] sm:$0xff] }
  0x20   : > { %3317 = vmatpush3.bf16.xpose.msk.msra.mxu0 %vm4122_vm1, %v3315_v10  ;;  %3368 = vmatpush3.bf16.xpose.msk.msra.mxu1 %vm4122_vm1, %v3315_v10  ;;  %v3324_v17 = vpack.c.bf16 %v267_v15, %v266_v14  ;;  %v251_v19 = vld [vmem:[%s4118_s3 + $0x28] sm:$0xff]  ;;  %v269_v21 = vld [vmem:[%s4118_s3 + $0xb8] sm:$0xff]  ;;  %v252_v24 = vld [vmem:[%s4118_s3 + $0x30] sm:$0xff] }
  0x21   : > { %3320 = vmatprep.subr.msk.bf16.mxu0 %vm4122_vm1, %v3318_v11  ;;  %3361 = vmatprep.subr.msk.bf16.mxu1 %vm4122_vm1, %v3318_v11  ;;  %v3327_v22 = vpack.c.bf16 %v251_v19, %v250_v18  ;;  %v3330_v23 = vpack.c.bf16 %v269_v21, %v268_v20  ;;  %v253_v25 = vld [vmem:[%s4118_s3 + $0x38] sm:$0xff]  ;;  %v270_v26 = vld [vmem:[%s4118_s3 + $0xc0] sm:$0xff]  ;;  %v271_v27 = vld [vmem:[%s4118_s3 + $0xc8] sm:$0xff] }
  0x22   : > { %v3333_v28 = vpack.c.bf16 %v253_v25, %v252_v24  ;;  %v3336_v29 = vpack.c.bf16 %v271_v27, %v270_v26  ;;  %v254_v30 = vld [vmem:[%s4118_s3 + $0x40] sm:$0xff]  ;;  %v255_v31 = vld [vmem:[%s4118_s3 + $0x48] sm:$0xff]  ;;  %v272_v32 = vld [vmem:[%s4118_s3 + $0xd0] sm:$0xff] }
  0x23   : > { %v273_v33 = vld [vmem:[%s4118_s3 + $0xd8] sm:$0xff]  ;;  %v3339_v34 = vpack.c.bf16 %v255_v31, %v254_v30  ;;  %v256_v36 = vld [vmem:[%s4118_s3 + $0x50] sm:$0xff]  ;;  %v274_v38 = vld [vmem:[%s4118_s3 + $0xe0] sm:$0xff] }
  0x24   : > { %v3342_v35 = vpack.c.bf16 %v273_v33, %v272_v32  ;;  %v257_v37 = vld [vmem:[%s4118_s3 + $0x58] sm:$0xff]  ;;  %v275_v39 = vld [vmem:[%s4118_s3 + $0xe8] sm:$0xff]  ;;  %v258_v42 = vld [vmem:[%s4118_s3 + $0x60] sm:$0xff] }
  0x25   : > { %v3345_v40 = vpack.c.bf16 %v257_v37, %v256_v36  ;;  %v3348_v41 = vpack.c.bf16 %v275_v39, %v274_v38  ;;  %v259_v43 = vld [vmem:[%s4118_s3 + $0x68] sm:$0xff]  ;;  %v276_v44 = vld [vmem:[%s4118_s3 + $0xf0] sm:$0xff]  ;;  %v277_v45 = vld [vmem:[%s4118_s3 + $0xf8] sm:$0xff] }
  0x26   : > { %v3351_v46 = vpack.c.bf16 %v259_v43, %v258_v42  ;;  %v3354_v47 = vpack.c.bf16 %v277_v45, %v276_v44  ;;  %v260_v48 = vld [vmem:[%s4118_s3 + $0x70] sm:$0xff]  ;;  %v261_v49 = vld [vmem:[%s4118_s3 + $0x78] sm:$0xff]  ;;  %v191_v3 = vld [vmem:[%s6551_s0 + $0x48] sm:$0xff]  ;;  %s4709_s3 = sshll.u32 %s165_s30, 10 }
  0x27   : > { %v3357_v50 = vpack.c.bf16 %v261_v49, %v260_v48  ;;  %v223_v4 = vld [vmem:[%s6551_s0 + $0x148] sm:$0xff]  ;;  %v192_v5 = vld [vmem:[%s6551_s0 + $0x50] sm:$0xff]  ;;  %v193_v7 = vld [vmem:[%s6551_s0 + $0x58] sm:$0xff]  ;;  %s4738_s4 = scalar_lea.vmem [#allocation2], %s4709_s3 }
  0x28   : > { %3323 = vmatpush3.bf16.xpose.msk.msra.mxu0 %vm4122_vm1, %v3321_v16  ;;  %3369 = vmatpush3.bf16.xpose.msk.msra.mxu1 %vm4122_vm1, %v3321_v16  ;;  %v224_v6 = vld [vmem:[%s6551_s0 + $0x150] sm:$0xff]  ;;  %v225_v8 = vld [vmem:[%s6551_s0 + $0x158] sm:$0xff]  ;;  %v194_v9 = vld [vmem:[%s6551_s0 + $0x60] sm:$0xff]  ;;  %s2953_s6 = sshll.u32 %s4738_s4, 4  ;;  %s6500_s6 = int_to_ptr.vmem [resolvable:$true] %s2953_s6 }
  0x29   : > { %3326 = vmatprep.subr.msk.bf16.mxu0 %vm4122_vm1, %v3324_v17  ;;  %3362 = vmatprep.subr.msk.bf16.mxu1 %vm4122_vm1, %v3324_v17  ;;  %v226_v10 = vld [vmem:[%s6551_s0 + $0x160] sm:$0xff]  ;;  %v195_v11 = vld [vmem:[%s6551_s0 + $0x68] sm:$0xff]  ;;  %v196_v13 = vld [vmem:[%s6551_s0 + $0x70] sm:$0xff]  ;;  %s3946_s18 = scalar_lea.vmem %s6500_s6, 16384  ;;  %p3953_p1 = scmp.lt.s32.totalorder %s6500_s6, %s3951_s20 }
  0x2a   : > { %v227_v12 = vld [vmem:[%s6551_s0 + $0x168] sm:$0xff]  ;;  %v228_v14 = vld [vmem:[%s6551_s0 + $0x170] sm:$0xff]  ;;  %v197_v15 = vld [vmem:[%s6551_s0 + $0x78] sm:$0xff]  ;;  %p3947_p12 = scmp.ne.s32.totalorder %s6500_s6, %s3946_s18  ;;  %p3954_p2 = scmp.lt.s32.totalorder %s3952_s23, %s3946_s18 }
  0x2b   : > { %v229_v16 = vld [vmem:[%s6551_s0 + $0x178] sm:$0xff]  ;;  %v198_v17 = vld [vmem:[%s6551_s0 + $0x80] sm:$0xff]  ;;  %v199_v19 = vld [vmem:[%s6551_s0 + $0x88] sm:$0xff] }
  0x2c   : > { %v230_v18 = vld [vmem:[%s6551_s0 + $0x180] sm:$0xff]  ;;  %v231_v20 = vld [vmem:[%s6551_s0 + $0x188] sm:$0xff]  ;;  %v200_v21 = vld [vmem:[%s6551_s0 + $0x90] sm:$0xff]  ;;  %p3948_p13 = pnand %p3947_p12, %p4085_p4  ;;  %p3955_p3 = por %p3954_p2, %p3953_p1 }
  0x2d   : > { %v233_v24 = vld [vmem:[%s6551_s0 + $0x198] sm:$0xff]  ;;  %v202_v25 = vld [vmem:[%s6551_s0 + $0xa0] sm:$0xff]  ;;  %v203_v27 = vld [vmem:[%s6551_s0 + $0xa8] sm:$0xff] }
  0x2e   : > { %v234_v26 = vld [vmem:[%s6551_s0 + $0x1a0] sm:$0xff]  ;;  %v236_v30 = vld [vmem:[%s6551_s0 + $0x1b0] sm:$0xff]  ;;  %v205_v31 = vld [vmem:[%s6551_s0 + $0xb8] sm:$0xff]  ;;  %p3949_p0 = pneg %p3948_p13 }
  0x2f   : > { %v237_v32 = vld [vmem:[%s6551_s0 + $0x1b8] sm:$0xff]  ;;  %v206_v33 = vld [vmem:[%s6551_s0 + $0xc0] sm:$0xff]  ;;  %v239_v36 = vld [vmem:[%s6551_s0 + $0x1c8] sm:$0xff] }
  0x30   : > { %3329 = vmatpush3.bf16.xpose.msk.msra.mxu0 %vm4122_vm1, %v3327_v22  ;;  %3370 = vmatpush3.bf16.xpose.msk.msra.mxu1 %vm4122_vm1, %v3327_v22  ;;  %v232_v22 = vld [vmem:[%s6551_s0 + $0x190] sm:$0xff]  ;;  %v209_v39 = vld [vmem:[%s6551_s0 + $0xd8] sm:$0xff]  ;;  %v242_v42 = vld [vmem:[%s6551_s0 + $0x1e0] sm:$0xff]  ;;  %p3956_p5 = pnand %p3955_p3, %p3949_p0 }
  0x31   : > { %3332 = vmatprep.subr.msk.bf16.mxu0 %vm4122_vm1, %v3330_v23  ;;  %3363 = vmatprep.subr.msk.bf16.mxu1 %vm4122_vm1, %v3330_v23  ;;  %v201_v23 = vld [vmem:[%s6551_s0 + $0x98] sm:$0xff]  ;;  %v208_v37 = vld [vmem:[%s6551_s0 + $0xd0] sm:$0xff]  ;;  %v211_v43 = vld [vmem:[%s6551_s0 + $0xe8] sm:$0xff] }
  0x32   : > { %v240_v38 = vld [vmem:[%s6551_s0 + $0x1d0] sm:$0xff]  ;;  %v243_v44 = vld [vmem:[%s6551_s0 + $0x1e8] sm:$0xff]  ;;  %v245_v48 = vld [vmem:[%s6551_s0 + $0x1f8] sm:$0xff] }
  0x33   : > { %v212_v45 = vld [vmem:[%s6551_s0 + $0xf0] sm:$0xff] }
  0x38   : > { %3335 = vmatpush3.bf16.xpose.msk.msra.mxu0 %vm4122_vm1, %v3333_v28  ;;  %3371 = vmatpush3.bf16.xpose.msk.msra.mxu1 %vm4122_vm1, %v3333_v28  ;;  %v235_v28 = vld [vmem:[%s6551_s0 + $0x1a8] sm:$0xff] }
  0x39   : > { %3338 = vmatprep.subr.msk.bf16.mxu0 %vm4122_vm1, %v3336_v29  ;;  %3364 = vmatprep.subr.msk.bf16.mxu1 %vm4122_vm1, %v3336_v29  ;;  %v204_v29 = vld [vmem:[%s6551_s0 + $0xb0] sm:$0xff] }
  0x40   : > { %3341 = vmatpush3.bf16.xpose.msk.msra.mxu0 %vm4122_vm1, %v3339_v34  ;;  %3372 = vmatpush3.bf16.xpose.msk.msra.mxu1 %vm4122_vm1, %v3339_v34  ;;  %v238_v34 = vld [vmem:[%s6551_s0 + $0x1c0] sm:$0xff] }
  0x41   : > { %3344 = vmatprep.subr.msk.bf16.mxu0 %vm4122_vm1, %v3342_v35  ;;  %3365 = vmatprep.subr.msk.bf16.mxu1 %vm4122_vm1, %v3342_v35  ;;  %v207_v35 = vld [vmem:[%s6551_s0 + $0xc8] sm:$0xff] }
  0x48   : > { %3347 = vmatpush3.bf16.xpose.msk.msra.mxu0 %vm4122_vm1, %v3345_v40  ;;  %3373 = vmatpush3.bf16.xpose.msk.msra.mxu1 %vm4122_vm1, %v3345_v40  ;;  %v241_v40 = vld [vmem:[%s6551_s0 + $0x1d8] sm:$0xff] }
  0x49   : > { %3350 = vmatprep.subr.msk.bf16.mxu0 %vm4122_vm1, %v3348_v41  ;;  %3366 = vmatprep.subr.msk.bf16.mxu1 %vm4122_vm1, %v3348_v41  ;;  %v210_v41 = vld [vmem:[%s6551_s0 + $0xe0] sm:$0xff] }
  0x50   : > { %3353 = vmatpush3.bf16.xpose.msk.msra.mxu0 %vm4122_vm1, %v3351_v46  ;;  %3374 = vmatpush3.bf16.xpose.msk.msra.mxu1 %vm4122_vm1, %v3351_v46  ;;  %v244_v46 = vld [vmem:[%s6551_s0 + $0x1f0] sm:$0xff] }
  0x51   : > { %3356 = vmatprep.subr.msk.bf16.mxu0 %vm4122_vm1, %v3354_v47  ;;  %3367 = vmatprep.subr.msk.bf16.mxu1 %vm4122_vm1, %v3354_v47  ;;  %v213_v47 = vld [vmem:[%s6551_s0 + $0xf8] sm:$0xff] }
  0x58   : > { %3359 = vmatpush3.bf16.xpose.msk.msra.mxu0 %vm4122_vm1, %v3357_v50  ;;  %3375 = vmatpush3.bf16.xpose.msk.msra.mxu1 %vm4122_vm1, %v3357_v50 }
  0x5f   : > { %3185 = vmatmul.mubr.msk.f32.vlgmr.msra.gmra.mrb[0].mxu0 %vm278_vm0, %v4104_v0  ;;  %3249 = vmatmul.mubr.msk.f32.vlgmr.msra.gmra.mrb[0].mxu1 %vm278_vm0, %v4109_v1  ;;  %v221_v0 = vld [vmem:[%s6551_s0 + $0x138] sm:$0xff]  ;;  %v190_v1 = vld [vmem:[%s6551_s0 + $0x40] sm:$0xff] }
  0x60   : > { %3186 = vmatprep.mubr.msk.f32.mxu0 %vm278_vm0, %v183_v51  ;;  %3250 = vmatprep.mubr.msk.f32.mxu1 %vm278_vm0, %v215_v52 }
  0x63   : > { %3187 = vmatmul.mubr.msk.f32.gmra.mrb[2].mxu0 %vm278_vm0, %v183_v51  ;;  %3251 = vmatmul.mubr.msk.f32.gmra.mrb[2].mxu1 %vm278_vm0, %v215_v52 }
  0x64   : > { %3188 = vmatprep.mubr.msk.f32.mxu0 %vm278_vm0, %v184_v53  ;;  %3252 = vmatprep.mubr.msk.f32.mxu1 %vm278_vm0, %v216_v54 }
  0x67   : > { %3189 = vmatmul.mubr.msk.f32.gmra.mrb[4].mxu0 %vm278_vm0, %v184_v53  ;;  %3253 = vmatmul.mubr.msk.f32.gmra.mrb[4].mxu1 %vm278_vm0, %v216_v54 }
  0x68   : > { %3190 = vmatprep.mubr.msk.f32.mxu0 %vm278_vm0, %v185_v55  ;;  %3254 = vmatprep.mubr.msk.f32.mxu1 %vm278_vm0, %v217_v56 }
  0x6b   : > { %3191 = vmatmul.mubr.msk.f32.gmra.mrb[6].mxu0 %vm278_vm0, %v185_v55  ;;  %3255 = vmatmul.mubr.msk.f32.gmra.mrb[6].mxu1 %vm278_vm0, %v217_v56 }
  0x6c   : > { %3192 = vmatprep.mubr.msk.f32.mxu0 %vm278_vm0, %v186_v57  ;;  %3256 = vmatprep.mubr.msk.f32.mxu1 %vm278_vm0, %v218_v58 }
  0x6f   : > { %3193 = vmatmul.mubr.msk.f32.gmra.mrb[8].mxu0 %vm278_vm0, %v186_v57  ;;  %3257 = vmatmul.mubr.msk.f32.gmra.mrb[8].mxu1 %vm278_vm0, %v218_v58 }
  0x70   : > { %3194 = vmatprep.mubr.msk.f32.mxu0 %vm278_vm0, %v187_v59  ;;  %3258 = vmatprep.mubr.msk.f32.mxu1 %vm278_vm0, %v219_v60 }
  0x73   : > { %3195 = vmatmul.mubr.msk.f32.gmra.mrb[10].mxu0 %vm278_vm0, %v187_v59  ;;  %3259 = vmatmul.mubr.msk.f32.gmra.mrb[10].mxu1 %vm278_vm0, %v219_v60 }
  0x74   : > { %3196 = vmatprep.mubr.msk.f32.mxu0 %vm278_vm0, %v188_v61  ;;  %3260 = vmatprep.mubr.msk.f32.mxu1 %vm278_vm0, %v220_v62 }
  0x77   : > { %3197 = vmatmul.mubr.msk.f32.gmra.mrb[12].mxu0 %vm278_vm0, %v188_v61  ;;  %3261 = vmatmul.mubr.msk.f32.gmra.mrb[12].mxu1 %vm278_vm0, %v220_v62 }
  0x78   : > { %3198 = vmatprep.mubr.msk.f32.mxu0 %vm278_vm0, %v189_v63  ;;  %3262 = vmatprep.mubr.msk.f32.mxu1 %vm278_vm0, %v221_v0 }
  0x7b   : > { %3199 = vmatmul.mubr.msk.f32.gmra.mrb[14].mxu0 %vm278_vm0, %v189_v63  ;;  %3263 = vmatmul.mubr.msk.f32.gmra.mrb[14].mxu1 %vm278_vm0, %v221_v0 }
  0x7c   : > { %3200 = vmatprep.mubr.msk.f32.mxu0 %vm278_vm0, %v190_v1  ;;  %3264 = vmatprep.mubr.msk.f32.mxu1 %vm278_vm0, %v222_v2 }
  0x7f   : > { %3201 = vmatmul.mubr.msk.f32.gmra.mrb[16].mxu0 %vm278_vm0, %v190_v1  ;;  %3265 = vmatmul.mubr.msk.f32.gmra.mrb[16].mxu1 %vm278_vm0, %v222_v2 }
  0x80   : > { %3202 = vmatprep.mubr.msk.f32.mxu0 %vm278_vm0, %v191_v3  ;;  %3266 = vmatprep.mubr.msk.f32.mxu1 %vm278_vm0, %v223_v4 }
  0x83   : > { %3203 = vmatmul.mubr.msk.f32.gmra.mrb[18].mxu0 %vm278_vm0, %v191_v3  ;;  %3267 = vmatmul.mubr.msk.f32.gmra.mrb[18].mxu1 %vm278_vm0, %v223_v4 }
  0x84   : > { %3204 = vmatprep.mubr.msk.f32.mxu0 %vm278_vm0, %v192_v5  ;;  %3268 = vmatprep.mubr.msk.f32.mxu1 %vm278_vm0, %v224_v6 }
  0x87   : > { %3205 = vmatmul.mubr.msk.f32.gmra.mrb[20].mxu0 %vm278_vm0, %v192_v5  ;;  %3269 = vmatmul.mubr.msk.f32.gmra.mrb[20].mxu1 %vm278_vm0, %v224_v6 }
  0x88   : > { %3206 = vmatprep.mubr.msk.f32.mxu0 %vm278_vm0, %v193_v7  ;;  %3270 = vmatprep.mubr.msk.f32.mxu1 %vm278_vm0, %v225_v8 }
  0x8b   : > { %3207 = vmatmul.mubr.msk.f32.gmra.mrb[22].mxu0 %vm278_vm0, %v193_v7  ;;  %3271 = vmatmul.mubr.msk.f32.gmra.mrb[22].mxu1 %vm278_vm0, %v225_v8 }
  0x8c   : > { %3208 = vmatprep.mubr.msk.f32.mxu0 %vm278_vm0, %v194_v9  ;;  %3272 = vmatprep.mubr.msk.f32.mxu1 %vm278_vm0, %v226_v10 }
  0x8f   : > { %3209 = vmatmul.mubr.msk.f32.gmra.mrb[24].mxu0 %vm278_vm0, %v194_v9  ;;  %3273 = vmatmul.mubr.msk.f32.gmra.mrb[24].mxu1 %vm278_vm0, %v226_v10 }
  0x90   : > { %3210 = vmatprep.mubr.msk.f32.mxu0 %vm278_vm0, %v195_v11  ;;  %3274 = vmatprep.mubr.msk.f32.mxu1 %vm278_vm0, %v227_v12 }
  0x93   : > { %3211 = vmatmul.mubr.msk.f32.gmra.mrb[26].mxu0 %vm278_vm0, %v195_v11  ;;  %3275 = vmatmul.mubr.msk.f32.gmra.mrb[26].mxu1 %vm278_vm0, %v227_v12 }
  0x94   : > { %3212 = vmatprep.mubr.msk.f32.mxu0 %vm278_vm0, %v196_v13  ;;  %3276 = vmatprep.mubr.msk.f32.mxu1 %vm278_vm0, %v228_v14 }
  0x97   : > { %3213 = vmatmul.mubr.msk.f32.gmra.mrb[28].mxu0 %vm278_vm0, %v196_v13  ;;  %3277 = vmatmul.mubr.msk.f32.gmra.mrb[28].mxu1 %vm278_vm0, %v228_v14 }
  0x98   : > { %3214 = vmatprep.mubr.msk.f32.mxu0 %vm278_vm0, %v197_v15  ;;  %3278 = vmatprep.mubr.msk.f32.mxu1 %vm278_vm0, %v229_v16 }
  0x9b   : > { %3215 = vmatmul.mubr.msk.f32.gmra.mrb[30].mxu0 %vm278_vm0, %v197_v15  ;;  %3279 = vmatmul.mubr.msk.f32.gmra.mrb[30].mxu1 %vm278_vm0, %v229_v16 }
  0x9c   : > { %3216 = vmatprep.mubr.msk.f32.mxu0 %vm278_vm0, %v198_v17  ;;  %3280 = vmatprep.mubr.msk.f32.mxu1 %vm278_vm0, %v230_v18 }
  0x9f   : > { %3217 = vmatmul.mubr.msk.f32.gmra.mrb[32].mxu0 %vm278_vm0, %v198_v17  ;;  %3281 = vmatmul.mubr.msk.f32.gmra.mrb[32].mxu1 %vm278_vm0, %v230_v18 }
  0xa0   : > { %3218 = vmatprep.mubr.msk.f32.mxu0 %vm278_vm0, %v199_v19  ;;  %3282 = vmatprep.mubr.msk.f32.mxu1 %vm278_vm0, %v231_v20 }
  0xa3   : > { %3219 = vmatmul.mubr.msk.f32.gmra.mrb[34].mxu0 %vm278_vm0, %v199_v19  ;;  %3283 = vmatmul.mubr.msk.f32.gmra.mrb[34].mxu1 %vm278_vm0, %v231_v20 }
  0xa4   : > { %3220 = vmatprep.mubr.msk.f32.mxu0 %vm278_vm0, %v200_v21  ;;  %3284 = vmatprep.mubr.msk.f32.mxu1 %vm278_vm0, %v232_v22 }
  0xa7   : > { %3221 = vmatmul.mubr.msk.f32.gmra.mrb[36].mxu0 %vm278_vm0, %v200_v21  ;;  %3285 = vmatmul.mubr.msk.f32.gmra.mrb[36].mxu1 %vm278_vm0, %v232_v22 }
  0xa8   : > { %3222 = vmatprep.mubr.msk.f32.mxu0 %vm278_vm0, %v201_v23  ;;  %3286 = vmatprep.mubr.msk.f32.mxu1 %vm278_vm0, %v233_v24 }
  0xab   : > { %3223 = vmatmul.mubr.msk.f32.gmra.mrb[38].mxu0 %vm278_vm0, %v201_v23  ;;  %3287 = vmatmul.mubr.msk.f32.gmra.mrb[38].mxu1 %vm278_vm0, %v233_v24 }
  0xac   : > { %3224 = vmatprep.mubr.msk.f32.mxu0 %vm278_vm0, %v202_v25  ;;  %3288 = vmatprep.mubr.msk.f32.mxu1 %vm278_vm0, %v234_v26 }
  0xaf   : > { %3225 = vmatmul.mubr.msk.f32.gmra.mrb[40].mxu0 %vm278_vm0, %v202_v25  ;;  %3289 = vmatmul.mubr.msk.f32.gmra.mrb[40].mxu1 %vm278_vm0, %v234_v26 }
  0xb0   : > { %3226 = vmatprep.mubr.msk.f32.mxu0 %vm278_vm0, %v203_v27  ;;  %3290 = vmatprep.mubr.msk.f32.mxu1 %vm278_vm0, %v235_v28 }
  0xb3   : > { %3227 = vmatmul.mubr.msk.f32.gmra.mrb[42].mxu0 %vm278_vm0, %v203_v27  ;;  %3291 = vmatmul.mubr.msk.f32.gmra.mrb[42].mxu1 %vm278_vm0, %v235_v28 }
  0xb4   : > { %3228 = vmatprep.mubr.msk.f32.mxu0 %vm278_vm0, %v204_v29  ;;  %3292 = vmatprep.mubr.msk.f32.mxu1 %vm278_vm0, %v236_v30 }
  0xb7   : > { %3229 = vmatmul.mubr.msk.f32.gmra.mrb[44].mxu0 %vm278_vm0, %v204_v29  ;;  %3293 = vmatmul.mubr.msk.f32.gmra.mrb[44].mxu1 %vm278_vm0, %v236_v30 }
  0xb8   : > { %3230 = vmatprep.mubr.msk.f32.mxu0 %vm278_vm0, %v205_v31  ;;  %3294 = vmatprep.mubr.msk.f32.mxu1 %vm278_vm0, %v237_v32 }
  0xbb   : > { %3231 = vmatmul.mubr.msk.f32.gmra.mrb[46].mxu0 %vm278_vm0, %v205_v31  ;;  %3295 = vmatmul.mubr.msk.f32.gmra.mrb[46].mxu1 %vm278_vm0, %v237_v32 }
  0xbc   : > { %3232 = vmatprep.mubr.msk.f32.mxu0 %vm278_vm0, %v206_v33  ;;  %3296 = vmatprep.mubr.msk.f32.mxu1 %vm278_vm0, %v238_v34 }
  0xbf   : > { %3233 = vmatmul.mubr.msk.f32.gmra.mrb[48].mxu0 %vm278_vm0, %v206_v33  ;;  %3297 = vmatmul.mubr.msk.f32.gmra.mrb[48].mxu1 %vm278_vm0, %v238_v34 }
  0xc0   : > { %3234 = vmatprep.mubr.msk.f32.mxu0 %vm278_vm0, %v207_v35  ;;  %3298 = vmatprep.mubr.msk.f32.mxu1 %vm278_vm0, %v239_v36 }
  0xc3   : > { %3235 = vmatmul.mubr.msk.f32.gmra.mrb[50].mxu0 %vm278_vm0, %v207_v35  ;;  %3299 = vmatmul.mubr.msk.f32.gmra.mrb[50].mxu1 %vm278_vm0, %v239_v36 }
  0xc4   : > { %3236 = vmatprep.mubr.msk.f32.mxu0 %vm278_vm0, %v208_v37  ;;  %3300 = vmatprep.mubr.msk.f32.mxu1 %vm278_vm0, %v240_v38 }
  0xc7   : > { %3237 = vmatmul.mubr.msk.f32.gmra.mrb[52].mxu0 %vm278_vm0, %v208_v37  ;;  %3301 = vmatmul.mubr.msk.f32.gmra.mrb[52].mxu1 %vm278_vm0, %v240_v38 }
  0xc8   : > { %3238 = vmatprep.mubr.msk.f32.mxu0 %vm278_vm0, %v209_v39  ;;  %3302 = vmatprep.mubr.msk.f32.mxu1 %vm278_vm0, %v241_v40 }
  0xcb   : > { %3239 = vmatmul.mubr.msk.f32.gmra.mrb[54].mxu0 %vm278_vm0, %v209_v39  ;;  %3303 = vmatmul.mubr.msk.f32.gmra.mrb[54].mxu1 %vm278_vm0, %v241_v40 }
  0xcc   : > { %3240 = vmatprep.mubr.msk.f32.mxu0 %vm278_vm0, %v210_v41  ;;  %3304 = vmatprep.mubr.msk.f32.mxu1 %vm278_vm0, %v242_v42 }
  0xcf   : > { %3241 = vmatmul.mubr.msk.f32.gmra.mrb[56].mxu0 %vm278_vm0, %v210_v41  ;;  %3305 = vmatmul.mubr.msk.f32.gmra.mrb[56].mxu1 %vm278_vm0, %v242_v42 }
  0xd0   : > { %3242 = vmatprep.mubr.msk.f32.mxu0 %vm278_vm0, %v211_v43  ;;  %3306 = vmatprep.mubr.msk.f32.mxu1 %vm278_vm0, %v243_v44 }
  0xd3   : > { %3243 = vmatmul.mubr.msk.f32.gmra.mrb[58].mxu0 %vm278_vm0, %v211_v43  ;;  %3307 = vmatmul.mubr.msk.f32.gmra.mrb[58].mxu1 %vm278_vm0, %v243_v44 }
  0xd4   : > { %3244 = vmatprep.mubr.msk.f32.mxu0 %vm278_vm0, %v212_v45  ;;  %3308 = vmatprep.mubr.msk.f32.mxu1 %vm278_vm0, %v244_v46 }
  0xd7   : > { %3245 = vmatmul.mubr.msk.f32.gmra.mrb[60].mxu0 %vm278_vm0, %v212_v45  ;;  %3309 = vmatmul.mubr.msk.f32.gmra.mrb[60].mxu1 %vm278_vm0, %v244_v46 }
  0xd8   : > { %3246 = vmatprep.mubr.msk.f32.mxu0 %vm278_vm0, %v213_v47  ;;  %3310 = vmatprep.mubr.msk.f32.mxu1 %vm278_vm0, %v245_v48 }
  0xdb   : > { %3247 = vmatmul.mubr.msk.f32.gmra.mrb[62].mxu0 %vm278_vm0, %v213_v47  ;;  %3311 = vmatmul.mubr.msk.f32.gmra.mrb[62].mxu1 %vm278_vm0, %v245_v48 }
 0x132   : > { %v633_v49 = vpop.f32.mrb[0].mxu0  ;;  %v825_v50 = vpop.f32.mrb[0].mxu1 }
 0x133   : > { %v1016_v51 = vmax.f32 %v633_v49, 0.0  ;;  %v1080_v52 = vmax.f32 %v825_v50, 0.0  ;;  %v635_v53 = vpop.f32.mrb[1].mxu0  ;;  %v827_v54 = vpop.f32.mrb[1].mxu1 }
 0x134   : > { %v1017_v55 = vmax.f32 %v635_v53, 0.0  ;;  %v1081_v56 = vmax.f32 %v827_v54, 0.0 }
 0x135   : > { %v4536_v57 = vmul.f32 3.0, %v1016_v51  ;;  %v4538_v58 = vmul.f32 3.0, %v1080_v52 }
 0x136   : > { %v4540_v59 = vmul.f32 3.0, %v1017_v55  ;;  %v4542_v60 = vmul.f32 3.0, %v1081_v56  ;;  %v639_v61 = vpop.f32.mrb[2].mxu0  ;;  %v831_v62 = vpop.f32.mrb[2].mxu1 }
 0x137   : > { %3434 = vrsqrt.f32 %v4536_v57  ;;  %v641_v63 = vpop.f32.mrb[3].mxu0  ;;  %v833_v0 = vpop.f32.mrb[3].mxu1  ;;  %vm1274_vm2 = vcmp.eq.f32.partialorder %v4536_v57, inf  ;;  %v1018_v3 = vmax.f32 %v639_v61, 0.0  ;;  %v1082_v4 = vmax.f32 %v831_v62, 0.0 }
 0x138   : > { %3436 = vrsqrt.f32 %v4538_v58  ;;  %v1019_v5 = vmax.f32 %v641_v63, 0.0  ;;  %v1083_v6 = vmax.f32 %v833_v0, 0.0  ;;  %vm1276_vm3 = vcmp.eq.f32.partialorder %v4536_v57, 0.0 }
 0x139   : > { %3438 = vrsqrt.f32 %v4540_v59  ;;  %v1277_v9 = vand.u32 2147483648, %v4536_v57  ;;  %vm1722_vm4 = vcmp.eq.f32.partialorder %v4538_v58, inf  ;;  %v4552_v11 = vmul.f32 3.0, %v1018_v3 }
 0x13a   : > { %3440 = vrsqrt.f32 %v4542_v60  ;;  %v645_v1 = vpop.f32.mrb[4].mxu0  ;;  %v837_v2 = vpop.f32.mrb[4].mxu1  ;;  %v4554_v12 = vmul.f32 3.0, %v1082_v4  ;;  %v4556_v13 = vmul.f32 3.0, %v1019_v5  ;;  %vm1724_vm5 = vcmp.eq.f32.partialorder %v4538_v58, 0.0 }
 0x13b   : > { %v647_v7 = vpop.f32.mrb[5].mxu0  ;;  %v839_v8 = vpop.f32.mrb[5].mxu1  ;;  %v1020_v10 = vmax.f32 %v645_v1, 0.0  ;;  %v1084_v14 = vmax.f32 %v837_v2, 0.0  ;;  %v4559_v15 = vmul.f32 3.0, %v1083_v6  ;;  %v1725_v20 = vand.u32 2147483648, %v4538_v58 }
 0x13c   : > { %v1021_v16 = vmax.f32 %v647_v7, 0.0  ;;  %v1085_v17 = vmax.f32 %v839_v8, 0.0  ;;  %vm1281_vm6 = vcmp.eq.f32.partialorder %v4540_v59, inf  ;;  %3442 = vrsqrt.f32 %v4552_v11 }
 0x13d   : > { %v4568_v21 = vmul.f32 3.0, %v1020_v10  ;;  %vm1283_vm7 = vcmp.eq.f32.partialorder %v4540_v59, 0.0  ;;  %v1284_v24 = vand.u32 2147483648, %v4540_v59  ;;  %vm1729_vm8 = vcmp.eq.f32.partialorder %v4542_v60, inf }
 0x13e   : > { %v4561_v18 = vpop.f32.mrb[6].mxu0  ;;  %v4563_v19 = vpop.f32.mrb[6].mxu1  ;;  %3444 = vrsqrt.f32 %v4554_v12  ;;  %vm1731_vm9 = vcmp.eq.f32.partialorder %v4542_v60, 0.0  ;;  %v1732_v26 = vand.u32 2147483648, %v4542_v60  ;;  %v4581_v27 = vmul.f32 3.0, %v1084_v14 }
 0x13f   : > { %v4570_v22 = vpop.f32.mrb[7].mxu0  ;;  %v4572_v23 = vpop.f32.mrb[7].mxu1  ;;  %3446 = vrsqrt.f32 %v4556_v13  ;;  %v4585_v30 = vmul.f32 3.0, %v1021_v16  ;;  %v4587_v31 = vmul.f32 3.0, %v1085_v17  ;;  %vm1288_vm10 = vcmp.eq.f32.partialorder %v4552_v11, inf }
 0x140   : > { %3448 = vrsqrt.f32 %v4559_v15  ;;  %v1291_v36 = vand.u32 2147483648, %v4552_v11  ;;  %vm1290_vm11 = vcmp.eq.f32.partialorder %v4552_v11, 0.0  ;;  %vm1736_vm12 = vcmp.eq.f32.partialorder %v4554_v12, inf }
 0x141   : > { %v3435_v25 = vpop.eup %3434  ;;  %3450 = vrsqrt.f32 %v4568_v21  ;;  %v1739_v42 = vand.u32 2147483648, %v4554_v12  ;;  %v1298_v43 = vand.u32 2147483648, %v4556_v13  ;;  %vm1738_vm13 = vcmp.eq.f32.partialorder %v4554_v12, 0.0 }
 0x142   : > { %v3437_v28 = vpop.eup %3436  ;;  %v1273_v29 = vmul.f32 %v3435_v25, %v4536_v57  ;;  %v4589_v32 = vpop.f32.mrb[8].mxu0  ;;  %vm1295_vm14 = vcmp.eq.f32.partialorder %v4556_v13, inf  ;;  %3452 = vrsqrt.f32 %v4581_v27  ;;  %vm1297_vm15 = vcmp.eq.f32.partialorder %v4556_v13, 0.0 }
 0x143   : > { %v4591_v33 = vpop.f32.mrb[8].mxu1  ;;  %v3439_v34 = vpop.eup %3438  ;;  %v1721_v35 = vmul.f32 %v3437_v28, %v4538_v58  ;;  %vm1743_vm0 = vcmp.eq.f32.partialorder %v4559_v15, inf  ;;  %vm1745_vm1 = vcmp.eq.f32.partialorder %v4559_v15, 0.0  ;;  %v1746_v61 = vand.u32 2147483648, %v4559_v15 }
 0x144   : > { %v4597_v37 = vpop.f32.mrb[9].mxu0  ;;  %v4599_v38 = vpop.f32.mrb[9].mxu1  ;;  %v1275_v40 = vsel %vm1274_vm2, %v4536_v57, %v1273_v29  ;;  %v1280_v41 = vmul.f32 %v3439_v34, %v4540_v59  ;;  %vm1302_vm2 = vcmp.eq.f32.partialorder %v4568_v21, inf  ;;  %v1305_v1 = vand.u32 2147483648, %v4568_v21 }
 0x145   : > { %v3441_v39 = vpop.eup %3440  ;;  %v1278_v44 = vsel %vm1276_vm3, %v1277_v9, %v1275_v40  ;;  %v1723_v45 = vsel %vm1722_vm4, %v4538_v58, %v1721_v35  ;;  %vm1304_vm3 = vcmp.eq.f32.partialorder %v4568_v21, 0.0  ;;  %vm1750_vm4 = vcmp.eq.f32.partialorder %v4581_v27, inf }
 0x146   : > { %v1728_v46 = vmul.f32 %v3441_v39, %v4542_v60  ;;  %v2168_v47 = vadd.f32 1.0, %v1278_v44  ;;  %v1726_v48 = vsel %vm1724_vm5, %v1725_v20, %v1723_v45  ;;  %v1282_v49 = vsel %vm1281_vm6, %v4540_v59, %v1280_v41  ;;  %v4625_v50 = vpop.f32.mrb[10].mxu0  ;;  %v4627_v51 = vpop.f32.mrb[10].mxu1 }
 0x147   : > { %v2232_v52 = vadd.f32 1.0, %v1726_v48  ;;  %v1285_v53 = vsel %vm1283_vm7, %v1284_v24, %v1282_v49  ;;  %v4635_v55 = vpop.f32.mrb[11].mxu0  ;;  %v4637_v56 = vpop.f32.mrb[11].mxu1  ;;  %vm1752_vm5 = vcmp.eq.f32.partialorder %v4581_v27, 0.0  ;;  %v1753_v5 = vand.u32 2147483648, %v4581_v27 }
 0x148   : > { %v1730_v54 = vsel %vm1729_vm8, %v4542_v60, %v1728_v46  ;;  %3454 = vrsqrt.f32 %v2168_v47  ;;  %v2169_v57 = vadd.f32 1.0, %v1285_v53  ;;  %v3443_v62 = vpop.eup %3442  ;;  %v1022_v14 = vmax.f32 %v4561_v18, 0.0 }
 0x149   : > { %v1733_v58 = vsel %vm1731_vm9, %v1732_v26, %v1730_v54  ;;  %3456 = vrsqrt.f32 %v2232_v52  ;;  %v3445_v63 = vpop.eup %3444  ;;  %v1287_v0 = vmul.f32 %v3443_v62, %v4552_v11  ;;  %vm1309_vm6 = vcmp.eq.f32.partialorder %v4585_v30, inf }
 0x14a   : > { %v2233_v59 = vadd.f32 1.0, %v1733_v58  ;;  %3458 = vrsqrt.f32 %v2169_v57  ;;  %v4647_v2 = vpop.f32.mrb[12].mxu0  ;;  %v4649_v60 = vpop.f32.mrb[12].mxu1  ;;  %v1735_v4 = vmul.f32 %v3445_v63, %v4554_v12  ;;  %v4686_v39 = vmul.f32 3.0, %v1022_v14 }
 0x14b   : > { %v3447_v3 = vpop.eup %3446  ;;  %v4654_v6 = vpop.f32.mrb[13].mxu0  ;;  %v1289_v9 = vsel %vm1288_vm10, %v4552_v11, %v1287_v0  ;;  %vm1311_vm7 = vcmp.eq.f32.partialorder %v4585_v30, 0.0  ;;  %v1312_v54 = vand.u32 2147483648, %v4585_v30  ;;  %v1086_v63 = vmax.f32 %v4563_v19, 0.0 }
 0x14c   : > { %3460 = vrsqrt.f32 %v2233_v59  ;;  %v4656_v7 = vpop.f32.mrb[13].mxu1  ;;  %v3449_v8 = vpop.eup %3448  ;;  %v1294_v10 = vmul.f32 %v3447_v3, %v4556_v13  ;;  %v1292_v17 = vsel %vm1290_vm11, %v1291_v36, %v1289_v9  ;;  %v1737_v20 = vsel %vm1736_vm12, %v4554_v12, %v1735_v4 }
 0x14d   : > { %3462 = vrsqrt.f32 %v4585_v30  ;;  %v3451_v16 = vpop.eup %3450  ;;  %v1742_v24 = vmul.f32 %v3449_v8, %v4559_v15  ;;  %v2170_v25 = vadd.f32 1.0, %v1292_v17  ;;  %v1740_v26 = vsel %vm1738_vm13, %v1739_v42, %v1737_v20 }
 0x14e   : > { %3464 = vrsqrt.f32 %v4587_v31  ;;  %v1296_v18 = vsel %vm1295_vm14, %v4556_v13, %v1294_v10  ;;  %v1301_v11 = vmul.f32 %v3451_v16, %v4568_v21  ;;  %v4677_v28 = vpop.f32.mrb[14].mxu0  ;;  %v4679_v29 = vpop.f32.mrb[14].mxu1  ;;  %v2234_v35 = vadd.f32 1.0, %v1740_v26 }
 0x14f   : > { %v3453_v34 = vpop.eup %3452  ;;  %v1299_v36 = vsel %vm1297_vm15, %v1298_v43, %v1296_v18  ;;  %v1744_v12 = vsel %vm1743_vm0, %v4559_v15, %v1742_v24  ;;  %v4688_v40 = vpop.f32.mrb[15].mxu0  ;;  %3466 = vrsqrt.f32 %v2170_v25  ;;  %v4723_v14 = vmul.f32 3.0, %v1086_v63 }
 0x150   : > { %v4690_v41 = vpop.f32.mrb[15].mxu1  ;;  %v2171_v42 = vadd.f32 1.0, %v1299_v36  ;;  %v1747_v44 = vsel %vm1745_vm1, %v1746_v61, %v1744_v12  ;;  %v1303_v13 = vsel %vm1302_vm2, %v4568_v21, %v1301_v11  ;;  %3468 = vrsqrt.f32 %v2234_v35 }
 0x151   : > { %v2235_v43 = vadd.f32 1.0, %v1747_v44  ;;  %v1306_v45 = vsel %vm1304_vm3, %v1305_v1, %v1303_v13  ;;  %v1749_v46 = vmul.f32 %v3453_v34, %v4581_v27  ;;  %v1023_v16 = vmax.f32 %v4570_v22, 0.0 }
 0x152   : > { %v3455_v47 = vpop.eup %3454  ;;  %3470 = vrsqrt.f32 %v2171_v42  ;;  %v2172_v48 = vadd.f32 1.0, %v1306_v45  ;;  %v4703_v15 = vpop.f32.mrb[16].mxu0  ;;  %vm1757_vm8 = vcmp.eq.f32.partialorder %v4587_v31, inf  ;;  %v1760_v36 = vand.u32 2147483648, %v4587_v31 }
 0x153   : > { %v4705_v49 = vpop.f32.mrb[16].mxu1  ;;  %v3457_v52 = vpop.eup %3456  ;;  %v2424_v53 = vmul.f32 %v3455_v47, %v3455_v47  ;;  %3472 = vrsqrt.f32 %v2235_v43  ;;  %v1751_v21 = vsel %vm1750_vm4, %v4581_v27, %v1749_v46  ;;  %vm1759_vm9 = vcmp.eq.f32.partialorder %v4587_v31, 0.0 }
 0x154   : > { %v4715_v57 = vpop.f32.mrb[17].mxu0  ;;  %v4717_v58 = vpop.f32.mrb[17].mxu1  ;;  %v2488_v62 = vmul.f32 %v3457_v52, %v3457_v52  ;;  %3474 = vrsqrt.f32 %v2172_v48  ;;  %v1754_v59 = vsel %vm1752_vm5, %v1753_v5, %v1751_v21  ;;  %vm1316_vm10 = vcmp.eq.f32.partialorder %v4686_v39, inf }
 0x155   : > { %v3459_v61 = vpop.eup %3458  ;;  %v2552_v1 = vmul.f32 %v2424_v53, %v2424_v53  ;;  %v2236_v4 = vadd.f32 1.0, %v1754_v59  ;;  %3476 = vrsqrt.f32 %v4686_v39  ;;  %v4756_v53 = vmul.f32 3.0, %v1023_v16 }
 0x156   : > { %v3461_v0 = vpop.eup %3460  ;;  %v2425_v3 = vmul.f32 %v3459_v61, %v3459_v61  ;;  %v2616_v9 = vmul.f32 %v2488_v62, %v2488_v62  ;;  %v4726_v17 = vpop.f32.mrb[18].mxu0  ;;  %vm1318_vm11 = vcmp.eq.f32.partialorder %v4686_v39, 0.0  ;;  %vm1764_vm12 = vcmp.eq.f32.partialorder %v4723_v14, inf }
 0x157   : > { %v3463_v8 = vpop.eup %3462  ;;  %v2489_v10 = vmul.f32 %v3461_v0, %v3461_v0  ;;  %v4728_v27 = vpop.f32.mrb[18].mxu1  ;;  %v2680_v19 = vmul.f32 %v3455_v47, %v2552_v1  ;;  %3478 = vrsqrt.f32 %v2236_v4  ;;  %v1024_v1 = vmax.f32 %v4589_v32, 0.0 }
 0x158   : > { %v3465_v5 = vpop.eup %3464  ;;  %v2553_v20 = vmul.f32 %v2425_v3, %v2425_v3  ;;  %v1308_v24 = vmul.f32 %v3463_v8, %v4585_v30  ;;  %v4731_v25 = vpop.f32.mrb[19].mxu0  ;;  %v2744_v18 = vmul.f32 %v3457_v52, %v2616_v9  ;;  %3480 = vrsqrt.f32 %v4723_v14 }
 0x159   : > { %v4733_v26 = vpop.f32.mrb[19].mxu1  ;;  %v2617_v11 = vmul.f32 %v2489_v10, %v2489_v10  ;;  %v1756_v34 = vmul.f32 %v3465_v5, %v4587_v31  ;;  %2808 = vst [vmem:[%s4738_s4] sm:$0xff] %v2680_v19  ;;  %v3467_v12 = vpop.eup %3466  ;;  %vm1766_vm13 = vcmp.eq.f32.partialorder %v4723_v14, 0.0  ;;  %vm1323_vm14 = vcmp.eq.f32.partialorder %v4756_v53, inf }
 0x15a   : > { %v2681_v22 = vmul.f32 %v3459_v61, %v2553_v20  ;;  %v1310_v35 = vsel %vm1309_vm6, %v4585_v30, %v1308_v24  ;;  %2872 = vst [vmem:[%s4738_s4 + $0x200] sm:$0xff] %v2744_v18  ;;  %v4751_v43 = vpop.f32.mrb[20].mxu0  ;;  %v4753_v45 = vpop.f32.mrb[20].mxu1  ;;  %v2426_v47 = vmul.f32 %v3467_v12, %v3467_v12  ;;  %vm1325_vm15 = vcmp.eq.f32.partialorder %v4756_v53, 0.0 }
 0x15b   : > { %v2745_v42 = vmul.f32 %v3461_v0, %v2617_v11  ;;  %v1313_v44 = vsel %vm1311_vm7, %v1312_v54, %v1310_v35  ;;  %v1758_v13 = vsel %vm1757_vm8, %v4587_v31, %v1756_v34  ;;  %v3469_v46 = vpop.eup %3468  ;;  %v4758_v21 = vpop.f32.mrb[21].mxu0  ;;  %v1087_v31 = vmax.f32 %v4572_v23, 0.0 }
 0x15c   : > { %2809 = vst [vmem:[%s4738_s4 + $0x8] sm:$0xff] %v2681_v22  ;;  %v2173_v48 = vadd.f32 1.0, %v1313_v44  ;;  %v1761_v52 = vsel %vm1759_vm9, %v1760_v36, %v1758_v13  ;;  %v4760_v61 = vpop.f32.mrb[21].mxu1  ;;  %v3471_v30 = vpop.eup %3470  ;;  %v2490_v54 = vmul.f32 %v3469_v46, %v3469_v46  ;;  %v2554_v63 = vmul.f32 %v2426_v47, %v2426_v47 }
 0x15d   : > { %2873 = vst [vmem:[%s4738_s4 + $0x208] sm:$0xff] %v2745_v42  ;;  %v2237_v62 = vadd.f32 1.0, %v1761_v52  ;;  %v3473_v59 = vpop.eup %3472  ;;  %v2427_v0 = vmul.f32 %v3471_v30, %v3471_v30  ;;  %v1319_v34 = vand.u32 2147483648, %v4686_v39  ;;  %v4781_v42 = vmul.f32 3.0, %v1024_v1 }
 0x15e   : > { %3482 = vrsqrt.f32 %v2173_v48  ;;  %v3475_v3 = vpop.eup %3474  ;;  %v2618_v4 = vmul.f32 %v2490_v54, %v2490_v54  ;;  %v2491_v8 = vmul.f32 %v3473_v59, %v3473_v59  ;;  %v4767_v9 = vpop.f32.mrb[22].mxu0  ;;  %v2682_v5 = vmul.f32 %v3467_v12, %v2554_v63 }
 0x15f   : > { %3484 = vrsqrt.f32 %v2237_v62  ;;  %v4769_v10 = vpop.f32.mrb[22].mxu1  ;;  %v3477_v16 = vpop.eup %3476  ;;  %v2555_v23 = vmul.f32 %v2427_v0, %v2427_v0  ;;  %v2428_v19 = vmul.f32 %v3475_v3, %v3475_v3  ;;  %v4779_v12 = vmul.f32 3.0, %v1087_v31 }
 0x160   : > { %3486 = vrsqrt.f32 %v4756_v53  ;;  %v4772_v20 = vpop.f32.mrb[23].mxu0  ;;  %v4774_v32 = vpop.f32.mrb[23].mxu1  ;;  %v2746_v24 = vmul.f32 %v3469_v46, %v2618_v4  ;;  %v2619_v18 = vmul.f32 %v2491_v8, %v2491_v8  ;;  %v1315_v11 = vmul.f32 %v3477_v16, %v4686_v39  ;;  %2810 = vst [vmem:[%s4738_s4 + $0x10] sm:$0xff] %v2682_v5 }
 0x161   : > { %v3479_v22 = vpop.eup %3478  ;;  %v2683_v35 = vmul.f32 %v3471_v30, %v2555_v23  ;;  %v2556_v36 = vmul.f32 %v2428_v19, %v2428_v19  ;;  %v1088_v48 = vmax.f32 %v4591_v33, 0.0  ;;  %3488 = vrsqrt.f32 %v4779_v12 }
 0x162   : > { %v3481_v44 = vpop.eup %3480  ;;  %2874 = vst [vmem:[%s4738_s4 + $0x210] sm:$0xff] %v2746_v24  ;;  %v2747_v13 = vmul.f32 %v3473_v59, %v2619_v18  ;;  %v2492_v47 = vmul.f32 %v3479_v22, %v3479_v22  ;;  %v1317_v46 = vsel %vm1316_vm10, %v4686_v39, %v1315_v11  ;;  %v4788_v52 = vpop.f32.mrb[24].mxu0  ;;  %v1767_v1 = vand.u32 2147483648, %v4723_v14 }
 0x163   : > { %v4790_v30 = vpop.f32.mrb[24].mxu1  ;;  %2811 = vst [vmem:[%s4738_s4 + $0x18] sm:$0xff] %v2683_v35  ;;  %v2684_v54 = vmul.f32 %v3475_v3, %v2556_v36  ;;  %v1320_v62 = vsel %vm1318_vm11, %v1319_v34, %v1317_v46  ;;  %v1763_v31 = vmul.f32 %v3481_v44, %v4723_v14  ;;  %v4797_v59 = vpop.f32.mrb[25].mxu0  ;;  %3490 = vrsqrt.f32 %v4781_v42 }
 0x164   : > { %v4799_v63 = vpop.f32.mrb[25].mxu1  ;;  %2875 = vst [vmem:[%s4738_s4 + $0x218] sm:$0xff] %v2747_v13  ;;  %v2620_v0 = vmul.f32 %v2492_v47, %v2492_v47  ;;  %v2174_v33 = vadd.f32 1.0, %v1320_v62  ;;  %v4814_v19 = vmul.f32 3.0, %v1088_v48  ;;  %vm1771_vm0 = vcmp.eq.f32.partialorder %v4779_v12, inf }
 0x165   : > { %2812 = vst [vmem:[%s4738_s4 + $0x20] sm:$0xff] %v2684_v54  ;;  %v1765_v3 = vsel %vm1764_vm12, %v4723_v14, %v1763_v31  ;;  %v1025_v14 = vmax.f32 %v4597_v37, 0.0  ;;  %v1089_v35 = vmax.f32 %v4599_v38, 0.0  ;;  %vm1773_vm1 = vcmp.eq.f32.partialorder %v4779_v12, 0.0 }
 0x166   : > { %v2748_v39 = vmul.f32 %v3479_v22, %v2620_v0  ;;  %3492 = vrsqrt.f32 %v2174_v33  ;;  %v1768_v4 = vsel %vm1766_vm13, %v1767_v1, %v1765_v3  ;;  %v4809_v8 = vpop.f32.mrb[26].mxu0  ;;  %v4811_v16 = vpop.f32.mrb[26].mxu1  ;;  %v1326_v22 = vand.u32 2147483648, %v4756_v53 }
 0x167   : > { %v2238_v23 = vadd.f32 1.0, %v1768_v4  ;;  %v4817_v24 = vpop.f32.mrb[27].mxu0  ;;  %v4819_v18 = vpop.f32.mrb[27].mxu1  ;;  %v1026_v37 = vmax.f32 %v4625_v50, 0.0  ;;  %v1090_v46 = vmax.f32 %v4627_v51, 0.0  ;;  %v1774_v54 = vand.u32 2147483648, %v4779_v12 }
 0x168   : > { %v3483_v5 = vpop.eup %3482  ;;  %2876 = vst [vmem:[%s4738_s4 + $0x220] sm:$0xff] %v2748_v39  ;;  %v4831_v62 = vmul.f32 3.0, %v1025_v14  ;;  %v4833_v38 = vmul.f32 3.0, %v1089_v35  ;;  %vm1330_vm2 = vcmp.eq.f32.partialorder %v4781_v42, inf  ;;  %vm1332_vm3 = vcmp.eq.f32.partialorder %v4781_v42, 0.0 }
 0x169   : > { %v3485_v11 = vpop.eup %3484  ;;  %v2429_v34 = vmul.f32 %v3483_v5, %v3483_v5  ;;  %3494 = vrsqrt.f32 %v2238_v23  ;;  %v4847_v39 = vmul.f32 3.0, %v1026_v37  ;;  %v1333_v23 = vand.u32 2147483648, %v4781_v42 }
 0x16a   : > { %v3487_v36 = vpop.eup %3486  ;;  %v2493_v44 = vmul.f32 %v3485_v11, %v3485_v11  ;;  %3496 = vrsqrt.f32 %v4814_v19  ;;  %v4840_v0 = vpop.f32.mrb[28].mxu0  ;;  %v4852_v14 = vmul.f32 3.0, %v1090_v46  ;;  %vm1778_vm4 = vcmp.eq.f32.partialorder %v4814_v19, inf }
 0x16b   : > { %v2557_v13 = vmul.f32 %v2429_v34, %v2429_v34  ;;  %v1322_v47 = vmul.f32 %v3487_v36, %v4756_v53  ;;  %v4842_v51 = vpop.f32.mrb[28].mxu1  ;;  %v3489_v33 = vpop.eup %3488  ;;  %3498 = vrsqrt.f32 %v4831_v62  ;;  %vm1780_vm5 = vcmp.eq.f32.partialorder %v4814_v19, 0.0 }
 0x16c   : > { %v2621_v48 = vmul.f32 %v2493_v44, %v2493_v44  ;;  %3500 = vrsqrt.f32 %v4833_v38  ;;  %v1027_v36 = vmax.f32 %v4635_v55, 0.0  ;;  %v4864_v44 = vpop.f32.mrb[29].mxu0  ;;  %vm1337_vm6 = vcmp.eq.f32.partialorder %v4831_v62, inf }
 0x16d   : > { %v2685_v31 = vmul.f32 %v3483_v5, %v2557_v13  ;;  %v1324_v50 = vsel %vm1323_vm14, %v4756_v53, %v1322_v47  ;;  %v1770_v5 = vmul.f32 %v3489_v33, %v4779_v12  ;;  %v3491_v34 = vpop.eup %3490  ;;  %v1781_v53 = vand.u32 2147483648, %v4814_v19 }
 0x16e   : > { %v2749_v1 = vmul.f32 %v3485_v11, %v2621_v48  ;;  %v1327_v3 = vsel %vm1325_vm15, %v1326_v22, %v1324_v50  ;;  %v1329_v35 = vmul.f32 %v3491_v34, %v4781_v42  ;;  %vm1339_vm7 = vcmp.eq.f32.partialorder %v4831_v62, 0.0 }
 0x16f   : > { %2813 = vst [vmem:[%s4738_s4 + $0x28] sm:$0xff] %v2685_v31  ;;  %v2175_v4 = vadd.f32 1.0, %v1327_v3  ;;  %v1772_v22 = vsel %vm1771_vm0, %v4779_v12, %v1770_v5  ;;  %v1340_v12 = vand.u32 2147483648, %v4831_v62  ;;  %vm1785_vm8 = vcmp.eq.f32.partialorder %v4833_v38, inf }
 0x170   : > { %2877 = vst [vmem:[%s4738_s4 + $0x228] sm:$0xff] %v2749_v1  ;;  %v3493_v11 = vpop.eup %3492  ;;  %v1775_v13 = vsel %vm1773_vm1, %v1774_v54, %v1772_v22  ;;  %v1331_v46 = vsel %vm1330_vm2, %v4781_v42, %v1329_v35  ;;  %vm1787_vm9 = vcmp.eq.f32.partialorder %v4833_v38, 0.0  ;;  %v4880_v1 = vpop.f32.mrb[29].mxu1  ;;  %v4883_v5 = vmul.f32 3.0, %v1027_v36 }
 0x171   : > { %3502 = vrsqrt.f32 %v2175_v4  ;;  %v2430_v37 = vmul.f32 %v3493_v11, %v3493_v11  ;;  %v2239_v47 = vadd.f32 1.0, %v1775_v13  ;;  %v1334_v31 = vsel %vm1332_vm3, %v1333_v23, %v1331_v46 }
 0x172   : > { %3504 = vrsqrt.f32 %v4847_v39  ;;  %v2176_v33 = vadd.f32 1.0, %v1334_v31  ;;  %v1091_v42 = vmax.f32 %v4637_v56, 0.0  ;;  %v1788_v34 = vand.u32 2147483648, %v4833_v38 }
 0x173   : > { %3506 = vrsqrt.f32 %v4852_v14  ;;  %v3495_v55 = vpop.eup %3494  ;;  %v2558_v48 = vmul.f32 %v2430_v37, %v2430_v37  ;;  %vm1344_vm10 = vcmp.eq.f32.partialorder %v4847_v39, inf  ;;  %vm1346_vm11 = vcmp.eq.f32.partialorder %v4847_v39, 0.0 }
 0x174   : > { %v3497_v54 = vpop.eup %3496  ;;  %v2494_v50 = vmul.f32 %v3495_v55, %v3495_v55  ;;  %3508 = vrsqrt.f32 %v2239_v47  ;;  %v1347_v13 = vand.u32 2147483648, %v4847_v39  ;;  %vm1792_vm12 = vcmp.eq.f32.partialorder %v4852_v14, inf }
 0x175   : > { %v2686_v3 = vmul.f32 %v3493_v11, %v2558_v48  ;;  %v1777_v4 = vmul.f32 %v3497_v54, %v4814_v19  ;;  %3510 = vrsqrt.f32 %v2176_v33  ;;  %v3499_v22 = vpop.eup %3498  ;;  %v1028_v11 = vmax.f32 %v4647_v2, 0.0  ;;  %v4903_v54 = vpop.f32.mrb[30].mxu0 }
 0x176   : > { %v2622_v23 = vmul.f32 %v2494_v50, %v2494_v50  ;;  %3512 = vrsqrt.f32 %v4883_v5  ;;  %v1336_v37 = vmul.f32 %v3499_v22, %v4831_v62  ;;  %v3501_v47 = vpop.eup %3500  ;;  %v4900_v48 = vmul.f32 3.0, %v1091_v42 }
 0x177   : > { %2814 = vst [vmem:[%s4738_s4 + $0x30] sm:$0xff] %v2686_v3  ;;  %v1779_v35 = vsel %vm1778_vm4, %v4814_v19, %v1777_v4  ;;  %v1092_v31 = vmax.f32 %v4649_v60, 0.0  ;;  %v1784_v19 = vmul.f32 %v3501_v47, %v4833_v38  ;;  %vm1794_vm13 = vcmp.eq.f32.partialorder %v4852_v14, 0.0  ;;  %v4917_v4 = vpop.f32.mrb[30].mxu1 }
 0x178   : > { %v2750_v56 = vmul.f32 %v3495_v55, %v2622_v23  ;;  %v1782_v36 = vsel %vm1780_vm5, %v1781_v53, %v1779_v35  ;;  %v1338_v2 = vsel %vm1337_vm6, %v4831_v62, %v1336_v37  ;;  %v1795_v53 = vand.u32 2147483648, %v4852_v14 }
 0x179   : > { %v2240_v46 = vadd.f32 1.0, %v1782_v36  ;;  %v1341_v60 = vsel %vm1339_vm7, %v1340_v12, %v1338_v2  ;;  %vm1351_vm14 = vcmp.eq.f32.partialorder %v4883_v5, inf  ;;  %v4915_v3 = vmul.f32 3.0, %v1028_v11 }
 0x17a   : > { %2878 = vst [vmem:[%s4738_s4 + $0x230] sm:$0xff] %v2750_v56  ;;  %v2177_v23 = vadd.f32 1.0, %v1341_v60  ;;  %v1786_v22 = vsel %vm1785_vm8, %v4833_v38, %v1784_v19  ;;  %v4927_v11 = vmul.f32 3.0, %v1092_v31  ;;  %v4938_v31 = vpop.f32.mrb[31].mxu0  ;;  %vm1353_vm15 = vcmp.eq.f32.partialorder %v4883_v5, 0.0 }
 0x17b   : > { %v3503_v50 = vpop.eup %3502  ;;  %3514 = vrsqrt.f32 %v2240_v46  ;;  %v1789_v62 = vsel %vm1787_vm9, %v1788_v34, %v1786_v22  ;;  %v1029_v46 = vmax.f32 %v4654_v6, 0.0  ;;  %v4943_v6 = vpop.f32.mrb[31].mxu1  ;;  %vm1799_vm0 = vcmp.eq.f32.partialorder %v4900_v48, inf }
 0x17c   : > { %v3505_v55 = vpop.eup %3504  ;;  %v2431_v33 = vmul.f32 %v3503_v50, %v3503_v50  ;;  %3516 = vrsqrt.f32 %v4900_v48  ;;  %v2241_v37 = vadd.f32 1.0, %v1789_v62  ;;  %vm1801_vm1 = vcmp.eq.f32.partialorder %v4900_v48, 0.0 }
 0x17d   : > { %v3507_v42 = vpop.eup %3506  ;;  %v1343_v35 = vmul.f32 %v3505_v55, %v4847_v39  ;;  %3518 = vrsqrt.f32 %v2177_v23  ;;  %vm1358_vm2 = vcmp.eq.f32.partialorder %v4915_v3, inf  ;;  %vm1360_vm3 = vcmp.eq.f32.partialorder %v4915_v3, 0.0 }
 0x17e   : > { %v2559_v56 = vmul.f32 %v2431_v33, %v2431_v33  ;;  %v1791_v12 = vmul.f32 %v3507_v42, %v4852_v14  ;;  %v3509_v36 = vpop.eup %3508  ;;  %3520 = vrsqrt.f32 %v2241_v37  ;;  %v1093_v42 = vmax.f32 %v4656_v7, 0.0 }
 0x17f   : > { %v1345_v47 = vsel %vm1344_vm10, %v4847_v39, %v1343_v35  ;;  %v2495_v19 = vmul.f32 %v3509_v36, %v3509_v36  ;;  %v3511_v55 = vpop.eup %3510  ;;  %3522 = vrsqrt.f32 %v4915_v3  ;;  %vm1806_vm4 = vcmp.eq.f32.partialorder %v4927_v11, inf }
 0x180   : > { %v2687_v2 = vmul.f32 %v3503_v50, %v2559_v56  ;;  %v1348_v38 = vsel %vm1346_vm11, %v1347_v13, %v1345_v47  ;;  %v1793_v34 = vsel %vm1792_vm12, %v4852_v14, %v1791_v12  ;;  %v3513_v50 = vpop.eup %3512  ;;  %v2432_v13 = vmul.f32 %v3511_v55, %v3511_v55 }
 0x181   : > { %v2178_v33 = vadd.f32 1.0, %v1348_v38  ;;  %v1796_v60 = vsel %vm1794_vm13, %v1795_v53, %v1793_v34  ;;  %v2623_v39 = vmul.f32 %v2495_v19, %v2495_v19  ;;  %v1350_v22 = vmul.f32 %v3513_v50, %v4883_v5  ;;  %v4973_v50 = vpop.f32.mrb[32].mxu1 }
 0x182   : > { %2815 = vst [vmem:[%s4738_s4 + $0x38] sm:$0xff] %v2687_v2  ;;  %v2242_v23 = vadd.f32 1.0, %v1796_v60  ;;  %v1354_v14 = vand.u32 2147483648, %v4883_v5  ;;  %v2560_v35 = vmul.f32 %v2432_v13, %v2432_v13  ;;  %v1802_v56 = vand.u32 2147483648, %v4900_v48 }
 0x183   : > { %3524 = vrsqrt.f32 %v2178_v33  ;;  %v2751_v53 = vmul.f32 %v3509_v36, %v2623_v39  ;;  %v1352_v7 = vsel %vm1351_vm14, %v4883_v5, %v1350_v22  ;;  %v4958_v36 = vmul.f32 3.0, %v1029_v46 }
 0x184   : > { %3526 = vrsqrt.f32 %v2242_v23  ;;  %v2688_v12 = vmul.f32 %v3511_v55, %v2560_v35  ;;  %v1355_v37 = vsel %vm1353_vm15, %v1354_v14, %v1352_v7  ;;  %v4960_v47 = vmul.f32 3.0, %v1093_v42  ;;  %v4971_v42 = vpop.f32.mrb[32].mxu0 }
 0x185   : > { %3528 = vrsqrt.f32 %v4927_v11  ;;  %v3515_v62 = vpop.eup %3514  ;;  %2879 = vst [vmem:[%s4738_s4 + $0x238] sm:$0xff] %v2751_v53  ;;  %v2179_v38 = vadd.f32 1.0, %v1355_v37  ;;  %v1030_v5 = vmax.f32 %v4677_v28, 0.0  ;;  %v1094_v55 = vmax.f32 %v4679_v29, 0.0 }
 0x186   : > { %v3517_v2 = vpop.eup %3516  ;;  %v2496_v19 = vmul.f32 %v3515_v62, %v3515_v62  ;;  %2816 = vst [vmem:[%s4738_s4 + $0x40] sm:$0xff] %v2688_v12  ;;  %3530 = vrsqrt.f32 %v4958_v36  ;;  %v1361_v60 = vand.u32 2147483648, %v4915_v3  ;;  %vm1808_vm5 = vcmp.eq.f32.partialorder %v4927_v11, 0.0 }
 0x187   : > { %v1798_v34 = vmul.f32 %v3517_v2, %v4900_v48  ;;  %v3519_v46 = vpop.eup %3518  ;;  %3532 = vrsqrt.f32 %v2179_v38  ;;  %v1809_v22 = vand.u32 2147483648, %v4927_v11  ;;  %v4983_v14 = vmul.f32 3.0, %v1030_v5 }
 0x188   : > { %v2624_v33 = vmul.f32 %v2496_v19, %v2496_v19  ;;  %v2433_v28 = vmul.f32 %v3519_v46, %v3519_v46  ;;  %3534 = vrsqrt.f32 %v4960_v47  ;;  %v3521_v29 = vpop.eup %3520  ;;  %vm1365_vm6 = vcmp.eq.f32.partialorder %v4958_v36, inf }
 0x189   : > { %v1800_v39 = vsel %vm1799_vm0, %v4900_v48, %v1798_v34  ;;  %v3523_v53 = vpop.eup %3522  ;;  %v2497_v7 = vmul.f32 %v3521_v29, %v3521_v29  ;;  %v4986_v37 = vmul.f32 3.0, %v1094_v55  ;;  %vm1367_vm7 = vcmp.eq.f32.partialorder %v4958_v36, 0.0  ;;  %v4993_v34 = vpop.f32.mrb[33].mxu0 }
 0x18a   : > { %v2752_v13 = vmul.f32 %v3515_v62, %v2624_v33  ;;  %v1803_v23 = vsel %vm1801_vm1, %v1802_v56, %v1800_v39  ;;  %v2561_v35 = vmul.f32 %v2433_v28, %v2433_v28  ;;  %v1357_v19 = vmul.f32 %v3523_v53, %v4915_v3  ;;  %6558 = vst [vmem:[#allocation5_spill] sm:$0xff] %v4993_v34  ;;  %v5000_v39 = vpop.f32.mrb[33].mxu1 }
 0x18b   : > { %v2243_v12 = vadd.f32 1.0, %v1803_v23  ;;  %v1368_v48 = vand.u32 2147483648, %v4958_v36  ;;  %3536 = vrsqrt.f32 %v4983_v14  ;;  %v2625_v38 = vmul.f32 %v2497_v7, %v2497_v7 }
 0x18c   : > { %2880 = vst [vmem:[%s4738_s4 + $0x240] sm:$0xff] %v2752_v13  ;;  %v2689_v62 = vmul.f32 %v3519_v46, %v2561_v35  ;;  %v1359_v28 = vsel %vm1358_vm2, %v4915_v3, %v1357_v19  ;;  %vm1813_vm8 = vcmp.eq.f32.partialorder %v4960_v47, inf  ;;  %vm1815_vm9 = vcmp.eq.f32.partialorder %v4960_v47, 0.0 }
 0x18d   : > { %v3525_v2 = vpop.eup %3524  ;;  %3538 = vrsqrt.f32 %v2243_v12  ;;  %v2753_v46 = vmul.f32 %v3521_v29, %v2625_v38  ;;  %v1362_v23 = vsel %vm1360_vm3, %v1361_v60, %v1359_v28  ;;  %v1816_v12 = vand.u32 2147483648, %v4960_v47 }
 0x18e   : > { %v3527_v56 = vpop.eup %3526  ;;  %v2434_v5 = vmul.f32 %v3525_v2, %v3525_v2  ;;  %3540 = vrsqrt.f32 %v4986_v37  ;;  %2817 = vst [vmem:[%s4738_s4 + $0x48] sm:$0xff] %v2689_v62  ;;  %v2180_v7 = vadd.f32 1.0, %v1362_v23  ;;  %vm1372_vm10 = vcmp.eq.f32.partialorder %v4983_v14, inf }
 0x18f   : > { %v3529_v55 = vpop.eup %3528  ;;  %v2498_v33 = vmul.f32 %v3527_v56, %v3527_v56  ;;  %2881 = vst [vmem:[%s4738_s4 + $0x248] sm:$0xff] %v2753_v46  ;;  %v1031_v3 = vmax.f32 %v4688_v40, 0.0  ;;  %vm1374_vm11 = vcmp.eq.f32.partialorder %v4983_v14, 0.0  ;;  %vm1820_vm12 = vcmp.eq.f32.partialorder %v4986_v37, inf }
 0x190   : > { %v2562_v13 = vmul.f32 %v2434_v5, %v2434_v5  ;;  %v1805_v53 = vmul.f32 %v3529_v55, %v4927_v11  ;;  %v3531_v19 = vpop.eup %3530  ;;  %3542 = vrsqrt.f32 %v2180_v7  ;;  %v1096_v7 = vmax.f32 %v4705_v49, 0.0 }
 0x191   : > { %v2626_v35 = vmul.f32 %v2498_v33, %v2498_v33  ;;  %v3533_v60 = vpop.eup %3532  ;;  %v1364_v5 = vmul.f32 %v3531_v19, %v4958_v36  ;;  %v5019_v28 = vmul.f32 3.0, %v1031_v3  ;;  %v5036_v19 = vpop.f32.mrb[34].mxu0  ;;  %vm1822_vm13 = vcmp.eq.f32.partialorder %v4986_v37, 0.0 }
 0x192   : > { %v2690_v34 = vmul.f32 %v3525_v2, %v2562_v13  ;;  %v1807_v29 = vsel %vm1806_vm4, %v4927_v11, %v1805_v53  ;;  %v3535_v55 = vpop.eup %3534  ;;  %v2435_v33 = vmul.f32 %v3533_v60, %v3533_v60  ;;  %v1375_v11 = vand.u32 2147483648, %v4983_v14 }
 0x193   : > { %v2754_v62 = vmul.f32 %v3527_v56, %v2626_v35  ;;  %v1810_v38 = vsel %vm1808_vm5, %v1809_v22, %v1807_v29  ;;  %v1366_v40 = vsel %vm1365_vm6, %v4958_v36, %v1364_v5  ;;  %v1812_v56 = vmul.f32 %v3535_v55, %v4960_v47 }
 0x194   : > { %2818 = vst [vmem:[%s4738_s4 + $0x50] sm:$0xff] %v2690_v34  ;;  %v2244_v2 = vadd.f32 1.0, %v1810_v38  ;;  %v1095_v22 = vmax.f32 %v4690_v41, 0.0  ;;  %v2563_v46 = vmul.f32 %v2435_v33, %v2435_v33  ;;  %v1369_v34 = vsel %vm1367_vm7, %v1368_v48, %v1366_v40  ;;  %v5038_v41 = vpop.f32.mrb[34].mxu1 }
 0x195   : > { %2882 = vst [vmem:[%s4738_s4 + $0x250] sm:$0xff] %v2754_v62  ;;  %v1032_v13 = vmax.f32 %v4703_v15, 0.0  ;;  %v3537_v23 = vpop.eup %3536  ;;  %v2181_v53 = vadd.f32 1.0, %v1369_v34  ;;  %v1814_v35 = vsel %vm1813_vm8, %v4960_v47, %v1812_v56  ;;  %v1823_v47 = vand.u32 2147483648, %v4986_v37 }
 0x196   : > { %3544 = vrsqrt.f32 %v2244_v2  ;;  %v2691_v36 = vmul.f32 %v3533_v60, %v2563_v46  ;;  %v1817_v15 = vsel %vm1815_vm9, %v1816_v12, %v1814_v35  ;;  %v1371_v48 = vmul.f32 %v3537_v23, %v4983_v14  ;;  %v5066_v23 = vpop.f32.mrb[35].mxu1 }
 0x197   : > { %3546 = vrsqrt.f32 %v5019_v28  ;;  %v3539_v29 = vpop.eup %3538  ;;  %v2245_v38 = vadd.f32 1.0, %v1817_v15  ;;  %v5044_v5 = vmul.f32 3.0, %v1095_v22  ;;  %v5052_v12 = vmul.f32 3.0, %v1032_v13  ;;  %v5063_v22 = vpop.f32.mrb[35].mxu0 }
 0x198   : > { %v3541_v3 = vpop.eup %3540  ;;  %v2499_v62 = vmul.f32 %v3539_v29, %v3539_v29  ;;  %3548 = vrsqrt.f32 %v2181_v53  ;;  %2819 = vst [vmem:[%s4738_s4 + $0x58] sm:$0xff] %v2691_v36  ;;  %v1373_v49 = vsel %vm1372_vm10, %v4983_v14, %v1371_v48  ;;  %v5056_v2 = vmul.f32 3.0, %v1096_v7 }
 0x199   : > { %v1819_v60 = vmul.f32 %v3541_v3, %v4986_v37  ;;  %3550 = vrsqrt.f32 %v2245_v38  ;;  %v1376_v33 = vsel %vm1374_vm11, %v1375_v11, %v1373_v49  ;;  %vm1379_vm14 = vcmp.eq.f32.partialorder %v5019_v28, inf }
 0x19a   : > { %v2627_v55 = vmul.f32 %v2499_v62, %v2499_v62  ;;  %v2182_v40 = vadd.f32 1.0, %v1376_v33  ;;  %3552 = vrsqrt.f32 %v5044_v5  ;;  %v3543_v46 = vpop.eup %3542  ;;  %vm1381_vm15 = vcmp.eq.f32.partialorder %v5019_v28, 0.0 }
 0x19b   : > { %v1821_v56 = vsel %vm1820_vm12, %v4986_v37, %v1819_v60  ;;  %3554 = vrsqrt.f32 %v5052_v12  ;;  %v2436_v14 = vmul.f32 %v3543_v46, %v3543_v46  ;;  %v1382_v37 = vand.u32 2147483648, %v5019_v28 }
 0x19c   : > { %v2755_v34 = vmul.f32 %v3539_v29, %v2627_v55  ;;  %v1824_v13 = vsel %vm1822_vm13, %v1823_v47, %v1821_v56  ;;  %3556 = vrsqrt.f32 %v2182_v40  ;;  %vm1827_vm0 = vcmp.eq.f32.partialorder %v5044_v5, inf }
 0x19d   : > { %v2246_v11 = vadd.f32 1.0, %v1824_v13  ;;  %3558 = vrsqrt.f32 %v5056_v2  ;;  %v2564_v35 = vmul.f32 %v2436_v14, %v2436_v14  ;;  %v1830_v7 = vand.u32 2147483648, %v5044_v5  ;;  %v5097_v13 = vpop.f32.mrb[36].mxu0  ;;  %v5099_v14 = vpop.f32.mrb[36].mxu1 }
 0x19e   : > { %2883 = vst [vmem:[%s4738_s4 + $0x258] sm:$0xff] %v2755_v34  ;;  %vm1829_vm1 = vcmp.eq.f32.partialorder %v5044_v5, 0.0  ;;  %vm1386_vm2 = vcmp.eq.f32.partialorder %v5052_v12, inf  ;;  %v1033_v15 = vmax.f32 %v4715_v57, 0.0  ;;  %v1097_v48 = vmax.f32 %v4717_v58, 0.0 }
 0x19f   : > { %3560 = vrsqrt.f32 %v2246_v11  ;;  %v2692_v3 = vmul.f32 %v3543_v46, %v2564_v35  ;;  %vm1388_vm3 = vcmp.eq.f32.partialorder %v5052_v12, 0.0  ;;  %v1389_v38 = vand.u32 2147483648, %v5052_v12 }
 0x1a0   : > { %v3545_v53 = vpop.eup %3544  ;;  %v5082_v47 = vmul.f32 3.0, %v1033_v15  ;;  %v5084_v55 = vmul.f32 3.0, %v1097_v48  ;;  %v1034_v33 = vmax.f32 %v4726_v17, 0.0  ;;  %vm1834_vm4 = vcmp.eq.f32.partialorder %v5056_v2, inf }
 0x1a1   : > { %v3547_v29 = vpop.eup %3546  ;;  %v2500_v36 = vmul.f32 %v3545_v53, %v3545_v53  ;;  %2820 = vst [vmem:[%s4738_s4 + $0x60] sm:$0xff] %v2692_v3  ;;  %v1098_v58 = vmax.f32 %v4728_v27, 0.0  ;;  %v1035_v17 = vmax.f32 %v4731_v25, 0.0  ;;  %vm1836_vm5 = vcmp.eq.f32.partialorder %v5056_v2, 0.0 }
 0x1a2   : > { %v1378_v62 = vmul.f32 %v3547_v29, %v5019_v28  ;;  %v3549_v49 = vpop.eup %3548  ;;  %3562 = vrsqrt.f32 %v5082_v47  ;;  %v5106_v25 = vmul.f32 3.0, %v1034_v33  ;;  %vm1393_vm6 = vcmp.eq.f32.partialorder %v5082_v47, inf }
 0x1a3   : > { %v2628_v60 = vmul.f32 %v2500_v36, %v2500_v36  ;;  %v2437_v40 = vmul.f32 %v3549_v49, %v3549_v49  ;;  %v3551_v56 = vpop.eup %3550  ;;  %3564 = vrsqrt.f32 %v5084_v55  ;;  %vm1395_vm7 = vcmp.eq.f32.partialorder %v5082_v47, 0.0 }
 0x1a4   : > { %v1380_v57 = vsel %vm1379_vm14, %v5019_v28, %v1378_v62  ;;  %v3553_v11 = vpop.eup %3552  ;;  %v2501_v29 = vmul.f32 %v3551_v56, %v3551_v56  ;;  %v1837_v28 = vand.u32 2147483648, %v5056_v2  ;;  %v5109_v62 = vpop.f32.mrb[37].mxu0  ;;  %vm1841_vm8 = vcmp.eq.f32.partialorder %v5084_v55, inf }
 0x1a5   : > { %v2756_v46 = vmul.f32 %v3545_v53, %v2628_v60  ;;  %v1383_v34 = vsel %vm1381_vm15, %v1382_v37, %v1380_v57  ;;  %v2565_v35 = vmul.f32 %v2437_v40, %v2437_v40  ;;  %v3555_v27 = vpop.eup %3554  ;;  %v1826_v53 = vmul.f32 %v3553_v11, %v5044_v5  ;;  %6559 = vst [vmem:[#allocation6_spill] sm:$0xff] %v5109_v62 }
 0x1a6   : > { %v2183_v36 = vadd.f32 1.0, %v1383_v34  ;;  %v3557_v37 = vpop.eup %3556  ;;  %v2629_v48 = vmul.f32 %v2501_v29, %v2501_v29  ;;  %v1385_v3 = vmul.f32 %v3555_v27, %v5052_v12  ;;  %v5116_v34 = vmul.f32 3.0, %v1035_v17  ;;  %v5127_v17 = vpop.f32.mrb[37].mxu1 }
 0x1a7   : > { %2884 = vst [vmem:[%s4738_s4 + $0x260] sm:$0xff] %v2756_v46  ;;  %v2693_v15 = vmul.f32 %v3549_v49, %v2565_v35  ;;  %v3559_v60 = vpop.eup %3558  ;;  %v2438_v40 = vmul.f32 %v3557_v37, %v3557_v37  ;;  %v1828_v57 = vsel %vm1827_vm0, %v5044_v5, %v1826_v53  ;;  %v5114_v46 = vmul.f32 3.0, %v1098_v58 }
 0x1a8   : > { %3566 = vrsqrt.f32 %v2183_v36  ;;  %v2757_v49 = vmul.f32 %v3551_v56, %v2629_v48  ;;  %v1831_v11 = vsel %vm1829_vm1, %v1830_v7, %v1828_v57  ;;  %v1387_v35 = vsel %vm1386_vm2, %v5052_v12, %v1385_v3 }
 0x1a9   : > { %v3561_v33 = vpop.eup %3560  ;;  %2821 = vst [vmem:[%s4738_s4 + $0x68] sm:$0xff] %v2693_v15  ;;  %v1833_v29 = vmul.f32 %v3559_v60, %v5056_v2  ;;  %v2566_v36 = vmul.f32 %v2438_v40, %v2438_v40  ;;  %v2247_v62 = vadd.f32 1.0, %v1831_v11  ;;  %v1390_v58 = vsel %vm1388_vm3, %v1389_v38, %v1387_v35 }
 0x1aa   : > { %v2502_v27 = vmul.f32 %v3561_v33, %v3561_v33  ;;  %2885 = vst [vmem:[%s4738_s4 + $0x268] sm:$0xff] %v2757_v49  ;;  %v2184_v56 = vadd.f32 1.0, %v1390_v58  ;;  %3568 = vrsqrt.f32 %v5106_v25  ;;  %v1396_v15 = vand.u32 2147483648, %v5082_v47 }
 0x1ab   : > { %v1835_v5 = vsel %vm1834_vm4, %v5056_v2, %v1833_v29  ;;  %v2694_v7 = vmul.f32 %v3557_v37, %v2566_v36  ;;  %3570 = vrsqrt.f32 %v2247_v62  ;;  %vm1843_vm9 = vcmp.eq.f32.partialorder %v5084_v55, 0.0 }
 0x1ac   : > { %v2630_v53 = vmul.f32 %v2502_v27, %v2502_v27  ;;  %v1838_v12 = vsel %vm1836_vm5, %v1837_v28, %v1835_v5  ;;  %3572 = vrsqrt.f32 %v2184_v56  ;;  %v3563_v48 = vpop.eup %3562  ;;  %v1844_v28 = vand.u32 2147483648, %v5084_v55 }
 0x1ad   : > { %v2248_v38 = vadd.f32 1.0, %v1838_v12  ;;  %2822 = vst [vmem:[%s4738_s4 + $0x70] sm:$0xff] %v2694_v7  ;;  %3574 = vrsqrt.f32 %v5114_v46  ;;  %v1392_v2 = vmul.f32 %v3563_v48, %v5082_v47  ;;  %vm1400_vm10 = vcmp.eq.f32.partialorder %v5106_v25, inf  ;;  %v3565_v37 = vpop.eup %3564 }
 0x1ae   : > { %v2758_v3 = vmul.f32 %v3561_v33, %v2630_v53  ;;  %vm1402_vm11 = vcmp.eq.f32.partialorder %v5106_v25, 0.0  ;;  %v1403_v62 = vand.u32 2147483648, %v5106_v25  ;;  %v1099_v60 = vmax.f32 %v4733_v26, 0.0  ;;  %v5162_v26 = vpop.f32.mrb[38].mxu0 }
 0x1af   : > { %3576 = vrsqrt.f32 %v2248_v38  ;;  %v1394_v57 = vsel %vm1393_vm6, %v5082_v47, %v1392_v2  ;;  %v1840_v33 = vmul.f32 %v3565_v37, %v5084_v55  ;;  %v1036_v49 = vmax.f32 %v4751_v43, 0.0 }
 0x1b0   : > { %2886 = vst [vmem:[%s4738_s4 + $0x270] sm:$0xff] %v2758_v3  ;;  %3578 = vrsqrt.f32 %v5116_v34  ;;  %v1100_v11 = vmax.f32 %v4753_v45, 0.0  ;;  %v1397_v29 = vsel %vm1395_vm7, %v1396_v15, %v1394_v57  ;;  %vm1848_vm12 = vcmp.eq.f32.partialorder %v5114_v46, inf  ;;  %v5170_v45 = vpop.f32.mrb[38].mxu1 }
 0x1b1   : > { %v5160_v36 = vmul.f32 3.0, %v1099_v60  ;;  %v2185_v27 = vadd.f32 1.0, %v1397_v29  ;;  %v1842_v58 = vsel %vm1841_vm8, %v5084_v55, %v1840_v33  ;;  %vm1850_vm13 = vcmp.eq.f32.partialorder %v5114_v46, 0.0  ;;  %v5182_v55 = vpop.f32.mrb[39].mxu0  ;;  %v5197_v29 = vpop.f32.mrb[39].mxu1 }
 0x1b2   : > { %v3567_v40 = vpop.eup %3566  ;;  %v5168_v43 = vmul.f32 3.0, %v1036_v49  ;;  %v1845_v47 = vsel %vm1843_vm9, %v1844_v28, %v1842_v58  ;;  %v5175_v5 = vmul.f32 3.0, %v1100_v11  ;;  %v1851_v12 = vand.u32 2147483648, %v5114_v46 }
 0x1b3   : > { %v2439_v35 = vmul.f32 %v3567_v40, %v3567_v40  ;;  %3580 = vrsqrt.f32 %v5160_v36  ;;  %v2249_v53 = vadd.f32 1.0, %v1845_v47  ;;  %vm1407_vm14 = vcmp.eq.f32.partialorder %v5116_v34, inf }
 0x1b4   : > { %v3569_v7 = vpop.eup %3568  ;;  %3582 = vrsqrt.f32 %v2185_v27  ;;  %vm1409_vm15 = vcmp.eq.f32.partialorder %v5116_v34, 0.0  ;;  %v1410_v28 = vand.u32 2147483648, %v5116_v34  ;;  %v1037_v37 = vmax.f32 %v4758_v21, 0.0 }
 0x1b5   : > { %v2567_v56 = vmul.f32 %v2439_v35, %v2439_v35  ;;  %v3571_v38 = vpop.eup %3570  ;;  %v1399_v48 = vmul.f32 %v3569_v7, %v5106_v25  ;;  %3584 = vrsqrt.f32 %v5168_v43  ;;  %vm1855_vm0 = vcmp.eq.f32.partialorder %v5160_v36, inf }
 0x1b6   : > { %v3573_v3 = vpop.eup %3572  ;;  %v2503_v2 = vmul.f32 %v3571_v38, %v3571_v38  ;;  %3586 = vrsqrt.f32 %v2249_v53  ;;  %vm1857_vm1 = vcmp.eq.f32.partialorder %v5160_v36, 0.0  ;;  %v1858_v21 = vand.u32 2147483648, %v5160_v36 }
 0x1b7   : > { %v2695_v15 = vmul.f32 %v3567_v40, %v2567_v56  ;;  %v3575_v60 = vpop.eup %3574  ;;  %v2440_v57 = vmul.f32 %v3573_v3, %v3573_v3  ;;  %v1401_v40 = vsel %vm1400_vm10, %v5106_v25, %v1399_v48  ;;  %3588 = vrsqrt.f32 %v5175_v5 }
 0x1b8   : > { %v2631_v49 = vmul.f32 %v2503_v2, %v2503_v2  ;;  %v1404_v11 = vsel %vm1402_vm11, %v1403_v62, %v1401_v40  ;;  %v1847_v35 = vmul.f32 %v3575_v60, %v5114_v46  ;;  %vm1414_vm2 = vcmp.eq.f32.partialorder %v5168_v43, inf }
 0x1b9   : > { %2823 = vst [vmem:[%s4738_s4 + $0x78] sm:$0xff] %v2695_v15  ;;  %v3577_v33 = vpop.eup %3576  ;;  %v2568_v58 = vmul.f32 %v2440_v57, %v2440_v57  ;;  %v2186_v47 = vadd.f32 1.0, %v1404_v11  ;;  %v5204_v53 = vmul.f32 3.0, %v1037_v37  ;;  %vm1416_vm3 = vcmp.eq.f32.partialorder %v5168_v43, 0.0 }
 0x1ba   : > { %v3579_v27 = vpop.eup %3578  ;;  %v2504_v56 = vmul.f32 %v3577_v33, %v3577_v33  ;;  %v2759_v7 = vmul.f32 %v3571_v38, %v2631_v49  ;;  %v1849_v25 = vsel %vm1848_vm12, %v5114_v46, %v1847_v35  ;;  %v1417_v46 = vand.u32 2147483648, %v5168_v43 }
 0x1bb   : > { %v1406_v62 = vmul.f32 %v3579_v27, %v5116_v34  ;;  %v2696_v15 = vmul.f32 %v3573_v3, %v2568_v58  ;;  %3590 = vrsqrt.f32 %v2186_v47  ;;  %v1852_v2 = vsel %vm1850_vm13, %v1851_v12, %v1849_v25  ;;  %v5227_v58 = vpop.f32.mrb[40].mxu1 }
 0x1bc   : > { %v2632_v48 = vmul.f32 %v2504_v56, %v2504_v56  ;;  %2887 = vst [vmem:[%s4738_s4 + $0x278] sm:$0xff] %v2759_v7  ;;  %v2250_v60 = vadd.f32 1.0, %v1852_v2  ;;  %3592 = vrsqrt.f32 %v5204_v53  ;;  %vm1862_vm4 = vcmp.eq.f32.partialorder %v5175_v5, inf }
 0x1bd   : > { %v1408_v38 = vsel %vm1407_vm14, %v5116_v34, %v1406_v62  ;;  %v3581_v57 = vpop.eup %3580  ;;  %2824 = vst [vmem:[%s4738_s4 + $0x80] sm:$0xff] %v2696_v15  ;;  %v1101_v11 = vmax.f32 %v4760_v61, 0.0  ;;  %vm1864_vm5 = vcmp.eq.f32.partialorder %v5175_v5, 0.0  ;;  %v1038_v34 = vmax.f32 %v4767_v9, 0.0 }
 0x1be   : > { %v2760_v37 = vmul.f32 %v3577_v33, %v2632_v48  ;;  %v1411_v3 = vsel %vm1409_vm15, %v1410_v28, %v1408_v38  ;;  %v3583_v12 = vpop.eup %3582  ;;  %3594 = vrsqrt.f32 %v2250_v60  ;;  %v1854_v49 = vmul.f32 %v3581_v57, %v5160_v36  ;;  %v5225_v28 = vpop.f32.mrb[40].mxu0 }
 0x1bf   : > { %v2187_v40 = vadd.f32 1.0, %v1411_v3  ;;  %v3585_v35 = vpop.eup %3584  ;;  %v2441_v27 = vmul.f32 %v3583_v12, %v3583_v12  ;;  %v1865_v33 = vand.u32 2147483648, %v5175_v5  ;;  %v5233_v7 = vmul.f32 3.0, %v1101_v11  ;;  %v5251_v11 = vpop.f32.mrb[41].mxu0 }
 0x1c0   : > { %2888 = vst [vmem:[%s4738_s4 + $0x280] sm:$0xff] %v2760_v37  ;;  %v3587_v56 = vpop.eup %3586  ;;  %v1856_v47 = vsel %vm1855_vm0, %v5160_v36, %v1854_v49  ;;  %v1413_v61 = vmul.f32 %v3585_v35, %v5168_v43  ;;  %v5237_v48 = vmul.f32 3.0, %v1038_v34  ;;  %v1102_v36 = vmax.f32 %v4769_v10, 0.0  ;;  %v5257_v34 = vpop.f32.mrb[41].mxu1 }
 0x1c1   : > { %3596 = vrsqrt.f32 %v2187_v40  ;;  %v3589_v25 = vpop.eup %3588  ;;  %v2569_v62 = vmul.f32 %v2441_v27, %v2441_v27  ;;  %v2505_v15 = vmul.f32 %v3587_v56, %v3587_v56  ;;  %v1859_v9 = vsel %vm1857_vm1, %v1858_v21, %v1856_v47 }
 0x1c2   : > { %v2251_v2 = vadd.f32 1.0, %v1859_v9  ;;  %v1415_v60 = vsel %vm1414_vm2, %v5168_v43, %v1413_v61  ;;  %v1861_v38 = vmul.f32 %v3589_v25, %v5175_v5  ;;  %3598 = vrsqrt.f32 %v5233_v7 }
 0x1c3   : > { %v2697_v57 = vmul.f32 %v3583_v12, %v2569_v62  ;;  %v2633_v37 = vmul.f32 %v2505_v15, %v2505_v15  ;;  %v1418_v3 = vsel %vm1416_vm3, %v1417_v46, %v1415_v60  ;;  %v1039_v49 = vmax.f32 %v4772_v20, 0.0 }
 0x1c4   : > { %3600 = vrsqrt.f32 %v2251_v2  ;;  %v2188_v21 = vadd.f32 1.0, %v1418_v3  ;;  %v1863_v40 = vsel %vm1862_vm4, %v5175_v5, %v1861_v38  ;;  %vm1421_vm6 = vcmp.eq.f32.partialorder %v5204_v53, inf }
 0x1c5   : > { %v3591_v35 = vpop.eup %3590  ;;  %2825 = vst [vmem:[%s4738_s4 + $0x88] sm:$0xff] %v2697_v57  ;;  %v2761_v12 = vmul.f32 %v3587_v56, %v2633_v37  ;;  %v1866_v43 = vsel %vm1864_vm5, %v1865_v33, %v1863_v40  ;;  %3602 = vrsqrt.f32 %v5237_v48  ;;  %v1424_v20 = vand.u32 2147483648, %v5204_v53 }
 0x1c6   : > { %v3593_v10 = vpop.eup %3592  ;;  %v2442_v46 = vmul.f32 %v3591_v35, %v3591_v35  ;;  %3604 = vrsqrt.f32 %v2188_v21  ;;  %v2252_v27 = vadd.f32 1.0, %v1866_v43  ;;  %v5263_v61 = vmul.f32 3.0, %v1102_v36 }
 0x1c7   : > { %2889 = vst [vmem:[%s4738_s4 + $0x288] sm:$0xff] %v2761_v12  ;;  %v1420_v47 = vmul.f32 %v3593_v10, %v5204_v53  ;;  %v5265_v33 = vmul.f32 3.0, %v1039_v49  ;;  %v1103_v25 = vmax.f32 %v4774_v32, 0.0  ;;  %vm1423_vm7 = vcmp.eq.f32.partialorder %v5204_v53, 0.0  ;;  %v5281_v49 = vpop.f32.mrb[42].mxu0 }
 0x1c8   : > { %v3595_v56 = vpop.eup %3594  ;;  %v2570_v5 = vmul.f32 %v2442_v46, %v2442_v46  ;;  %3606 = vrsqrt.f32 %v2252_v27  ;;  %vm1869_vm8 = vcmp.eq.f32.partialorder %v5233_v7, inf  ;;  %vm1871_vm9 = vcmp.eq.f32.partialorder %v5233_v7, 0.0 }
 0x1c9   : > { %v2506_v62 = vmul.f32 %v3595_v56, %v3595_v56  ;;  %v1422_v15 = vsel %vm1421_vm6, %v5204_v53, %v1420_v47  ;;  %3608 = vrsqrt.f32 %v5263_v61  ;;  %v1872_v3 = vand.u32 2147483648, %v5233_v7 }
 0x1ca   : > { %v2698_v2 = vmul.f32 %v3591_v35, %v2570_v5  ;;  %v1425_v60 = vsel %vm1423_vm7, %v1424_v20, %v1422_v15  ;;  %3610 = vrsqrt.f32 %v5265_v33  ;;  %vm1428_vm10 = vcmp.eq.f32.partialorder %v5237_v48, inf  ;;  %v5283_v35 = vpop.f32.mrb[42].mxu1 }
 0x1cb   : > { %v3597_v9 = vpop.eup %3596  ;;  %v2634_v38 = vmul.f32 %v2506_v62, %v2506_v62  ;;  %v2189_v37 = vadd.f32 1.0, %v1425_v60  ;;  %vm1430_vm11 = vcmp.eq.f32.partialorder %v5237_v48, 0.0  ;;  %v5278_v53 = vmul.f32 3.0, %v1103_v25 }
 0x1cc   : > { %v2443_v57 = vmul.f32 %v3597_v9, %v3597_v9  ;;  %v3599_v32 = vpop.eup %3598  ;;  %2826 = vst [vmem:[%s4738_s4 + $0x90] sm:$0xff] %v2698_v2  ;;  %v1431_v43 = vand.u32 2147483648, %v5237_v48  ;;  %vm1876_vm12 = vcmp.eq.f32.partialorder %v5263_v61, inf  ;;  %vm1878_vm13 = vcmp.eq.f32.partialorder %v5263_v61, 0.0 }
 0x1cd   : > { %v2762_v36 = vmul.f32 %v3595_v56, %v2634_v38  ;;  %3612 = vrsqrt.f32 %v2189_v37  ;;  %v1868_v40 = vmul.f32 %v3599_v32, %v5233_v7  ;;  %v1040_v20 = vmax.f32 %v4788_v52, 0.0 }
 0x1ce   : > { %v2571_v21 = vmul.f32 %v2443_v57, %v2443_v57  ;;  %v3601_v12 = vpop.eup %3600  ;;  %3614 = vrsqrt.f32 %v5278_v53  ;;  %v1104_v62 = vmax.f32 %v4790_v30, 0.0  ;;  %v1041_v15 = vmax.f32 %v4797_v59, 0.0  ;;  %v5302_v57 = vpop.f32.mrb[43].mxu0 }
 0x1cf   : > { %v3603_v10 = vpop.eup %3602  ;;  %2890 = vst [vmem:[%s4738_s4 + $0x290] sm:$0xff] %v2762_v36  ;;  %v2507_v27 = vmul.f32 %v3601_v12, %v3601_v12  ;;  %v1870_v47 = vsel %vm1869_vm8, %v5233_v7, %v1868_v40  ;;  %v5300_v38 = vmul.f32 3.0, %v1040_v20  ;;  %v1879_v37 = vand.u32 2147483648, %v5263_v61 }
 0x1d0   : > { %v2699_v46 = vmul.f32 %v3597_v9, %v2571_v21  ;;  %v3605_v56 = vpop.eup %3604  ;;  %v1873_v5 = vsel %vm1871_vm9, %v1872_v3, %v1870_v47  ;;  %v1427_v25 = vmul.f32 %v3603_v10, %v5237_v48  ;;  %vm1435_vm14 = vcmp.eq.f32.partialorder %v5265_v33, inf }
 0x1d1   : > { %v2635_v2 = vmul.f32 %v2507_v27, %v2507_v27  ;;  %v2444_v9 = vmul.f32 %v3605_v56, %v3605_v56  ;;  %v2253_v60 = vadd.f32 1.0, %v1873_v5  ;;  %v5309_v30 = vmul.f32 3.0, %v1104_v62 }
 0x1d2   : > { %2827 = vst [vmem:[%s4738_s4 + $0x98] sm:$0xff] %v2699_v46  ;;  %v3607_v52 = vpop.eup %3606  ;;  %v1429_v7 = vsel %vm1428_vm10, %v5237_v48, %v1427_v25  ;;  %vm1437_vm15 = vcmp.eq.f32.partialorder %v5265_v33, 0.0  ;;  %v5317_v20 = vmul.f32 3.0, %v1041_v15  ;;  %v1438_v5 = vand.u32 2147483648, %v5265_v33 }
 0x1d3   : > { %v3609_v59 = vpop.eup %3608  ;;  %v2763_v32 = vmul.f32 %v3601_v12, %v2635_v2  ;;  %v2572_v3 = vmul.f32 %v2444_v9, %v2444_v9  ;;  %v2508_v36 = vmul.f32 %v3607_v52, %v3607_v52  ;;  %3616 = vrsqrt.f32 %v2253_v60  ;;  %v5319_v12 = vpop.f32.mrb[43].mxu1 }
 0x1d4   : > { %v1432_v21 = vsel %vm1430_vm11, %v1431_v43, %v1429_v7  ;;  %v1875_v40 = vmul.f32 %v3609_v59, %v5263_v61  ;;  %3618 = vrsqrt.f32 %v5300_v38  ;;  %v3611_v10 = vpop.eup %3610  ;;  %v1105_v15 = vmax.f32 %v4799_v63, 0.0 }
 0x1d5   : > { %2891 = vst [vmem:[%s4738_s4 + $0x298] sm:$0xff] %v2763_v32  ;;  %v2700_v46 = vmul.f32 %v3605_v56, %v2572_v3  ;;  %v2636_v27 = vmul.f32 %v2508_v36, %v2508_v36  ;;  %v2190_v47 = vadd.f32 1.0, %v1432_v21  ;;  %v1434_v43 = vmul.f32 %v3611_v10, %v5265_v33  ;;  %v5342_v32 = vpop.f32.mrb[44].mxu0  ;;  %v5349_v36 = vpop.f32.mrb[44].mxu1 }
 0x1d6   : > { %v1877_v48 = vsel %vm1876_vm12, %v5263_v61, %v1875_v40  ;;  %3620 = vrsqrt.f32 %v5309_v30  ;;  %vm1883_vm0 = vcmp.eq.f32.partialorder %v5278_v53, inf  ;;  %vm1885_vm1 = vcmp.eq.f32.partialorder %v5278_v53, 0.0 }
 0x1d7   : > { %v3613_v25 = vpop.eup %3612  ;;  %2828 = vst [vmem:[%s4738_s4 + $0xa0] sm:$0xff] %v2700_v46  ;;  %v2764_v56 = vmul.f32 %v3607_v52, %v2636_v27  ;;  %3622 = vrsqrt.f32 %v2190_v47  ;;  %v1880_v62 = vsel %vm1878_vm13, %v1879_v37, %v1877_v48  ;;  %v1436_v7 = vsel %vm1435_vm14, %v5265_v33, %v1434_v43 }
 0x1d8   : > { %v3615_v2 = vpop.eup %3614  ;;  %v2445_v9 = vmul.f32 %v3613_v25, %v3613_v25  ;;  %v2254_v60 = vadd.f32 1.0, %v1880_v62  ;;  %v1439_v59 = vsel %vm1437_vm15, %v1438_v5, %v1436_v7  ;;  %3624 = vrsqrt.f32 %v5317_v20  ;;  %v5363_v62 = vpop.f32.mrb[45].mxu0 }
 0x1d9   : > { %2892 = vst [vmem:[%s4738_s4 + $0x2a0] sm:$0xff] %v2764_v56  ;;  %v1882_v52 = vmul.f32 %v3615_v2, %v5278_v53  ;;  %v2191_v61 = vadd.f32 1.0, %v1439_v59  ;;  %v1886_v37 = vand.u32 2147483648, %v5278_v53  ;;  %vm1442_vm2 = vcmp.eq.f32.partialorder %v5300_v38, inf }
 0x1da   : > { %v2573_v63 = vmul.f32 %v2445_v9, %v2445_v9  ;;  %3626 = vrsqrt.f32 %v2254_v60  ;;  %vm1444_vm3 = vcmp.eq.f32.partialorder %v5300_v38, 0.0  ;;  %v5347_v33 = vmul.f32 3.0, %v1105_v15 }
 0x1db   : > { %v1884_v3 = vsel %vm1883_vm0, %v5278_v53, %v1882_v52  ;;  %3628 = vrsqrt.f32 %v2191_v61  ;;  %v1042_v10 = vmax.f32 %v4809_v8, 0.0  ;;  %v1445_v47 = vand.u32 2147483648, %v5300_v38 }
 0x1dc   : > { %v2701_v21 = vmul.f32 %v3613_v25, %v2573_v63  ;;  %v1887_v40 = vsel %vm1885_vm1, %v1886_v37, %v1884_v3  ;;  %vm1890_vm4 = vcmp.eq.f32.partialorder %v5309_v30, inf  ;;  %3630 = vrsqrt.f32 %v5347_v33  ;;  %v5379_v37 = vpop.f32.mrb[45].mxu1 }
 0x1dd   : > { %v3617_v46 = vpop.eup %3616  ;;  %v2255_v27 = vadd.f32 1.0, %v1887_v40  ;;  %vm1892_vm5 = vcmp.eq.f32.partialorder %v5309_v30, 0.0  ;;  %v5357_v43 = vmul.f32 3.0, %v1042_v10  ;;  %v1106_v5 = vmax.f32 %v4811_v16, 0.0 }
 0x1de   : > { %v3619_v53 = vpop.eup %3618  ;;  %2829 = vst [vmem:[%s4738_s4 + $0xa8] sm:$0xff] %v2701_v21  ;;  %v2509_v48 = vmul.f32 %v3617_v46, %v3617_v46  ;;  %v1893_v25 = vand.u32 2147483648, %v5309_v30  ;;  %v1043_v56 = vmax.f32 %v4817_v24, 0.0  ;;  %vm1449_vm6 = vcmp.eq.f32.partialorder %v5317_v20, inf }
 0x1df   : > { %3632 = vrsqrt.f32 %v2255_v27  ;;  %v1441_v8 = vmul.f32 %v3619_v53, %v5300_v38  ;;  %vm1451_vm7 = vcmp.eq.f32.partialorder %v5317_v20, 0.0  ;;  %v1452_v24 = vand.u32 2147483648, %v5317_v20 }
 0x1e0   : > { %v3621_v15 = vpop.eup %3620  ;;  %v2637_v2 = vmul.f32 %v2509_v48, %v2509_v48  ;;  %3634 = vrsqrt.f32 %v5357_v43  ;;  %v5373_v7 = vmul.f32 3.0, %v1106_v5  ;;  %v5377_v61 = vmul.f32 3.0, %v1043_v56 }
 0x1e1   : > { %v3623_v9 = vpop.eup %3622  ;;  %v1443_v16 = vsel %vm1442_vm2, %v5300_v38, %v1441_v8  ;;  %v1889_v60 = vmul.f32 %v3621_v15, %v5309_v30  ;;  %vm1897_vm8 = vcmp.eq.f32.partialorder %v5347_v33, inf  ;;  %vm1899_vm9 = vcmp.eq.f32.partialorder %v5347_v33, 0.0 }
 0x1e2   : > { %v2765_v59 = vmul.f32 %v3617_v46, %v2637_v2  ;;  %v2446_v52 = vmul.f32 %v3623_v9, %v3623_v9  ;;  %v1446_v63 = vsel %vm1444_vm3, %v1445_v47, %v1443_v16  ;;  %v3625_v3 = vpop.eup %3624  ;;  %3636 = vrsqrt.f32 %v5373_v7 }
 0x1e3   : > { %v2192_v21 = vadd.f32 1.0, %v1446_v63  ;;  %v1891_v40 = vsel %vm1890_vm4, %v5309_v30, %v1889_v60  ;;  %v1448_v27 = vmul.f32 %v3625_v3, %v5317_v20  ;;  %v1107_v48 = vmax.f32 %v4819_v18, 0.0 }
 0x1e4   : > { %v3627_v10 = vpop.eup %3626  ;;  %2893 = vst [vmem:[%s4738_s4 + $0x2a8] sm:$0xff] %v2765_v59  ;;  %v2574_v46 = vmul.f32 %v2446_v52, %v2446_v52  ;;  %v1894_v38 = vsel %vm1892_vm5, %v1893_v25, %v1891_v40  ;;  %v1900_v15 = vand.u32 2147483648, %v5347_v33  ;;  %vm1456_vm10 = vcmp.eq.f32.partialorder %v5357_v43, inf }
 0x1e5   : > { %v2510_v47 = vmul.f32 %v3627_v10, %v3627_v10  ;;  %3638 = vrsqrt.f32 %v2192_v21  ;;  %v2256_v53 = vadd.f32 1.0, %v1894_v38  ;;  %v3629_v5 = vpop.eup %3628  ;;  %v1450_v56 = vsel %vm1449_vm6, %v5317_v20, %v1448_v27  ;;  %v5406_v21 = vpop.f32.mrb[46].mxu0 }
 0x1e6   : > { %v2702_v8 = vmul.f32 %v3623_v9, %v2574_v46  ;;  %3640 = vrsqrt.f32 %v5377_v61  ;;  %v3631_v30 = vpop.eup %3630  ;;  %v2447_v2 = vmul.f32 %v3629_v5, %v3629_v5  ;;  %v1453_v16 = vsel %vm1451_vm7, %v1452_v24, %v1450_v56  ;;  %v5408_v20 = vpop.f32.mrb[46].mxu1 }
 0x1e7   : > { %v2638_v25 = vmul.f32 %v2510_v47, %v2510_v47  ;;  %3642 = vrsqrt.f32 %v2256_v53  ;;  %v2193_v60 = vadd.f32 1.0, %v1453_v16  ;;  %v1896_v18 = vmul.f32 %v3631_v30, %v5347_v33 }
 0x1e8   : > { %2830 = vst [vmem:[%s4738_s4 + $0xb0] sm:$0xff] %v2702_v8  ;;  %vm1458_vm11 = vcmp.eq.f32.partialorder %v5357_v43, 0.0  ;;  %v2575_v52 = vmul.f32 %v2447_v2, %v2447_v2  ;;  %v5403_v63 = vmul.f32 3.0, %v1107_v48  ;;  %v1044_v3 = vmax.f32 %v4840_v0, 0.0  ;;  %v5421_v8 = vpop.f32.mrb[47].mxu0 }
 0x1e9   : > { %v3633_v9 = vpop.eup %3632  ;;  %v2766_v59 = vmul.f32 %v3627_v10, %v2638_v25  ;;  %3644 = vrsqrt.f32 %v2193_v60  ;;  %v1898_v46 = vsel %vm1897_vm8, %v5347_v33, %v1896_v18  ;;  %v1108_v38 = vmax.f32 %v4842_v51, 0.0 }
 0x1ea   : > { %v3635_v24 = vpop.eup %3634  ;;  %v2511_v40 = vmul.f32 %v3633_v9, %v3633_v9  ;;  %v2703_v10 = vmul.f32 %v3629_v5, %v2575_v52  ;;  %v1901_v27 = vsel %vm1899_vm9, %v1900_v15, %v1898_v46  ;;  %3646 = vrsqrt.f32 %v5403_v63 }
 0x1eb   : > { %2894 = vst [vmem:[%s4738_s4 + $0x2b0] sm:$0xff] %v2766_v59  ;;  %v1455_v0 = vmul.f32 %v3635_v24, %v5357_v43  ;;  %v2257_v53 = vadd.f32 1.0, %v1901_v27  ;;  %v1459_v48 = vand.u32 2147483648, %v5357_v43  ;;  %vm1904_vm12 = vcmp.eq.f32.partialorder %v5373_v7, inf }
 0x1ec   : > { %v2639_v47 = vmul.f32 %v2511_v40, %v2511_v40  ;;  %v3637_v56 = vpop.eup %3636  ;;  %2831 = vst [vmem:[%s4738_s4 + $0xb8] sm:$0xff] %v2703_v10  ;;  %vm1906_vm13 = vcmp.eq.f32.partialorder %v5373_v7, 0.0  ;;  %v5428_v33 = vmul.f32 3.0, %v1044_v3  ;;  %v5430_v5 = vmul.f32 3.0, %v1108_v38  ;;  %v5448_v40 = vpop.f32.mrb[47].mxu1 }
 0x1ed   : > { %v1457_v51 = vsel %vm1456_vm10, %v5357_v43, %v1455_v0  ;;  %3648 = vrsqrt.f32 %v2257_v53  ;;  %v1903_v25 = vmul.f32 %v3637_v56, %v5373_v7  ;;  %v1907_v60 = vand.u32 2147483648, %v5373_v7 }
 0x1ee   : > { %v2767_v15 = vmul.f32 %v3633_v9, %v2639_v47  ;;  %v1460_v30 = vsel %vm1458_vm11, %v1459_v48, %v1457_v51  ;;  %vm1463_vm14 = vcmp.eq.f32.partialorder %v5377_v61, inf  ;;  %3650 = vrsqrt.f32 %v5428_v33 }
 0x1ef   : > { %v3639_v2 = vpop.eup %3638  ;;  %v2194_v16 = vadd.f32 1.0, %v1460_v30  ;;  %v1905_v9 = vsel %vm1904_vm12, %v5373_v7, %v1903_v25  ;;  %vm1465_vm15 = vcmp.eq.f32.partialorder %v5377_v61, 0.0  ;;  %3652 = vrsqrt.f32 %v5430_v5 }
 0x1f0   : > { %v3641_v18 = vpop.eup %3640  ;;  %2895 = vst [vmem:[%s4738_s4 + $0x2b8] sm:$0xff] %v2767_v15  ;;  %v2448_v59 = vmul.f32 %v3639_v2, %v3639_v2  ;;  %v1908_v52 = vsel %vm1906_vm13, %v1907_v60, %v1905_v9  ;;  %v1466_v24 = vand.u32 2147483648, %v5377_v61  ;;  %vm1911_vm0 = vcmp.eq.f32.partialorder %v5403_v63, inf }
 0x1f1   : > { %v3643_v43 = vpop.eup %3642  ;;  %3654 = vrsqrt.f32 %v2194_v16  ;;  %v1462_v3 = vmul.f32 %v3641_v18, %v5377_v61  ;;  %v2258_v10 = vadd.f32 1.0, %v1908_v52  ;;  %vm1913_vm1 = vcmp.eq.f32.partialorder %v5403_v63, 0.0  ;;  %v5469_v18 = vpop.f32.mrb[48].mxu0 }
 0x1f2   : > { %v2576_v46 = vmul.f32 %v2448_v59, %v2448_v59  ;;  %v2512_v38 = vmul.f32 %v3643_v43, %v3643_v43  ;;  %v1045_v7 = vmax.f32 %v4864_v44, 0.0  ;;  %v1109_v0 = vmax.f32 %v4880_v1, 0.0  ;;  %v5478_v52 = vpop.f32.mrb[48].mxu1 }
 0x1f3   : > { %v1464_v27 = vsel %vm1463_vm14, %v5377_v61, %v1462_v3  ;;  %v3645_v47 = vpop.eup %3644  ;;  %3656 = vrsqrt.f32 %v2258_v10  ;;  %v1914_v1 = vand.u32 2147483648, %v5403_v63  ;;  %vm1470_vm2 = vcmp.eq.f32.partialorder %v5428_v33, inf }
 0x1f4   : > { %v2704_v53 = vmul.f32 %v3639_v2, %v2576_v46  ;;  %v2640_v48 = vmul.f32 %v2512_v38, %v2512_v38  ;;  %v1467_v56 = vsel %vm1465_vm15, %v1466_v24, %v1464_v27  ;;  %v3647_v51 = vpop.eup %3646  ;;  %v2449_v15 = vmul.f32 %v3645_v47, %v3645_v47 }
 0x1f5   : > { %v2195_v30 = vadd.f32 1.0, %v1467_v56  ;;  %v5459_v25 = vmul.f32 3.0, %v1045_v7  ;;  %v5461_v16 = vmul.f32 3.0, %v1109_v0  ;;  %v1910_v44 = vmul.f32 %v3647_v51, %v5403_v63 }
 0x1f6   : > { %2832 = vst [vmem:[%s4738_s4 + $0xc0] sm:$0xff] %v2704_v53  ;;  %v2768_v60 = vmul.f32 %v3643_v43, %v2640_v48  ;;  %v2577_v2 = vmul.f32 %v2449_v15, %v2449_v15  ;;  %vm1472_vm3 = vcmp.eq.f32.partialorder %v5428_v33, 0.0  ;;  %v1046_v61 = vmax.f32 %v4903_v54, 0.0 }
 0x1f7   : > { %3658 = vrsqrt.f32 %v2195_v30  ;;  %v3649_v59 = vpop.eup %3648  ;;  %v1912_v9 = vsel %vm1911_vm0, %v5403_v63, %v1910_v44  ;;  %v1473_v43 = vand.u32 2147483648, %v5428_v33  ;;  %vm1918_vm4 = vcmp.eq.f32.partialorder %v5430_v5, inf  ;;  %v5491_v63 = vpop.f32.mrb[49].mxu0 }
 0x1f8   : > { %2896 = vst [vmem:[%s4738_s4 + $0x2c0] sm:$0xff] %v2768_v60  ;;  %3660 = vrsqrt.f32 %v5459_v25  ;;  %v3651_v3 = vpop.eup %3650  ;;  %v2705_v24 = vmul.f32 %v3645_v47, %v2577_v2  ;;  %v2513_v54 = vmul.f32 %v3649_v59, %v3649_v59  ;;  %v1915_v46 = vsel %vm1913_vm1, %v1914_v1, %v1912_v9  ;;  %v5497_v30 = vpop.f32.mrb[49].mxu1 }
 0x1f9   : > { %3662 = vrsqrt.f32 %v5461_v16  ;;  %v3653_v38 = vpop.eup %3652  ;;  %v2259_v10 = vadd.f32 1.0, %v1915_v46  ;;  %v1469_v27 = vmul.f32 %v3651_v3, %v5428_v33  ;;  %vm1920_vm5 = vcmp.eq.f32.partialorder %v5430_v5, 0.0 }
 0x1fa   : > { %v1110_v7 = vmax.f32 %v4917_v4, 0.0  ;;  %2833 = vst [vmem:[%s4738_s4 + $0xc8] sm:$0xff] %v2705_v24  ;;  %v2641_v53 = vmul.f32 %v2513_v54, %v2513_v54  ;;  %v1917_v48 = vmul.f32 %v3653_v38, %v5430_v5  ;;  %v1921_v47 = vand.u32 2147483648, %v5430_v5 }
 0x1fb   : > { %v3655_v0 = vpop.eup %3654  ;;  %v5489_v56 = vmul.f32 3.0, %v1046_v61  ;;  %3664 = vrsqrt.f32 %v2259_v10  ;;  %v1471_v15 = vsel %vm1470_vm2, %v5428_v33, %v1469_v27  ;;  %v1047_v4 = vmax.f32 %v4938_v31, 0.0 }
 0x1fc   : > { %v2450_v51 = vmul.f32 %v3655_v0, %v3655_v0  ;;  %v2769_v60 = vmul.f32 %v3649_v59, %v2641_v53  ;;  %v1474_v44 = vsel %vm1472_vm3, %v1473_v43, %v1471_v15  ;;  %v1919_v1 = vsel %vm1918_vm4, %v5430_v5, %v1917_v48 }
 0x1fd   : > { %3666 = vrsqrt.f32 %v5489_v56  ;;  %v3657_v2 = vpop.eup %3656  ;;  %v2196_v9 = vadd.f32 1.0, %v1474_v44  ;;  %v1922_v3 = vsel %vm1920_vm5, %v1921_v47, %v1919_v1  ;;  %v5507_v31 = vmul.f32 3.0, %v1110_v7  ;;  %v5536_v44 = vpop.f32.mrb[50].mxu1 }
 0x1fe   : > { %v2578_v61 = vmul.f32 %v2450_v51, %v2450_v51  ;;  %2897 = vst [vmem:[%s4738_s4 + $0x2c8] sm:$0xff] %v2769_v60  ;;  %v2514_v59 = vmul.f32 %v3657_v2, %v3657_v2  ;;  %v2260_v24 = vadd.f32 1.0, %v1922_v3  ;;  %vm1477_vm6 = vcmp.eq.f32.partialorder %v5459_v25, inf  ;;  %v5534_v60 = vpop.f32.mrb[50].mxu0 }
 0x1ff   : > { %3668 = vrsqrt.f32 %v2196_v9  ;;  %vm1479_vm7 = vcmp.eq.f32.partialorder %v5459_v25, 0.0  ;;  %v1480_v43 = vand.u32 2147483648, %v5459_v25  ;;  %vm1925_vm8 = vcmp.eq.f32.partialorder %v5461_v16, inf }
 0x200   : > { %v2706_v33 = vmul.f32 %v3655_v0, %v2578_v61  ;;  %v2642_v46 = vmul.f32 %v2514_v59, %v2514_v59  ;;  %3670 = vrsqrt.f32 %v2260_v24  ;;  %v5514_v5 = vmul.f32 3.0, %v1047_v4 }
 0x201   : > { %v3659_v54 = vpop.eup %3658  ;;  %3672 = vrsqrt.f32 %v5507_v31  ;;  %v1111_v27 = vmax.f32 %v4943_v6, 0.0  ;;  %v1048_v7 = vmax.f32 %v4971_v42, 0.0  ;;  %vm1927_vm9 = vcmp.eq.f32.partialorder %v5461_v16, 0.0 }
 0x202   : > { %v3661_v38 = vpop.eup %3660  ;;  %2834 = vst [vmem:[%s4738_s4 + $0xd0] sm:$0xff] %v2706_v33  ;;  %v2451_v10 = vmul.f32 %v3659_v54, %v3659_v54  ;;  %v2770_v53 = vmul.f32 %v3657_v2, %v2642_v46  ;;  %3674 = vrsqrt.f32 %v5514_v5  ;;  %v1928_v15 = vand.u32 2147483648, %v5461_v16 }
 0x203   : > { %v3663_v0 = vpop.eup %3662  ;;  %v1476_v48 = vmul.f32 %v3661_v38, %v5459_v25  ;;  %vm1484_vm10 = vcmp.eq.f32.partialorder %v5489_v56, inf  ;;  %vm1486_vm11 = vcmp.eq.f32.partialorder %v5489_v56, 0.0  ;;  %v1487_v42 = vand.u32 2147483648, %v5489_v56 }
 0x204   : > { %v2579_v47 = vmul.f32 %v2451_v10, %v2451_v10  ;;  %v1924_v51 = vmul.f32 %v3663_v0, %v5461_v16  ;;  %2898 = vst [vmem:[%s4738_s4 + $0x2d0] sm:$0xff] %v2770_v53  ;;  %v5532_v4 = vmul.f32 3.0, %v1111_v27  ;;  %vm1932_vm12 = vcmp.eq.f32.partialorder %v5507_v31, inf }
 0x205   : > { %v1478_v6 = vsel %vm1477_vm6, %v5459_v25, %v1476_v48  ;;  %v3665_v1 = vpop.eup %3664  ;;  %v5544_v3 = vmul.f32 3.0, %v1048_v7  ;;  %vm1934_vm13 = vcmp.eq.f32.partialorder %v5507_v31, 0.0  ;;  %v1112_v38 = vmax.f32 %v4973_v50, 0.0  ;;  %v6560_v7 = vld [vmem:[#allocation5_spill] sm:$0xff] }
 0x206   : > { %v2707_v2 = vmul.f32 %v3659_v54, %v2579_v47  ;;  %v1481_v61 = vsel %vm1479_vm7, %v1480_v43, %v1478_v6  ;;  %v1926_v9 = vsel %vm1925_vm8, %v5461_v16, %v1924_v51  ;;  %v2515_v24 = vmul.f32 %v3665_v1, %v3665_v1  ;;  %v5549_v54 = vpop.f32.mrb[51].mxu0 }
 0x207   : > { %v3667_v59 = vpop.eup %3666  ;;  %v2197_v33 = vadd.f32 1.0, %v1481_v61  ;;  %v1929_v46 = vsel %vm1927_vm9, %v1928_v15, %v1926_v9  ;;  %3676 = vrsqrt.f32 %v5532_v4  ;;  %v1935_v27 = vand.u32 2147483648, %v5507_v31 }
 0x208   : > { %2835 = vst [vmem:[%s4738_s4 + $0xd8] sm:$0xff] %v2707_v2  ;;  %v2261_v25 = vadd.f32 1.0, %v1929_v46  ;;  %v1483_v43 = vmul.f32 %v3667_v59, %v5489_v56  ;;  %v2643_v10 = vmul.f32 %v2515_v24, %v2515_v24  ;;  %v1049_v0 = vmax.f32 %v6560_v7, 0.0  ;;  %v5568_v59 = vpop.f32.mrb[51].mxu1 }
 0x209   : > { %3678 = vrsqrt.f32 %v2197_v33  ;;  %v3669_v16 = vpop.eup %3668  ;;  %vm1491_vm14 = vcmp.eq.f32.partialorder %v5514_v5, inf  ;;  %vm1493_vm15 = vcmp.eq.f32.partialorder %v5514_v5, 0.0  ;;  %v1494_v61 = vand.u32 2147483648, %v5514_v5 }
 0x20a   : > { %3680 = vrsqrt.f32 %v2261_v25  ;;  %v1485_v53 = vsel %vm1484_vm10, %v5489_v56, %v1483_v43  ;;  %v3671_v48 = vpop.eup %3670  ;;  %v2771_v47 = vmul.f32 %v3665_v1, %v2643_v10  ;;  %v2452_v50 = vmul.f32 %v3669_v16, %v3669_v16 }
 0x20b   : > { %v1488_v51 = vsel %vm1486_vm11, %v1487_v42, %v1485_v53  ;;  %3682 = vrsqrt.f32 %v5544_v3  ;;  %v3673_v15 = vpop.eup %3672  ;;  %v2516_v6 = vmul.f32 %v3671_v48, %v3671_v48  ;;  %v5566_v9 = vmul.f32 3.0, %v1112_v38 }
 0x20c   : > { %v2198_v2 = vadd.f32 1.0, %v1488_v51  ;;  %v3675_v24 = vpop.eup %3674  ;;  %2899 = vst [vmem:[%s4738_s4 + $0x2d8] sm:$0xff] %v2771_v47  ;;  %v2580_v33 = vmul.f32 %v2452_v50, %v2452_v50  ;;  %v1931_v1 = vmul.f32 %v3673_v15, %v5507_v31  ;;  %vm1939_vm0 = vcmp.eq.f32.partialorder %v5532_v4, inf }
 0x20d   : > { %v5573_v56 = vmul.f32 3.0, %v1049_v0  ;;  %v2644_v42 = vmul.f32 %v2516_v6, %v2516_v6  ;;  %v1490_v46 = vmul.f32 %v3675_v24, %v5514_v5  ;;  %v1113_v25 = vmax.f32 %v5000_v39, 0.0  ;;  %v5608_v24 = vpop.f32.mrb[52].mxu1 }
 0x20e   : > { %3684 = vrsqrt.f32 %v2198_v2  ;;  %v2708_v43 = vmul.f32 %v3669_v16, %v2580_v33  ;;  %v1933_v38 = vsel %vm1932_vm12, %v5507_v31, %v1931_v1  ;;  %v1050_v10 = vmax.f32 %v5036_v19, 0.0 }
 0x20f   : > { %3686 = vrsqrt.f32 %v5566_v9  ;;  %v2772_v7 = vmul.f32 %v3671_v48, %v2644_v42  ;;  %v1936_v0 = vsel %vm1934_vm13, %v1935_v27, %v1933_v38  ;;  %v1492_v53 = vsel %vm1491_vm14, %v5514_v5, %v1490_v46  ;;  %v5597_v27 = vpop.f32.mrb[52].mxu0 }
 0x210   : > { %vm1941_vm1 = vcmp.eq.f32.partialorder %v5532_v4, 0.0  ;;  %2836 = vst [vmem:[%s4738_s4 + $0xe0] sm:$0xff] %v2708_v43  ;;  %v2262_v16 = vadd.f32 1.0, %v1936_v0  ;;  %v1495_v47 = vsel %vm1493_vm15, %v1494_v61, %v1492_v53  ;;  %v1942_v50 = vand.u32 2147483648, %v5532_v4 }
 0x211   : > { %v3677_v39 = vpop.eup %3676  ;;  %3688 = vrsqrt.f32 %v5573_v56  ;;  %2900 = vst [vmem:[%s4738_s4 + $0x2e0] sm:$0xff] %v2772_v7  ;;  %v2199_v19 = vadd.f32 1.0, %v1495_v47  ;;  %vm1498_vm2 = vcmp.eq.f32.partialorder %v5544_v3, inf  ;;  %vm1500_vm3 = vcmp.eq.f32.partialorder %v5544_v3, 0.0 }
 0x212   : > { %v1938_v31 = vmul.f32 %v3677_v39, %v5532_v4  ;;  %3690 = vrsqrt.f32 %v2262_v16  ;;  %v1501_v51 = vand.u32 2147483648, %v5544_v3  ;;  %v5600_v5 = vmul.f32 3.0, %v1113_v25 }
 0x213   : > { %v3679_v48 = vpop.eup %3678  ;;  %v5602_v15 = vmul.f32 3.0, %v1050_v10  ;;  %3692 = vrsqrt.f32 %v2199_v19  ;;  %vm1946_vm4 = vcmp.eq.f32.partialorder %v5566_v9, inf  ;;  %vm1948_vm5 = vcmp.eq.f32.partialorder %v5566_v9, 0.0  ;;  %v5616_v10 = vpop.f32.mrb[53].mxu0 }
 0x214   : > { %v3681_v6 = vpop.eup %3680  ;;  %v2453_v2 = vmul.f32 %v3679_v48, %v3679_v48  ;;  %v1940_v61 = vsel %vm1939_vm0, %v5532_v4, %v1938_v31  ;;  %3694 = vrsqrt.f32 %v5600_v5  ;;  %v1114_v38 = vmax.f32 %v5038_v41, 0.0 }
 0x215   : > { %v3683_v33 = vpop.eup %3682  ;;  %v2517_v1 = vmul.f32 %v3681_v6, %v3681_v6  ;;  %v1943_v42 = vsel %vm1941_vm1, %v1942_v50, %v1940_v61  ;;  %v1949_v0 = vand.u32 2147483648, %v5566_v9  ;;  %3696 = vrsqrt.f32 %v5602_v15 }
 0x216   : > { %v2581_v46 = vmul.f32 %v2453_v2, %v2453_v2  ;;  %v2263_v25 = vadd.f32 1.0, %v1943_v42  ;;  %v1497_v43 = vmul.f32 %v3683_v33, %v5544_v3  ;;  %v1051_v4 = vmax.f32 %v5063_v22, 0.0 }
 0x217   : > { %v2645_v7 = vmul.f32 %v2517_v1, %v2517_v1  ;;  %vm1505_vm6 = vcmp.eq.f32.partialorder %v5573_v56, inf  ;;  %vm1507_vm7 = vcmp.eq.f32.partialorder %v5573_v56, 0.0  ;;  %v5631_v2 = vmul.f32 3.0, %v1114_v38 }
 0x218   : > { %v3685_v53 = vpop.eup %3684  ;;  %v2709_v39 = vmul.f32 %v3679_v48, %v2581_v46  ;;  %3698 = vrsqrt.f32 %v2263_v25  ;;  %v1499_v16 = vsel %vm1498_vm2, %v5544_v3, %v1497_v43  ;;  %v1508_v48 = vand.u32 2147483648, %v5573_v56  ;;  %v5638_v3 = vpop.f32.mrb[53].mxu1 }
 0x219   : > { %v3687_v41 = vpop.eup %3686  ;;  %v2773_v47 = vmul.f32 %v3681_v6, %v2645_v7  ;;  %v2454_v50 = vmul.f32 %v3685_v53, %v3685_v53  ;;  %v1502_v19 = vsel %vm1500_vm3, %v1501_v51, %v1499_v16  ;;  %vm1953_vm8 = vcmp.eq.f32.partialorder %v5600_v5, inf }
 0x21a   : > { %2837 = vst [vmem:[%s4738_s4 + $0xe8] sm:$0xff] %v2709_v39  ;;  %v2200_v22 = vadd.f32 1.0, %v1502_v19  ;;  %v1945_v31 = vmul.f32 %v3687_v41, %v5566_v9  ;;  %vm1955_vm9 = vcmp.eq.f32.partialorder %v5600_v5, 0.0  ;;  %v5636_v6 = vmul.f32 3.0, %v1051_v4 }
 0x21b   : > { %v3689_v61 = vpop.eup %3688  ;;  %2901 = vst [vmem:[%s4738_s4 + $0x2e8] sm:$0xff] %v2773_v47  ;;  %v2582_v33 = vmul.f32 %v2454_v50, %v2454_v50  ;;  %v1956_v42 = vand.u32 2147483648, %v5600_v5  ;;  %v1115_v38 = vmax.f32 %v5066_v23, 0.0  ;;  %vm1512_vm10 = vcmp.eq.f32.partialorder %v5602_v15, inf }
 0x21c   : > { %3700 = vrsqrt.f32 %v2200_v22  ;;  %v1947_v51 = vsel %vm1946_vm4, %v5566_v9, %v1945_v31  ;;  %v1504_v1 = vmul.f32 %v3689_v61, %v5573_v56  ;;  %v3691_v46 = vpop.eup %3690  ;;  %v1052_v61 = vmax.f32 %v5097_v13, 0.0 }
 0x21d   : > { %v2710_v25 = vmul.f32 %v3685_v53, %v2582_v33  ;;  %v1950_v43 = vsel %vm1948_vm5, %v1949_v0, %v1947_v51  ;;  %3702 = vrsqrt.f32 %v5631_v2  ;;  %v3693_v7 = vpop.eup %3692  ;;  %v2518_v4 = vmul.f32 %v3691_v46, %v3691_v46 }
 0x21e   : > { %v2264_v39 = vadd.f32 1.0, %v1950_v43  ;;  %v1506_v16 = vsel %vm1505_vm6, %v5573_v56, %v1504_v1  ;;  %v3695_v41 = vpop.eup %3694  ;;  %v2455_v47 = vmul.f32 %v3693_v7, %v3693_v7  ;;  %v1515_v0 = vand.u32 2147483648, %v5602_v15  ;;  %v5663_v56 = vpop.f32.mrb[54].mxu0 }
 0x21f   : > { %2838 = vst [vmem:[%s4738_s4 + $0xf0] sm:$0xff] %v2710_v25  ;;  %v1509_v9 = vsel %vm1507_vm7, %v1508_v48, %v1506_v16  ;;  %3704 = vrsqrt.f32 %v5636_v6  ;;  %v2646_v23 = vmul.f32 %v2518_v4, %v2518_v4  ;;  %v1952_v50 = vmul.f32 %v3695_v41, %v5600_v5  ;;  %v3697_v19 = vpop.eup %3696  ;;  %v5665_v48 = vpop.f32.mrb[54].mxu1 }
 0x220   : > { %3706 = vrsqrt.f32 %v2264_v39  ;;  %v2201_v53 = vadd.f32 1.0, %v1509_v9  ;;  %v2583_v22 = vmul.f32 %v2455_v47, %v2455_v47  ;;  %v5659_v31 = vmul.f32 3.0, %v1115_v38  ;;  %v6561_v47 = vld [vmem:[#allocation6_spill] sm:$0xff] }
 0x221   : > { %v1116_v33 = vmax.f32 %v5099_v14, 0.0  ;;  %v2774_v1 = vmul.f32 %v3691_v46, %v2646_v23  ;;  %v1954_v25 = vsel %vm1953_vm8, %v5600_v5, %v1952_v50  ;;  %v1511_v43 = vmul.f32 %v3697_v19, %v5602_v15  ;;  %v5687_v23 = vpop.f32.mrb[55].mxu0 }
 0x222   : > { %v3699_v51 = vpop.eup %3698  ;;  %3708 = vrsqrt.f32 %v2201_v53  ;;  %v2711_v38 = vmul.f32 %v3693_v7, %v2583_v22  ;;  %v1957_v13 = vsel %vm1955_vm9, %v1956_v42, %v1954_v25  ;;  %vm1514_vm11 = vcmp.eq.f32.partialorder %v5602_v15, 0.0  ;;  %v5694_v22 = vpop.f32.mrb[55].mxu1 }
 0x223   : > { %v2519_v4 = vmul.f32 %v3699_v51, %v3699_v51  ;;  %3710 = vrsqrt.f32 %v5659_v31  ;;  %2902 = vst [vmem:[%s4738_s4 + $0x2f0] sm:$0xff] %v2774_v1  ;;  %v2265_v14 = vadd.f32 1.0, %v1957_v13  ;;  %v1513_v46 = vsel %vm1512_vm10, %v5602_v15, %v1511_v43 }
 0x224   : > { %vm1960_vm12 = vcmp.eq.f32.partialorder %v5631_v2, inf  ;;  %2839 = vst [vmem:[%s4738_s4 + $0xf8] sm:$0xff] %v2711_v38  ;;  %v1516_v16 = vsel %vm1514_vm11, %v1515_v0, %v1513_v46  ;;  %vm1962_vm13 = vcmp.eq.f32.partialorder %v5631_v2, 0.0  ;;  %v5682_v7 = vmul.f32 3.0, %v1052_v61 }
 0x225   : > { %v2647_v39 = vmul.f32 %v2519_v4, %v2519_v4  ;;  %3712 = vrsqrt.f32 %v2265_v14  ;;  %v2202_v42 = vadd.f32 1.0, %v1516_v16  ;;  %v5684_v41 = vmul.f32 3.0, %v1116_v33 }
 0x226   : > { %v3701_v5 = vpop.eup %3700  ;;  %v1053_v9 = vmax.f32 %v6561_v47, 0.0  ;;  %v1963_v19 = vand.u32 2147483648, %v5631_v2  ;;  %3714 = vrsqrt.f32 %v5682_v7  ;;  %vm1519_vm14 = vcmp.eq.f32.partialorder %v5636_v6, inf }
 0x227   : > { %v3703_v15 = vpop.eup %3702  ;;  %v2775_v53 = vmul.f32 %v3699_v51, %v2647_v39  ;;  %v2456_v50 = vmul.f32 %v3701_v5, %v3701_v5  ;;  %3716 = vrsqrt.f32 %v2202_v42  ;;  %vm1521_vm15 = vcmp.eq.f32.partialorder %v5636_v6, 0.0 }
 0x228   : > { %v1959_v0 = vmul.f32 %v3703_v15, %v5631_v2  ;;  %v1522_v1 = vand.u32 2147483648, %v5636_v6  ;;  %vm1967_vm0 = vcmp.eq.f32.partialorder %v5659_v31, inf  ;;  %3718 = vrsqrt.f32 %v5684_v41 }
 0x229   : > { %v3705_v61 = vpop.eup %3704  ;;  %2903 = vst [vmem:[%s4738_s4 + $0x2f8] sm:$0xff] %v2775_v53  ;;  %v2584_v33 = vmul.f32 %v2456_v50, %v2456_v50  ;;  %vm1969_vm1 = vcmp.eq.f32.partialorder %v5659_v31, 0.0  ;;  %v5705_v38 = vmul.f32 3.0, %v1053_v9  ;;  %v1117_v46 = vmax.f32 %v5127_v17, 0.0  ;;  %v5721_v50 = vpop.f32.mrb[56].mxu0 }
 0x22a   : > { %v3707_v51 = vpop.eup %3706  ;;  %v1961_v25 = vsel %vm1960_vm12, %v5631_v2, %v1959_v0  ;;  %v1518_v43 = vmul.f32 %v3705_v61, %v5636_v6  ;;  %v1970_v47 = vand.u32 2147483648, %v5659_v31  ;;  %vm1526_vm2 = vcmp.eq.f32.partialorder %v5682_v7, inf }
 0x22b   : > { %v2712_v4 = vmul.f32 %v3701_v5, %v2584_v33  ;;  %v2520_v13 = vmul.f32 %v3707_v51, %v3707_v51  ;;  %v1964_v14 = vsel %vm1962_vm13, %v1963_v19, %v1961_v25  ;;  %3720 = vrsqrt.f32 %v5705_v38  ;;  %v5723_v19 = vpop.f32.mrb[56].mxu1 }
 0x22c   : > { %v3709_v39 = vpop.eup %3708  ;;  %v2266_v16 = vadd.f32 1.0, %v1964_v14  ;;  %v1520_v42 = vsel %vm1519_vm14, %v5636_v6, %v1518_v43  ;;  %vm1528_vm3 = vcmp.eq.f32.partialorder %v5682_v7, 0.0  ;;  %v5725_v33 = vmul.f32 3.0, %v1117_v46 }
 0x22d   : > { %v3711_v15 = vpop.eup %3710  ;;  %2840 = vst [vmem:[%s4738_s4 + $0x100] sm:$0xff] %v2712_v4  ;;  %v2648_v9 = vmul.f32 %v2520_v13, %v2520_v13  ;;  %v2457_v5 = vmul.f32 %v3709_v39, %v3709_v39  ;;  %v1523_v2 = vsel %vm1521_vm15, %v1522_v1, %v1520_v42  ;;  %v1054_v6 = vmax.f32 %v5162_v26, 0.0 }
 0x22e   : > { %3722 = vrsqrt.f32 %v2266_v16  ;;  %v2203_v17 = vadd.f32 1.0, %v1523_v2  ;;  %v1966_v53 = vmul.f32 %v3711_v15, %v5659_v31  ;;  %v1529_v43 = vand.u32 2147483648, %v5682_v7 }
 0x22f   : > { %v2776_v0 = vmul.f32 %v3707_v51, %v2648_v9  ;;  %v2585_v61 = vmul.f32 %v2457_v5, %v2457_v5  ;;  %v3713_v1 = vpop.eup %3712  ;;  %v1118_v4 = vmax.f32 %v5170_v45, 0.0  ;;  %vm1974_vm4 = vcmp.eq.f32.partialorder %v5684_v41, inf }
 0x230   : > { %3724 = vrsqrt.f32 %v2203_v17  ;;  %v1968_v25 = vsel %vm1967_vm0, %v5659_v31, %v1966_v53  ;;  %v3715_v13 = vpop.eup %3714  ;;  %v2521_v51 = vmul.f32 %v3713_v1, %v3713_v1  ;;  %vm1976_vm5 = vcmp.eq.f32.partialorder %v5684_v41, 0.0 }
 0x231   : > { %2904 = vst [vmem:[%s4738_s4 + $0x300] sm:$0xff] %v2776_v0  ;;  %v2713_v14 = vmul.f32 %v3709_v39, %v2585_v61  ;;  %v1971_v46 = vsel %vm1969_vm1, %v1970_v47, %v1968_v25  ;;  %3726 = vrsqrt.f32 %v5725_v33  ;;  %v3717_v26 = vpop.eup %3716  ;;  %v1525_v42 = vmul.f32 %v3715_v13, %v5682_v7  ;;  %v5753_v61 = vpop.f32.mrb[57].mxu0 }
 0x232   : > { %v2267_v16 = vadd.f32 1.0, %v1971_v46  ;;  %v3719_v15 = vpop.eup %3718  ;;  %v2649_v45 = vmul.f32 %v2521_v51, %v2521_v51  ;;  %v2458_v9 = vmul.f32 %v3717_v26, %v3717_v26  ;;  %v1977_v39 = vand.u32 2147483648, %v5684_v41 }
 0x233   : > { %2841 = vst [vmem:[%s4738_s4 + $0x108] sm:$0xff] %v2713_v14  ;;  %v5742_v5 = vmul.f32 3.0, %v1054_v6  ;;  %v1527_v31 = vsel %vm1526_vm2, %v5682_v7, %v1525_v42  ;;  %v1973_v47 = vmul.f32 %v3719_v15, %v5684_v41  ;;  %v5748_v2 = vmul.f32 3.0, %v1118_v4  ;;  %v5765_v14 = vpop.f32.mrb[57].mxu1 }
 0x234   : > { %3728 = vrsqrt.f32 %v2267_v16  ;;  %v2777_v17 = vmul.f32 %v3713_v1, %v2649_v45  ;;  %v2586_v53 = vmul.f32 %v2458_v9, %v2458_v9  ;;  %v1530_v0 = vsel %vm1528_vm3, %v1529_v43, %v1527_v31 }
 0x235   : > { %3730 = vrsqrt.f32 %v5742_v5  ;;  %v3721_v6 = vpop.eup %3720  ;;  %v2204_v25 = vadd.f32 1.0, %v1530_v0  ;;  %v1975_v13 = vsel %vm1974_vm4, %v5684_v41, %v1973_v47  ;;  %vm1533_vm6 = vcmp.eq.f32.partialorder %v5705_v38, inf }
 0x236   : > { %v1055_v4 = vmax.f32 %v5182_v55, 0.0  ;;  %2905 = vst [vmem:[%s4738_s4 + $0x308] sm:$0xff] %v2777_v17  ;;  %v2714_v1 = vmul.f32 %v3717_v26, %v2586_v53  ;;  %v1978_v7 = vsel %vm1976_vm5, %v1977_v39, %v1975_v13  ;;  %v1532_v43 = vmul.f32 %v3721_v6, %v5705_v38 }
 0x237   : > { %vm1535_vm7 = vcmp.eq.f32.partialorder %v5705_v38, 0.0  ;;  %3732 = vrsqrt.f32 %v2204_v25  ;;  %v2268_v46 = vadd.f32 1.0, %v1978_v7  ;;  %v1536_v16 = vand.u32 2147483648, %v5705_v38  ;;  %v5784_v25 = vpop.f32.mrb[58].mxu1 }
 0x238   : > { %v3723_v51 = vpop.eup %3722  ;;  %vm1981_vm8 = vcmp.eq.f32.partialorder %v5725_v33, inf  ;;  %2842 = vst [vmem:[%s4738_s4 + $0x110] sm:$0xff] %v2714_v1  ;;  %v1534_v26 = vsel %vm1533_vm6, %v5705_v38, %v1532_v43  ;;  %vm1983_vm9 = vcmp.eq.f32.partialorder %v5725_v33, 0.0  ;;  %3734 = vrsqrt.f32 %v5748_v2 }
 0x239   : > { %v2522_v55 = vmul.f32 %v3723_v51, %v3723_v51  ;;  %3736 = vrsqrt.f32 %v2268_v46  ;;  %v1537_v42 = vsel %vm1535_vm7, %v1536_v16, %v1534_v26  ;;  %v5773_v15 = vmul.f32 3.0, %v1055_v4 }
 0x23a   : > { %v3725_v41 = vpop.eup %3724  ;;  %v1119_v45 = vmax.f32 %v5197_v29, 0.0  ;;  %v2205_v47 = vadd.f32 1.0, %v1537_v42  ;;  %v1056_v17 = vmax.f32 %v5225_v28, 0.0  ;;  %v1984_v38 = vand.u32 2147483648, %v5725_v33  ;;  %v5782_v29 = vpop.f32.mrb[58].mxu0 }
 0x23b   : > { %v3727_v9 = vpop.eup %3726  ;;  %v2650_v39 = vmul.f32 %v2522_v55, %v2522_v55  ;;  %v2459_v31 = vmul.f32 %v3725_v41, %v3725_v41  ;;  %vm1540_vm10 = vcmp.eq.f32.partialorder %v5742_v5, inf  ;;  %3738 = vrsqrt.f32 %v5773_v15 }
 0x23c   : > { %v1980_v53 = vmul.f32 %v3727_v9, %v5725_v33  ;;  %3740 = vrsqrt.f32 %v2205_v47  ;;  %vm1542_vm11 = vcmp.eq.f32.partialorder %v5742_v5, 0.0  ;;  %v1543_v4 = vand.u32 2147483648, %v5742_v5 }
 0x23d   : > { %v2778_v0 = vmul.f32 %v3723_v51, %v2650_v39  ;;  %v2587_v6 = vmul.f32 %v2459_v31, %v2459_v31  ;;  %v5790_v1 = vmul.f32 3.0, %v1119_v45  ;;  %v5792_v7 = vmul.f32 3.0, %v1056_v17  ;;  %v5801_v45 = vpop.f32.mrb[59].mxu0 }
 0x23e   : > { %v3729_v13 = vpop.eup %3728  ;;  %v1982_v28 = vsel %vm1981_vm8, %v5725_v33, %v1980_v53  ;;  %vm1988_vm12 = vcmp.eq.f32.partialorder %v5748_v2, inf  ;;  %v1120_v42 = vmax.f32 %v5227_v58, 0.0  ;;  %vm1990_vm13 = vcmp.eq.f32.partialorder %v5748_v2, 0.0  ;;  %v5812_v58 = vpop.f32.mrb[59].mxu1 }
 0x23f   : > { %v3731_v43 = vpop.eup %3730  ;;  %2906 = vst [vmem:[%s4738_s4 + $0x310] sm:$0xff] %v2778_v0  ;;  %v2715_v51 = vmul.f32 %v3725_v41, %v2587_v6  ;;  %v2523_v46 = vmul.f32 %v3729_v13, %v3729_v13  ;;  %v1985_v16 = vsel %vm1983_vm9, %v1984_v38, %v1982_v28  ;;  %3742 = vrsqrt.f32 %v5790_v1 }
 0x240   : > { %v2269_v55 = vadd.f32 1.0, %v1985_v16  ;;  %v1539_v26 = vmul.f32 %v3731_v43, %v5742_v5  ;;  %3744 = vrsqrt.f32 %v5792_v7  ;;  %v1057_v33 = vmax.f32 %v5251_v11, 0.0 }
 0x241   : > { %2843 = vst [vmem:[%s4738_s4 + $0x118] sm:$0xff] %v2715_v51  ;;  %v2651_v9 = vmul.f32 %v2523_v46, %v2523_v46  ;;  %v3733_v41 = vpop.eup %3732  ;;  %v1991_v31 = vand.u32 2147483648, %v5748_v2  ;;  %vm1547_vm14 = vcmp.eq.f32.partialorder %v5773_v15, inf  ;;  %vm1549_vm15 = vcmp.eq.f32.partialorder %v5773_v15, 0.0 }
 0x242   : > { %3746 = vrsqrt.f32 %v2269_v55  ;;  %v1541_v39 = vsel %vm1540_vm10, %v5742_v5, %v1539_v26  ;;  %v3735_v47 = vpop.eup %3734  ;;  %v2460_v53 = vmul.f32 %v3733_v41, %v3733_v41  ;;  %v1550_v28 = vand.u32 2147483648, %v5773_v15 }
 0x243   : > { %v2779_v17 = vmul.f32 %v3729_v13, %v2651_v9  ;;  %v1544_v38 = vsel %vm1542_vm11, %v1543_v4, %v1541_v39  ;;  %v3737_v11 = vpop.eup %3736  ;;  %v1987_v6 = vmul.f32 %v3735_v47, %v5748_v2  ;;  %v5819_v43 = vmul.f32 3.0, %v1120_v42 }
 0x244   : > { %v2206_v0 = vadd.f32 1.0, %v1544_v38  ;;  %v2588_v51 = vmul.f32 %v2460_v53, %v2460_v53  ;;  %v2524_v46 = vmul.f32 %v3737_v11, %v3737_v11  ;;  %vm1995_vm0 = vcmp.eq.f32.partialorder %v5790_v1, inf }
 0x245   : > { %2907 = vst [vmem:[%s4738_s4 + $0x318] sm:$0xff] %v2779_v17  ;;  %v5823_v13 = vmul.f32 3.0, %v1057_v33  ;;  %v3739_v5 = vpop.eup %3738  ;;  %v1989_v4 = vsel %vm1988_vm12, %v5748_v2, %v1987_v6  ;;  %vm1997_vm1 = vcmp.eq.f32.partialorder %v5790_v1, 0.0  ;;  %v1121_v16 = vmax.f32 %v5257_v34, 0.0  ;;  %v5841_v2 = vpop.f32.mrb[60].mxu0 }
 0x246   : > { %3748 = vrsqrt.f32 %v2206_v0  ;;  %v3741_v55 = vpop.eup %3740  ;;  %v2716_v26 = vmul.f32 %v3733_v41, %v2588_v51  ;;  %v2652_v42 = vmul.f32 %v2524_v46, %v2524_v46  ;;  %v1992_v9 = vsel %vm1990_vm13, %v1991_v31, %v1989_v4  ;;  %v5843_v31 = vpop.f32.mrb[60].mxu1 }
 0x247   : > { %v1546_v39 = vmul.f32 %v3739_v5, %v5773_v15  ;;  %v2461_v33 = vmul.f32 %v3741_v55, %v3741_v55  ;;  %v2270_v47 = vadd.f32 1.0, %v1992_v9  ;;  %3750 = vrsqrt.f32 %v5819_v43 }
 0x248   : > { %v1058_v17 = vmax.f32 %v5281_v49, 0.0  ;;  %2844 = vst [vmem:[%s4738_s4 + $0x120] sm:$0xff] %v2716_v26  ;;  %v2780_v53 = vmul.f32 %v3737_v11, %v2652_v42  ;;  %v1998_v41 = vand.u32 2147483648, %v5790_v1  ;;  %3752 = vrsqrt.f32 %v5823_v13 }
 0x249   : > { %v1548_v34 = vsel %vm1547_vm14, %v5773_v15, %v1546_v39  ;;  %v3743_v38 = vpop.eup %3742  ;;  %v2589_v0 = vmul.f32 %v2461_v33, %v2461_v33  ;;  %3754 = vrsqrt.f32 %v2270_v47  ;;  %vm1554_vm2 = vcmp.eq.f32.partialorder %v5792_v7, inf }
 0x24a   : > { %v1551_v49 = vsel %vm1549_vm15, %v1550_v28, %v1548_v34  ;;  %v3745_v11 = vpop.eup %3744  ;;  %2908 = vst [vmem:[%s4738_s4 + $0x320] sm:$0xff] %v2780_v53  ;;  %v1994_v51 = vmul.f32 %v3743_v38, %v5790_v1  ;;  %vm1556_vm3 = vcmp.eq.f32.partialorder %v5792_v7, 0.0  ;;  %v5851_v46 = vmul.f32 3.0, %v1121_v16 }
 0x24b   : > { %v2207_v6 = vadd.f32 1.0, %v1551_v49  ;;  %v2717_v4 = vmul.f32 %v3741_v55, %v2589_v0  ;;  %v1553_v26 = vmul.f32 %v3745_v11, %v5792_v7  ;;  %v1557_v42 = vand.u32 2147483648, %v5792_v7 }
 0x24c   : > { %v3747_v5 = vpop.eup %3746  ;;  %v5855_v15 = vmul.f32 3.0, %v1058_v17  ;;  %v1996_v9 = vsel %vm1995_vm0, %v5790_v1, %v1994_v51  ;;  %vm2002_vm4 = vcmp.eq.f32.partialorder %v5819_v43, inf  ;;  %v1122_v39 = vmax.f32 %v5283_v35, 0.0 }
 0x24d   : > { %v2525_v28 = vmul.f32 %v3747_v5, %v3747_v5  ;;  %3756 = vrsqrt.f32 %v2207_v6  ;;  %2845 = vst [vmem:[%s4738_s4 + $0x128] sm:$0xff] %v2717_v4  ;;  %v1999_v16 = vsel %vm1997_vm1, %v1998_v41, %v1996_v9  ;;  %v1555_v55 = vsel %vm1554_vm2, %v5792_v7, %v1553_v26  ;;  %v5875_v41 = vpop.f32.mrb[61].mxu0  ;;  %v5886_v26 = vpop.f32.mrb[61].mxu1 }
 0x24e   : > { %3758 = vrsqrt.f32 %v5851_v46  ;;  %v2271_v47 = vadd.f32 1.0, %v1999_v16  ;;  %v1558_v17 = vsel %vm1556_vm3, %v1557_v42, %v1555_v55  ;;  %vm2004_vm5 = vcmp.eq.f32.partialorder %v5819_v43, 0.0 }
 0x24f   : > { %v2653_v33 = vmul.f32 %v2525_v28, %v2525_v28  ;;  %v2208_v34 = vadd.f32 1.0, %v1558_v17  ;;  %v2005_v1 = vand.u32 2147483648, %v5819_v43  ;;  %vm1561_vm6 = vcmp.eq.f32.partialorder %v5823_v13, inf }
 0x250   : > { %v3749_v53 = vpop.eup %3748  ;;  %3760 = vrsqrt.f32 %v5855_v15  ;;  %vm1563_vm7 = vcmp.eq.f32.partialorder %v5823_v13, 0.0  ;;  %v1564_v0 = vand.u32 2147483648, %v5823_v13  ;;  %v5879_v49 = vmul.f32 3.0, %v1122_v39 }
 0x251   : > { %v2781_v38 = vmul.f32 %v3747_v5, %v2653_v33  ;;  %v2462_v35 = vmul.f32 %v3749_v53, %v3749_v53  ;;  %3762 = vrsqrt.f32 %v2271_v47  ;;  %v3751_v7 = vpop.eup %3750  ;;  %v1059_v11 = vmax.f32 %v5302_v57, 0.0 }
 0x252   : > { %3764 = vrsqrt.f32 %v2208_v34  ;;  %v3753_v6 = vpop.eup %3752  ;;  %v2001_v4 = vmul.f32 %v3751_v7, %v5819_v43  ;;  %vm2009_vm8 = vcmp.eq.f32.partialorder %v5851_v46, inf  ;;  %v1123_v5 = vmax.f32 %v5319_v12, 0.0  ;;  %v5911_v7 = vpop.f32.mrb[62].mxu0 }
 0x253   : > { %2909 = vst [vmem:[%s4738_s4 + $0x328] sm:$0xff] %v2781_v38  ;;  %v2590_v51 = vmul.f32 %v2462_v35, %v2462_v35  ;;  %v3755_v42 = vpop.eup %3754  ;;  %v1560_v28 = vmul.f32 %v3753_v6, %v5823_v13  ;;  %vm2011_vm9 = vcmp.eq.f32.partialorder %v5851_v46, 0.0  ;;  %v2012_v9 = vand.u32 2147483648, %v5851_v46 }
 0x254   : > { %3766 = vrsqrt.f32 %v5879_v49  ;;  %v2526_v16 = vmul.f32 %v3755_v42, %v3755_v42  ;;  %v2003_v55 = vsel %vm2002_vm4, %v5819_v43, %v2001_v4  ;;  %v1060_v12 = vmax.f32 %v5342_v32, 0.0 }
 0x255   : > { %v2718_v57 = vmul.f32 %v3749_v53, %v2590_v51  ;;  %v2006_v39 = vsel %vm2004_vm5, %v2005_v1, %v2003_v55  ;;  %v1562_v33 = vsel %vm1561_vm6, %v5823_v13, %v1560_v28  ;;  %vm1568_vm10 = vcmp.eq.f32.partialorder %v5855_v15, inf }
 0x256   : > { %v5902_v47 = vmul.f32 3.0, %v1059_v11  ;;  %v2654_v53 = vmul.f32 %v2526_v16, %v2526_v16  ;;  %v2272_v34 = vadd.f32 1.0, %v2006_v39  ;;  %v1565_v38 = vsel %vm1563_vm7, %v1564_v0, %v1562_v33  ;;  %v5925_v16 = vpop.f32.mrb[62].mxu1 }
 0x257   : > { %v3757_v17 = vpop.eup %3756  ;;  %2846 = vst [vmem:[%s4738_s4 + $0x130] sm:$0xff] %v2718_v57  ;;  %v5907_v35 = vmul.f32 3.0, %v1123_v5  ;;  %v2209_v1 = vadd.f32 1.0, %v1565_v38  ;;  %vm1570_vm11 = vcmp.eq.f32.partialorder %v5855_v15, 0.0  ;;  %v5914_v51 = vmul.f32 3.0, %v1060_v12 }
 0x258   : > { %v3759_v32 = vpop.eup %3758  ;;  %v2463_v43 = vmul.f32 %v3757_v17, %v3757_v17  ;;  %3768 = vrsqrt.f32 %v5902_v47  ;;  %v2782_v11 = vmul.f32 %v3755_v42, %v2654_v53  ;;  %v1571_v4 = vand.u32 2147483648, %v5855_v15 }
 0x259   : > { %3770 = vrsqrt.f32 %v2272_v34  ;;  %v2008_v6 = vmul.f32 %v3759_v32, %v5851_v46  ;;  %v1124_v5 = vmax.f32 %v5349_v36, 0.0  ;;  %vm2016_vm12 = vcmp.eq.f32.partialorder %v5879_v49, inf }
 0x25a   : > { %v3761_v13 = vpop.eup %3760  ;;  %v2591_v0 = vmul.f32 %v2463_v43, %v2463_v43  ;;  %3772 = vrsqrt.f32 %v2209_v1  ;;  %2910 = vst [vmem:[%s4738_s4 + $0x330] sm:$0xff] %v2782_v11  ;;  %vm2018_vm13 = vcmp.eq.f32.partialorder %v5879_v49, 0.0  ;;  %v2019_v43 = vand.u32 2147483648, %v5879_v49  ;;  %v5940_v11 = vpop.f32.mrb[63].mxu0 }
 0x25b   : > { %v3763_v28 = vpop.eup %3762  ;;  %v2010_v57 = vsel %vm2009_vm8, %v5851_v46, %v2008_v6  ;;  %v1567_v42 = vmul.f32 %v3761_v13, %v5855_v15  ;;  %3774 = vrsqrt.f32 %v5907_v35  ;;  %vm1575_vm14 = vcmp.eq.f32.partialorder %v5902_v47, inf }
 0x25c   : > { %v3765_v55 = vpop.eup %3764  ;;  %v2719_v12 = vmul.f32 %v3757_v17, %v2591_v0  ;;  %v2527_v39 = vmul.f32 %v3763_v28, %v3763_v28  ;;  %v2013_v36 = vsel %vm2011_vm9, %v2012_v9, %v2010_v57  ;;  %3776 = vrsqrt.f32 %v5914_v51 }
 0x25d   : > { %v2464_v33 = vmul.f32 %v3765_v55, %v3765_v55  ;;  %v2273_v53 = vadd.f32 1.0, %v2013_v36  ;;  %v1569_v34 = vsel %vm1568_vm10, %v5855_v15, %v1567_v42  ;;  %vm1577_vm15 = vcmp.eq.f32.partialorder %v5902_v47, 0.0  ;;  %v5950_v42 = vpop.f32.mrb[63].mxu1 }
 0x25e   : > { %v3767_v38 = vpop.eup %3766  ;;  %2847 = vst [vmem:[%s4738_s4 + $0x138] sm:$0xff] %v2719_v12  ;;  %v2655_v32 = vmul.f32 %v2527_v39, %v2527_v39  ;;  %v1572_v17 = vsel %vm1570_vm11, %v1571_v4, %v1569_v34  ;;  %v5943_v13 = vmul.f32 3.0, %v1124_v5  ;;  %v1061_v15 = vmax.f32 %v5363_v62, 0.0 }
 0x25f   : > { %v2592_v46 = vmul.f32 %v2464_v33, %v2464_v33  ;;  %3778 = vrsqrt.f32 %v2273_v53  ;;  %v2210_v9 = vadd.f32 1.0, %v1572_v17  ;;  %v2015_v1 = vmul.f32 %v3767_v38, %v5879_v49 }
 0x260   : > { %v2783_v6 = vmul.f32 %v3763_v28, %v2655_v32  ;;  %v1125_v57 = vmax.f32 %v5379_v37, 0.0  ;;  %v1578_v5 = vand.u32 2147483648, %v5902_v47  ;;  %vm2023_vm0 = vcmp.eq.f32.partialorder %v5907_v35, inf }
 0x261   : > { %v2720_v0 = vmul.f32 %v3765_v55, %v2592_v46  ;;  %3780 = vrsqrt.f32 %v2210_v9  ;;  %v2017_v4 = vsel %vm2016_vm12, %v5879_v49, %v2015_v1  ;;  %vm2025_vm1 = vcmp.eq.f32.partialorder %v5907_v35, 0.0 }
 0x262   : > { %v3769_v12 = vpop.eup %3768  ;;  %2911 = vst [vmem:[%s4738_s4 + $0x338] sm:$0xff] %v2783_v6  ;;  %v2020_v28 = vsel %vm2018_vm13, %v2019_v43, %v2017_v4  ;;  %3782 = vrsqrt.f32 %v5943_v13  ;;  %v5961_v37 = vmul.f32 3.0, %v1061_v15  ;;  %v2026_v49 = vand.u32 2147483648, %v5907_v35 }
 0x263   : > { %v3771_v62 = vpop.eup %3770  ;;  %2848 = vst [vmem:[%s4738_s4 + $0x140] sm:$0xff] %v2720_v0  ;;  %v2274_v55 = vadd.f32 1.0, %v2020_v28  ;;  %v1574_v39 = vmul.f32 %v3769_v12, %v5902_v47  ;;  %vm1582_vm2 = vcmp.eq.f32.partialorder %v5914_v51, inf  ;;  %v5965_v53 = vmul.f32 3.0, %v1125_v57 }
 0x264   : > { %v3773_v36 = vpop.eup %3772  ;;  %v2528_v33 = vmul.f32 %v3771_v62, %v3771_v62  ;;  %vm1584_vm3 = vcmp.eq.f32.partialorder %v5914_v51, 0.0  ;;  %v1062_v15 = vmax.f32 %v5406_v21, 0.0  ;;  %v1126_v0 = vmax.f32 %v5408_v20, 0.0 }
 0x265   : > { %v3775_v34 = vpop.eup %3774  ;;  %v2465_v38 = vmul.f32 %v3773_v36, %v3773_v36  ;;  %3784 = vrsqrt.f32 %v2274_v55  ;;  %v1576_v32 = vsel %vm1575_vm14, %v5902_v47, %v1574_v39  ;;  %v1585_v21 = vand.u32 2147483648, %v5914_v51 }
 0x266   : > { %v2656_v17 = vmul.f32 %v2528_v33, %v2528_v33  ;;  %v1579_v43 = vsel %vm1577_vm15, %v1578_v5, %v1576_v32  ;;  %v2022_v46 = vmul.f32 %v3775_v34, %v5907_v35  ;;  %3786 = vrsqrt.f32 %v5961_v37  ;;  %v3777_v9 = vpop.eup %3776 }
 0x267   : > { %v2593_v1 = vmul.f32 %v2465_v38, %v2465_v38  ;;  %v2211_v6 = vadd.f32 1.0, %v1579_v43  ;;  %v1581_v47 = vmul.f32 %v3777_v9, %v5914_v51  ;;  %3788 = vrsqrt.f32 %v5965_v53 }
 0x268   : > { %v2784_v4 = vmul.f32 %v3771_v62, %v2656_v17  ;;  %v2024_v57 = vsel %vm2023_vm0, %v5907_v35, %v2022_v46  ;;  %vm2030_vm4 = vcmp.eq.f32.partialorder %v5943_v13, inf  ;;  %vm2032_vm5 = vcmp.eq.f32.partialorder %v5943_v13, 0.0 }
 0x269   : > { %v3779_v12 = vpop.eup %3778  ;;  %v2721_v28 = vmul.f32 %v3773_v36, %v2593_v1  ;;  %3790 = vrsqrt.f32 %v2211_v6  ;;  %v2027_v5 = vsel %vm2025_vm1, %v2026_v49, %v2024_v57  ;;  %v1583_v62 = vsel %vm1582_vm2, %v5914_v51, %v1581_v47 }
 0x26a   : > { %2912 = vst [vmem:[%s4738_s4 + $0x340] sm:$0xff] %v2784_v4  ;;  %v2529_v20 = vmul.f32 %v3779_v12, %v3779_v12  ;;  %v2275_v55 = vadd.f32 1.0, %v2027_v5  ;;  %v1586_v36 = vsel %vm1584_vm3, %v1585_v21, %v1583_v62  ;;  %v5994_v35 = vmul.f32 3.0, %v1062_v15 }
 0x26b   : > { %v3781_v39 = vpop.eup %3780  ;;  %2849 = vst [vmem:[%s4738_s4 + $0x148] sm:$0xff] %v2721_v28  ;;  %v5996_v33 = vmul.f32 3.0, %v1126_v0  ;;  %v2212_v32 = vadd.f32 1.0, %v1586_v36  ;;  %v2033_v43 = vand.u32 2147483648, %v5943_v13  ;;  %vm1589_vm6 = vcmp.eq.f32.partialorder %v5961_v37, inf }
 0x26c   : > { %v3783_v49 = vpop.eup %3782  ;;  %v2657_v34 = vmul.f32 %v2529_v20, %v2529_v20  ;;  %v2466_v38 = vmul.f32 %v3781_v39, %v3781_v39  ;;  %3792 = vrsqrt.f32 %v2275_v55  ;;  %vm1591_vm7 = vcmp.eq.f32.partialorder %v5961_v37, 0.0 }
 0x26d   : > { %v2029_v17 = vmul.f32 %v3783_v49, %v5943_v13  ;;  %3794 = vrsqrt.f32 %v5994_v35  ;;  %v1592_v6 = vand.u32 2147483648, %v5961_v37  ;;  %vm2037_vm8 = vcmp.eq.f32.partialorder %v5965_v53, inf }
 0x26e   : > { %v2785_v51 = vmul.f32 %v3779_v12, %v2657_v34  ;;  %v2594_v46 = vmul.f32 %v2466_v38, %v2466_v38  ;;  %3796 = vrsqrt.f32 %v2212_v32  ;;  %vm2039_vm9 = vcmp.eq.f32.partialorder %v5965_v53, 0.0 }
 0x26f   : > { %v3785_v9 = vpop.eup %3784  ;;  %v2031_v1 = vsel %vm2030_vm4, %v5943_v13, %v2029_v17  ;;  %3798 = vrsqrt.f32 %v5996_v33  ;;  %v1063_v28 = vmax.f32 %v5421_v8, 0.0  ;;  %v1127_v5 = vmax.f32 %v5448_v40, 0.0 }
 0x270   : > { %v3787_v15 = vpop.eup %3786  ;;  %2913 = vst [vmem:[%s4738_s4 + $0x348] sm:$0xff] %v2785_v51  ;;  %v2722_v0 = vmul.f32 %v3781_v39, %v2594_v46  ;;  %v2530_v4 = vmul.f32 %v3785_v9, %v3785_v9  ;;  %v2034_v57 = vsel %vm2032_vm5, %v2033_v43, %v2031_v1  ;;  %v2040_v55 = vand.u32 2147483648, %v5965_v53 }
 0x271   : > { %v2276_v47 = vadd.f32 1.0, %v2034_v57  ;;  %v1588_v12 = vmul.f32 %v3787_v15, %v5961_v37  ;;  %v3789_v21 = vpop.eup %3788  ;;  %vm1596_vm10 = vcmp.eq.f32.partialorder %v5994_v35, inf  ;;  %vm1598_vm11 = vcmp.eq.f32.partialorder %v5994_v35, 0.0 }
 0x272   : > { %2850 = vst [vmem:[%s4738_s4 + $0x150] sm:$0xff] %v2722_v0  ;;  %v2658_v20 = vmul.f32 %v2530_v4, %v2530_v4  ;;  %v2036_v8 = vmul.f32 %v3789_v21, %v5965_v53  ;;  %v6024_v39 = vmul.f32 3.0, %v1063_v28  ;;  %v6028_v34 = vmul.f32 3.0, %v1127_v5 }
 0x273   : > { %v3791_v13 = vpop.eup %3790  ;;  %3800 = vrsqrt.f32 %v2276_v47  ;;  %v1590_v62 = vsel %vm1589_vm6, %v5961_v37, %v1588_v12  ;;  %v1599_v17 = vand.u32 2147483648, %v5994_v35  ;;  %vm2044_vm12 = vcmp.eq.f32.partialorder %v5996_v33, inf }
 0x274   : > { %v2786_v40 = vmul.f32 %v3785_v9, %v2658_v20  ;;  %v2467_v36 = vmul.f32 %v3791_v13, %v3791_v13  ;;  %v1593_v49 = vsel %vm1591_vm7, %v1592_v6, %v1590_v62  ;;  %v2038_v32 = vsel %vm2037_vm8, %v5965_v53, %v2036_v8 }
 0x275   : > { %v2213_v38 = vadd.f32 1.0, %v1593_v49  ;;  %3802 = vrsqrt.f32 %v6024_v39  ;;  %v2041_v46 = vsel %vm2039_vm9, %v2040_v55, %v2038_v32  ;;  %v1064_v37 = vmax.f32 %v5469_v18, 0.0 }
 0x276   : > { %v3793_v43 = vpop.eup %3792  ;;  %2914 = vst [vmem:[%s4738_s4 + $0x350] sm:$0xff] %v2786_v40  ;;  %v2595_v51 = vmul.f32 %v2467_v36, %v2467_v36  ;;  %v2277_v6 = vadd.f32 1.0, %v2041_v46  ;;  %v1128_v15 = vmax.f32 %v5478_v52, 0.0  ;;  %vm2046_vm13 = vcmp.eq.f32.partialorder %v5996_v33, 0.0 }
 0x277   : > { %v3795_v9 = vpop.eup %3794  ;;  %v2531_v1 = vmul.f32 %v3793_v43, %v3793_v43  ;;  %3804 = vrsqrt.f32 %v2213_v38  ;;  %v1065_v18 = vmax.f32 %v5491_v63, 0.0  ;;  %v2047_v5 = vand.u32 2147483648, %v5996_v33 }
 0x278   : > { %v3797_v0 = vpop.eup %3796  ;;  %v2723_v4 = vmul.f32 %v3791_v13, %v2595_v51  ;;  %v1595_v57 = vmul.f32 %v3795_v9, %v5994_v35  ;;  %3806 = vrsqrt.f32 %v6028_v34  ;;  %v6051_v21 = vmul.f32 3.0, %v1064_v37 }
 0x279   : > { %v3799_v53 = vpop.eup %3798  ;;  %v2659_v47 = vmul.f32 %v2531_v1, %v2531_v1  ;;  %v2468_v12 = vmul.f32 %v3797_v0, %v3797_v0  ;;  %3808 = vrsqrt.f32 %v2277_v6  ;;  %v6055_v62 = vmul.f32 3.0, %v1128_v15 }
 0x27a   : > { %2851 = vst [vmem:[%s4738_s4 + $0x158] sm:$0xff] %v2723_v4  ;;  %v1597_v52 = vsel %vm1596_vm10, %v5994_v35, %v1595_v57  ;;  %v2043_v28 = vmul.f32 %v3799_v53, %v5996_v33  ;;  %vm1603_vm14 = vcmp.eq.f32.partialorder %v6024_v39, inf  ;;  %3810 = vrsqrt.f32 %v6051_v21 }
 0x27b   : > { %v2787_v20 = vmul.f32 %v3793_v43, %v2659_v47  ;;  %v2596_v55 = vmul.f32 %v2468_v12, %v2468_v12  ;;  %v1600_v13 = vsel %vm1598_vm11, %v1599_v17, %v1597_v52  ;;  %vm1605_vm15 = vcmp.eq.f32.partialorder %v6024_v39, 0.0 }
 0x27c   : > { %v2214_v63 = vadd.f32 1.0, %v1600_v13  ;;  %v2045_v8 = vsel %vm2044_vm12, %v5996_v33, %v2043_v28  ;;  %v6066_v35 = vmul.f32 3.0, %v1065_v18  ;;  %v1606_v17 = vand.u32 2147483648, %v6024_v39 }
 0x27d   : > { %v3801_v40 = vpop.eup %3800  ;;  %2915 = vst [vmem:[%s4738_s4 + $0x358] sm:$0xff] %v2787_v20  ;;  %v2724_v36 = vmul.f32 %v3797_v0, %v2596_v55  ;;  %v2048_v49 = vsel %vm2046_vm13, %v2047_v5, %v2045_v8  ;;  %vm2051_vm0 = vcmp.eq.f32.partialorder %v6028_v34, inf  ;;  %vm2053_vm1 = vcmp.eq.f32.partialorder %v6028_v34, 0.0 }
 0x27e   : > { %v2532_v38 = vmul.f32 %v3801_v40, %v3801_v40  ;;  %3812 = vrsqrt.f32 %v2214_v63  ;;  %v2278_v32 = vadd.f32 1.0, %v2048_v49  ;;  %v2054_v51 = vand.u32 2147483648, %v6028_v34 }
 0x27f   : > { %v3803_v43 = vpop.eup %3802  ;;  %2852 = vst [vmem:[%s4738_s4 + $0x160] sm:$0xff] %v2724_v36  ;;  %3814 = vrsqrt.f32 %v6055_v62  ;;  %vm1610_vm2 = vcmp.eq.f32.partialorder %v6051_v21, inf  ;;  %vm1612_vm3 = vcmp.eq.f32.partialorder %v6051_v21, 0.0  ;;  %v1129_v9 = vmax.f32 %v5497_v30, 0.0 }
 0x280   : > { %v2660_v33 = vmul.f32 %v2532_v38, %v2532_v38  ;;  %3816 = vrsqrt.f32 %v2278_v32  ;;  %v1602_v46 = vmul.f32 %v3803_v43, %v6024_v39  ;;  %v1066_v1 = vmax.f32 %v5534_v60, 0.0 }
 0x281   : > { %v3805_v37 = vpop.eup %3804  ;;  %3818 = vrsqrt.f32 %v6066_v35  ;;  %v1130_v57 = vmax.f32 %v5536_v44, 0.0  ;;  %v6087_v18 = vmul.f32 3.0, %v1129_v9  ;;  %v1613_v5 = vand.u32 2147483648, %v6051_v21 }
 0x282   : > { %v3807_v6 = vpop.eup %3806  ;;  %v2788_v15 = vmul.f32 %v3801_v40, %v2660_v33  ;;  %v2469_v0 = vmul.f32 %v3805_v37, %v3805_v37  ;;  %v1604_v4 = vsel %vm1603_vm14, %v6024_v39, %v1602_v46  ;;  %v6089_v30 = vmul.f32 3.0, %v1066_v1 }
 0x283   : > { %v3809_v53 = vpop.eup %3808  ;;  %v1607_v47 = vsel %vm1605_vm15, %v1606_v17, %v1604_v4  ;;  %v2050_v12 = vmul.f32 %v3807_v6, %v6028_v34  ;;  %vm2058_vm4 = vcmp.eq.f32.partialorder %v6055_v62, inf  ;;  %3820 = vrsqrt.f32 %v6087_v18 }
 0x284   : > { %2916 = vst [vmem:[%s4738_s4 + $0x360] sm:$0xff] %v2788_v15  ;;  %v2597_v60 = vmul.f32 %v2469_v0, %v2469_v0  ;;  %v2533_v52 = vmul.f32 %v3809_v53, %v3809_v53  ;;  %v2215_v28 = vadd.f32 1.0, %v1607_v47  ;;  %v6098_v39 = vmul.f32 3.0, %v1130_v57  ;;  %v3811_v20 = vpop.eup %3810 }
 0x285   : > { %v2052_v44 = vsel %vm2051_vm0, %v6028_v34, %v2050_v12  ;;  %v1609_v40 = vmul.f32 %v3811_v20, %v6051_v21  ;;  %vm2060_vm5 = vcmp.eq.f32.partialorder %v6055_v62, 0.0  ;;  %v2061_v38 = vand.u32 2147483648, %v6055_v62 }
 0x286   : > { %v2725_v55 = vmul.f32 %v3805_v37, %v2597_v60  ;;  %v2661_v13 = vmul.f32 %v2533_v52, %v2533_v52  ;;  %3822 = vrsqrt.f32 %v2215_v28  ;;  %v2055_v63 = vsel %vm2053_vm1, %v2054_v51, %v2052_v44 }
 0x287   : > { %v2279_v8 = vadd.f32 1.0, %v2055_v63  ;;  %3824 = vrsqrt.f32 %v6089_v30  ;;  %vm1617_vm6 = vcmp.eq.f32.partialorder %v6066_v35, inf  ;;  %vm1619_vm7 = vcmp.eq.f32.partialorder %v6066_v35, 0.0 }
 0x288   : > { %v3813_v36 = vpop.eup %3812  ;;  %2853 = vst [vmem:[%s4738_s4 + $0x168] sm:$0xff] %v2725_v55  ;;  %v2789_v49 = vmul.f32 %v3809_v53, %v2661_v13  ;;  %v1611_v17 = vsel %vm1610_vm2, %v6051_v21, %v1609_v40  ;;  %v1620_v43 = vand.u32 2147483648, %v6066_v35  ;;  %vm2065_vm8 = vcmp.eq.f32.partialorder %v6087_v18, inf }
 0x289   : > { %v3815_v32 = vpop.eup %3814  ;;  %v2470_v34 = vmul.f32 %v3813_v36, %v3813_v36  ;;  %3826 = vrsqrt.f32 %v2279_v8  ;;  %v1614_v33 = vsel %vm1612_vm3, %v1613_v5, %v1611_v17  ;;  %vm2067_vm9 = vcmp.eq.f32.partialorder %v6087_v18, 0.0 }
 0x28a   : > { %v3817_v51 = vpop.eup %3816  ;;  %2917 = vst [vmem:[%s4738_s4 + $0x368] sm:$0xff] %v2789_v49  ;;  %v2057_v46 = vmul.f32 %v3815_v32, %v6055_v62  ;;  %3828 = vrsqrt.f32 %v6098_v39  ;;  %v2216_v6 = vadd.f32 1.0, %v1614_v33  ;;  %v1067_v0 = vmax.f32 %v5549_v54, 0.0 }
 0x28b   : > { %v3819_v37 = vpop.eup %3818  ;;  %v2598_v9 = vmul.f32 %v2470_v34, %v2470_v34  ;;  %v2534_v1 = vmul.f32 %v3817_v51, %v3817_v51  ;;  %v1131_v4 = vmax.f32 %v5568_v59, 0.0  ;;  %v2068_v52 = vand.u32 2147483648, %v6087_v18 }
 0x28c   : > { %v2059_v15 = vsel %vm2058_vm4, %v6055_v62, %v2057_v46  ;;  %v1616_v21 = vmul.f32 %v3819_v37, %v6066_v35  ;;  %3830 = vrsqrt.f32 %v2216_v6  ;;  %v6132_v28 = vmul.f32 3.0, %v1067_v0 }
 0x28d   : > { %v2726_v57 = vmul.f32 %v3813_v36, %v2598_v9  ;;  %v2662_v53 = vmul.f32 %v2534_v1, %v2534_v1  ;;  %v2062_v47 = vsel %vm2060_vm5, %v2061_v38, %v2059_v15  ;;  %v3821_v5 = vpop.eup %3820  ;;  %vm1624_vm10 = vcmp.eq.f32.partialorder %v6089_v30, inf }
 0x28e   : > { %v2280_v12 = vadd.f32 1.0, %v2062_v47  ;;  %v1618_v60 = vsel %vm1617_vm6, %v6066_v35, %v1616_v21  ;;  %v6138_v62 = vmul.f32 3.0, %v1131_v4  ;;  %v2064_v55 = vmul.f32 %v3821_v5, %v6087_v18 }
 0x28f   : > { %2854 = vst [vmem:[%s4738_s4 + $0x170] sm:$0xff] %v2726_v57  ;;  %v2790_v54 = vmul.f32 %v3817_v51, %v2662_v53  ;;  %v1621_v59 = vsel %vm1619_vm7, %v1620_v43, %v1618_v60  ;;  %vm1626_vm11 = vcmp.eq.f32.partialorder %v6089_v30, 0.0  ;;  %v1627_v8 = vand.u32 2147483648, %v6089_v30 }
 0x290   : > { %v3823_v44 = vpop.eup %3822  ;;  %3832 = vrsqrt.f32 %v2280_v12  ;;  %v2217_v20 = vadd.f32 1.0, %v1621_v59  ;;  %v1068_v35 = vmax.f32 %v5597_v27, 0.0  ;;  %v2066_v40 = vsel %vm2065_vm8, %v6087_v18, %v2064_v55 }
 0x291   : > { %v3825_v13 = vpop.eup %3824  ;;  %2918 = vst [vmem:[%s4738_s4 + $0x370] sm:$0xff] %v2790_v54  ;;  %v2471_v63 = vmul.f32 %v3823_v44, %v3823_v44  ;;  %3834 = vrsqrt.f32 %v6132_v28  ;;  %v1132_v49 = vmax.f32 %v5608_v24, 0.0  ;;  %v2069_v34 = vsel %vm2067_vm9, %v2068_v52, %v2066_v40 }
 0x292   : > { %3836 = vrsqrt.f32 %v2217_v20  ;;  %v1623_v36 = vmul.f32 %v3825_v13, %v6089_v30  ;;  %vm2072_vm12 = vcmp.eq.f32.partialorder %v6098_v39, inf  ;;  %v2281_v43 = vadd.f32 1.0, %v2069_v34 }
 0x293   : > { %v3827_v38 = vpop.eup %3826  ;;  %v2599_v32 = vmul.f32 %v2471_v63, %v2471_v63  ;;  %3838 = vrsqrt.f32 %v6138_v62  ;;  %v2075_v33 = vand.u32 2147483648, %v6098_v39  ;;  %v6162_v37 = vmul.f32 3.0, %v1068_v35 }
 0x294   : > { %v3829_v27 = vpop.eup %3828  ;;  %v2535_v17 = vmul.f32 %v3827_v38, %v3827_v38  ;;  %v1625_v51 = vsel %vm1624_vm10, %v6089_v30, %v1623_v36  ;;  %3840 = vrsqrt.f32 %v2281_v43  ;;  %v6164_v6 = vmul.f32 3.0, %v1132_v49 }
 0x295   : > { %v2727_v24 = vmul.f32 %v3823_v44, %v2599_v32  ;;  %v1628_v46 = vsel %vm1626_vm11, %v1627_v8, %v1625_v51  ;;  %v2071_v18 = vmul.f32 %v3829_v27, %v6098_v39  ;;  %vm2074_vm13 = vcmp.eq.f32.partialorder %v6098_v39, 0.0 }
 0x296   : > { %v2663_v9 = vmul.f32 %v2535_v17, %v2535_v17  ;;  %v2218_v1 = vadd.f32 1.0, %v1628_v46  ;;  %v3831_v15 = vpop.eup %3830  ;;  %vm1631_vm14 = vcmp.eq.f32.partialorder %v6132_v28, inf  ;;  %3842 = vrsqrt.f32 %v6162_v37 }
 0x297   : > { %2855 = vst [vmem:[%s4738_s4 + $0x178] sm:$0xff] %v2727_v24  ;;  %v2073_v21 = vsel %vm2072_vm12, %v6098_v39, %v2071_v18  ;;  %v2472_v0 = vmul.f32 %v3831_v15, %v3831_v15  ;;  %vm1633_vm15 = vcmp.eq.f32.partialorder %v6132_v28, 0.0  ;;  %v1634_v53 = vand.u32 2147483648, %v6132_v28 }
 0x298   : > { %v2791_v30 = vmul.f32 %v3827_v38, %v2663_v9  ;;  %3844 = vrsqrt.f32 %v2218_v1  ;;  %v2076_v4 = vsel %vm2074_vm13, %v2075_v33, %v2073_v21  ;;  %vm2079_vm0 = vcmp.eq.f32.partialorder %v6138_v62, inf }
 0x299   : > { %v2282_v57 = vadd.f32 1.0, %v2076_v4  ;;  %3846 = vrsqrt.f32 %v6164_v6  ;;  %v2600_v12 = vmul.f32 %v2472_v0, %v2472_v0  ;;  %vm2081_vm1 = vcmp.eq.f32.partialorder %v6138_v62, 0.0 }
 0x29a   : > { %v3833_v47 = vpop.eup %3832  ;;  %2919 = vst [vmem:[%s4738_s4 + $0x378] sm:$0xff] %v2791_v30  ;;  %v1069_v39 = vmax.f32 %v5616_v10, 0.0  ;;  %v1133_v5 = vmax.f32 %v5638_v3, 0.0  ;;  %v1070_v54 = vmax.f32 %v5663_v56, 0.0  ;;  %v2082_v55 = vand.u32 2147483648, %v6138_v62 }
 0x29b   : > { %v3835_v60 = vpop.eup %3834  ;;  %v2536_v52 = vmul.f32 %v3833_v47, %v3833_v47  ;;  %3848 = vrsqrt.f32 %v2282_v57  ;;  %v2728_v44 = vmul.f32 %v3831_v15, %v2600_v12  ;;  %vm1638_vm2 = vcmp.eq.f32.partialorder %v6162_v37, inf }
 0x29c   : > { %v3837_v59 = vpop.eup %3836  ;;  %v1630_v20 = vmul.f32 %v3835_v60, %v6132_v28  ;;  %v6184_v13 = vmul.f32 3.0, %v1069_v39  ;;  %v6187_v10 = vmul.f32 3.0, %v1133_v5  ;;  %vm1640_vm3 = vcmp.eq.f32.partialorder %v6162_v37, 0.0 }
 0x29d   : > { %v3839_v63 = vpop.eup %3838  ;;  %v2664_v8 = vmul.f32 %v2536_v52, %v2536_v52  ;;  %v2473_v35 = vmul.f32 %v3837_v59, %v3837_v59  ;;  %2856 = vst [vmem:[%s4738_s4 + $0x180] sm:$0xff] %v2728_v44  ;;  %v6198_v38 = vmul.f32 3.0, %v1070_v54  ;;  %v1641_v17 = vand.u32 2147483648, %v6162_v37 }
 0x29e   : > { %v1632_v3 = vsel %vm1631_vm14, %v6132_v28, %v1630_v20  ;;  %v2078_v56 = vmul.f32 %v3839_v63, %v6138_v62  ;;  %3850 = vrsqrt.f32 %v6184_v13  ;;  %v3841_v32 = vpop.eup %3840  ;;  %vm2086_vm4 = vcmp.eq.f32.partialorder %v6164_v6, inf }
 0x29f   : > { %v2792_v40 = vmul.f32 %v3833_v47, %v2664_v8  ;;  %v2601_v36 = vmul.f32 %v2473_v35, %v2473_v35  ;;  %v1635_v49 = vsel %vm1633_vm15, %v1634_v53, %v1632_v3  ;;  %3852 = vrsqrt.f32 %v6187_v10 }
 0x2a0   : > { %v2219_v34 = vadd.f32 1.0, %v1635_v49  ;;  %v2080_v27 = vsel %vm2079_vm0, %v6138_v62, %v2078_v56  ;;  %v3843_v43 = vpop.eup %3842  ;;  %v2537_v33 = vmul.f32 %v3841_v32, %v3841_v32  ;;  %vm2088_vm5 = vcmp.eq.f32.partialorder %v6164_v6, 0.0 }
 0x2a1   : > { %2920 = vst [vmem:[%s4738_s4 + $0x380] sm:$0xff] %v2792_v40  ;;  %v2729_v51 = vmul.f32 %v3837_v59, %v2601_v36  ;;  %v2083_v28 = vsel %vm2081_vm1, %v2082_v55, %v2080_v27  ;;  %v1637_v18 = vmul.f32 %v3843_v43, %v6162_v37  ;;  %v1134_v21 = vmax.f32 %v5665_v48, 0.0 }
 0x2a2   : > { %v3845_v24 = vpop.eup %3844  ;;  %3854 = vrsqrt.f32 %v2219_v34  ;;  %v2283_v46 = vadd.f32 1.0, %v2083_v28  ;;  %v2665_v1 = vmul.f32 %v2537_v33, %v2537_v33  ;;  %v2089_v0 = vand.u32 2147483648, %v6164_v6 }
 0x2a3   : > { %v3847_v9 = vpop.eup %3846  ;;  %2857 = vst [vmem:[%s4738_s4 + $0x188] sm:$0xff] %v2729_v51  ;;  %v2474_v15 = vmul.f32 %v3845_v24, %v3845_v24  ;;  %3856 = vrsqrt.f32 %v6198_v38  ;;  %v1639_v62 = vsel %vm1638_vm2, %v6162_v37, %v1637_v18  ;;  %vm1645_vm6 = vcmp.eq.f32.partialorder %v6184_v13, inf }
 0x2a4   : > { %3858 = vrsqrt.f32 %v2283_v46  ;;  %v2085_v30 = vmul.f32 %v3847_v9, %v6164_v6  ;;  %v2793_v57 = vmul.f32 %v3841_v32, %v2665_v1  ;;  %v1642_v47 = vsel %vm1640_vm3, %v1641_v17, %v1639_v62 }
 0x2a5   : > { %v3849_v4 = vpop.eup %3848  ;;  %v2602_v53 = vmul.f32 %v2474_v15, %v2474_v15  ;;  %v2220_v48 = vadd.f32 1.0, %v1642_v47  ;;  %vm1647_vm7 = vcmp.eq.f32.partialorder %v6184_v13, 0.0  ;;  %v6229_v5 = vmul.f32 3.0, %v1134_v21 }
 0x2a6   : > { %v2538_v12 = vmul.f32 %v3849_v4, %v3849_v4  ;;  %v2087_v39 = vsel %vm2086_vm4, %v6164_v6, %v2085_v30  ;;  %2921 = vst [vmem:[%s4738_s4 + $0x388] sm:$0xff] %v2793_v57  ;;  %v1071_v37 = vmax.f32 %v5687_v23, 0.0  ;;  %v1135_v20 = vmax.f32 %v5694_v22, 0.0 }
 0x2a7   : > { %v2730_v60 = vmul.f32 %v3845_v24, %v2602_v53  ;;  %v2090_v52 = vsel %vm2088_vm5, %v2089_v0, %v2087_v39  ;;  %3860 = vrsqrt.f32 %v2220_v48  ;;  %v1648_v63 = vand.u32 2147483648, %v6184_v13 }
 0x2a8   : > { %v3851_v54 = vpop.eup %3850  ;;  %v2666_v59 = vmul.f32 %v2538_v12, %v2538_v12  ;;  %v2284_v44 = vadd.f32 1.0, %v2090_v52  ;;  %vm2093_vm8 = vcmp.eq.f32.partialorder %v6187_v10, inf  ;;  %3862 = vrsqrt.f32 %v6229_v5 }
 0x2a9   : > { %2858 = vst [vmem:[%s4738_s4 + $0x190] sm:$0xff] %v2730_v60  ;;  %v1644_v55 = vmul.f32 %v3851_v54, %v6184_v13  ;;  %v3853_v6 = vpop.eup %3852  ;;  %vm2095_vm9 = vcmp.eq.f32.partialorder %v6187_v10, 0.0  ;;  %v6239_v23 = vmul.f32 3.0, %v1071_v37  ;;  %v2096_v3 = vand.u32 2147483648, %v6187_v10 }
 0x2aa   : > { %v2794_v8 = vmul.f32 %v3849_v4, %v2666_v59  ;;  %3864 = vrsqrt.f32 %v2284_v44  ;;  %v2092_v35 = vmul.f32 %v3853_v6, %v6187_v10  ;;  %v6246_v56 = vmul.f32 3.0, %v1135_v20 }
 0x2ab   : > { %v1646_v22 = vsel %vm1645_vm6, %v6184_v13, %v1644_v55  ;;  %vm1652_vm10 = vcmp.eq.f32.partialorder %v6198_v38, inf  ;;  %3866 = vrsqrt.f32 %v6239_v23  ;;  %v1072_v49 = vmax.f32 %v5721_v50, 0.0 }
 0x2ac   : > { %v3855_v40 = vpop.eup %3854  ;;  %2922 = vst [vmem:[%s4738_s4 + $0x390] sm:$0xff] %v2794_v8  ;;  %v1649_v36 = vsel %vm1647_vm7, %v1648_v63, %v1646_v22  ;;  %v2094_v17 = vsel %vm2093_vm8, %v6187_v10, %v2092_v35  ;;  %vm1654_vm11 = vcmp.eq.f32.partialorder %v6198_v38, 0.0  ;;  %v1655_v33 = vand.u32 2147483648, %v6198_v38 }
 0x2ad   : > { %v3857_v32 = vpop.eup %3856  ;;  %v2475_v34 = vmul.f32 %v3855_v40, %v3855_v40  ;;  %v2221_v27 = vadd.f32 1.0, %v1649_v36  ;;  %v2097_v13 = vsel %vm2095_vm9, %v2096_v3, %v2094_v17  ;;  %3868 = vrsqrt.f32 %v6246_v56 }
 0x2ae   : > { %v3859_v43 = vpop.eup %3858  ;;  %v1651_v51 = vmul.f32 %v3857_v32, %v6198_v38  ;;  %v2285_v24 = vadd.f32 1.0, %v2097_v13  ;;  %vm2100_vm12 = vcmp.eq.f32.partialorder %v6229_v5, inf  ;;  %vm2102_vm13 = vcmp.eq.f32.partialorder %v6229_v5, 0.0 }
 0x2af   : > { %v2603_v50 = vmul.f32 %v2475_v34, %v2475_v34  ;;  %v2539_v28 = vmul.f32 %v3859_v43, %v3859_v43  ;;  %3870 = vrsqrt.f32 %v2221_v27  ;;  %v6268_v10 = vmul.f32 3.0, %v1072_v49 }
 0x2b0   : > { %v1653_v46 = vsel %vm1652_vm10, %v6198_v38, %v1651_v51  ;;  %3872 = vrsqrt.f32 %v2285_v24  ;;  %v2103_v62 = vand.u32 2147483648, %v6229_v5  ;;  %vm1659_vm14 = vcmp.eq.f32.partialorder %v6239_v23, inf }
 0x2b1   : > { %v2731_v18 = vmul.f32 %v3855_v40, %v2603_v50  ;;  %v2667_v9 = vmul.f32 %v2539_v28, %v2539_v28  ;;  %v1656_v1 = vsel %vm1654_vm11, %v1655_v33, %v1653_v46  ;;  %v3861_v15 = vpop.eup %3860  ;;  %3874 = vrsqrt.f32 %v6268_v10 }
 0x2b2   : > { %v2222_v21 = vadd.f32 1.0, %v1656_v1  ;;  %v3863_v30 = vpop.eup %3862  ;;  %v2476_v4 = vmul.f32 %v3861_v15, %v3861_v15  ;;  %vm1661_vm15 = vcmp.eq.f32.partialorder %v6239_v23, 0.0  ;;  %v1136_v57 = vmax.f32 %v5723_v19, 0.0 }
 0x2b3   : > { %2859 = vst [vmem:[%s4738_s4 + $0x198] sm:$0xff] %v2731_v18  ;;  %v2795_v0 = vmul.f32 %v3859_v43, %v2667_v9  ;;  %v2099_v38 = vmul.f32 %v3863_v30, %v6229_v5  ;;  %v1662_v47 = vand.u32 2147483648, %v6239_v23  ;;  %v1073_v12 = vmax.f32 %v5753_v61, 0.0 }
 0x2b4   : > { %v3865_v53 = vpop.eup %3864  ;;  %3876 = vrsqrt.f32 %v2222_v21  ;;  %v2604_v48 = vmul.f32 %v2476_v4, %v2476_v4  ;;  %vm2107_vm0 = vcmp.eq.f32.partialorder %v6246_v56, inf  ;;  %v6283_v60 = vmul.f32 3.0, %v1136_v57 }
 0x2b5   : > { %2923 = vst [vmem:[%s4738_s4 + $0x398] sm:$0xff] %v2795_v0  ;;  %v2540_v39 = vmul.f32 %v3865_v53, %v3865_v53  ;;  %v3867_v52 = vpop.eup %3866  ;;  %v2101_v19 = vsel %vm2100_vm12, %v6229_v5, %v2099_v38  ;;  %vm2109_vm1 = vcmp.eq.f32.partialorder %v6246_v56, 0.0  ;;  %v6289_v37 = vmul.f32 3.0, %v1073_v12 }
 0x2b6   : > { %v1137_v54 = vmax.f32 %v5765_v14, 0.0  ;;  %v2732_v61 = vmul.f32 %v3861_v15, %v2604_v48  ;;  %v2104_v44 = vsel %vm2102_vm13, %v2103_v62, %v2101_v19  ;;  %v1658_v20 = vmul.f32 %v3867_v52, %v6239_v23 }
 0x2b7   : > { %v2668_v59 = vmul.f32 %v2540_v39, %v2540_v39  ;;  %v3869_v55 = vpop.eup %3868  ;;  %v2286_v63 = vadd.f32 1.0, %v2104_v44  ;;  %v2110_v6 = vand.u32 2147483648, %v6246_v56  ;;  %vm1666_vm2 = vcmp.eq.f32.partialorder %v6268_v10, inf }
 0x2b8   : > { %3878 = vrsqrt.f32 %v6283_v60  ;;  %2860 = vst [vmem:[%s4738_s4 + $0x1a0] sm:$0xff] %v2732_v61  ;;  %v1660_v14 = vsel %vm1659_vm14, %v6239_v23, %v1658_v20  ;;  %v2106_v5 = vmul.f32 %v3869_v55, %v6246_v56  ;;  %vm1668_vm3 = vcmp.eq.f32.partialorder %v6268_v10, 0.0 }
 0x2b9   : > { %v3871_v8 = vpop.eup %3870  ;;  %v2796_v22 = vmul.f32 %v3865_v53, %v2668_v59  ;;  %3880 = vrsqrt.f32 %v2286_v63  ;;  %v1663_v3 = vsel %vm1661_vm15, %v1662_v47, %v1660_v14  ;;  %v6306_v40 = vmul.f32 3.0, %v1137_v54 }
 0x2ba   : > { %v2477_v35 = vmul.f32 %v3871_v8, %v3871_v8  ;;  %v3873_v36 = vpop.eup %3872  ;;  %v2223_v49 = vadd.f32 1.0, %v1663_v3  ;;  %v2108_v32 = vsel %vm2107_vm0, %v6246_v56, %v2106_v5  ;;  %3882 = vrsqrt.f32 %v6289_v37 }
 0x2bb   : > { %2924 = vst [vmem:[%s4738_s4 + $0x3a0] sm:$0xff] %v2796_v22  ;;  %v1074_v34 = vmax.f32 %v5782_v29, 0.0  ;;  %v3875_v27 = vpop.eup %3874  ;;  %v2541_v43 = vmul.f32 %v3873_v36, %v3873_v36  ;;  %v2111_v23 = vsel %vm2109_vm1, %v2110_v6, %v2108_v32  ;;  %v1138_v13 = vmax.f32 %v5784_v25, 0.0 }
 0x2bc   : > { %v2605_v17 = vmul.f32 %v2477_v35, %v2477_v35  ;;  %3884 = vrsqrt.f32 %v2223_v49  ;;  %v2287_v51 = vadd.f32 1.0, %v2111_v23  ;;  %v1665_v33 = vmul.f32 %v3875_v27, %v6268_v10 }
 0x2bd   : > { %v1669_v50 = vand.u32 2147483648, %v6268_v10  ;;  %v2669_v46 = vmul.f32 %v2541_v43, %v2541_v43  ;;  %vm2114_vm4 = vcmp.eq.f32.partialorder %v6283_v60, inf  ;;  %3886 = vrsqrt.f32 %v6306_v40 }
 0x2be   : > { %v3877_v28 = vpop.eup %3876  ;;  %v2733_v24 = vmul.f32 %v3871_v8, %v2605_v17  ;;  %3888 = vrsqrt.f32 %v2287_v51  ;;  %v1667_v25 = vsel %vm1666_vm2, %v6268_v10, %v1665_v33  ;;  %vm2116_vm5 = vcmp.eq.f32.partialorder %v6283_v60, 0.0 }
 0x2bf   : > { %v2478_v29 = vmul.f32 %v3877_v28, %v3877_v28  ;;  %v2797_v56 = vmul.f32 %v3873_v36, %v2669_v46  ;;  %v1670_v18 = vsel %vm1668_vm3, %v1669_v50, %v1667_v25  ;;  %v6328_v9 = vmul.f32 3.0, %v1074_v34 }
 0x2c0   : > { %2861 = vst [vmem:[%s4738_s4 + $0x1a8] sm:$0xff] %v2733_v24  ;;  %v6330_v1 = vmul.f32 3.0, %v1138_v13  ;;  %v2224_v21 = vadd.f32 1.0, %v1670_v18  ;;  %v1075_v62 = vmax.f32 %v5801_v45, 0.0  ;;  %v1139_v30 = vmax.f32 %v5812_v58, 0.0 }
 0x2c1   : > { %v2606_v15 = vmul.f32 %v2478_v29, %v2478_v29  ;;  %2925 = vst [vmem:[%s4738_s4 + $0x3a8] sm:$0xff] %v2797_v56  ;;  %v2117_v4 = vand.u32 2147483648, %v6283_v60  ;;  %vm1673_vm6 = vcmp.eq.f32.partialorder %v6289_v37, inf  ;;  %vm1675_vm7 = vcmp.eq.f32.partialorder %v6289_v37, 0.0 }
 0x2c2   : > { %v3879_v0 = vpop.eup %3878  ;;  %3890 = vrsqrt.f32 %v6328_v9  ;;  %v1676_v53 = vand.u32 2147483648, %v6289_v37  ;;  %vm2121_vm8 = vcmp.eq.f32.partialorder %v6306_v40, inf  ;;  %vm2123_vm9 = vcmp.eq.f32.partialorder %v6306_v40, 0.0 }
 0x2c3   : > { %v2734_v10 = vmul.f32 %v3877_v28, %v2606_v15  ;;  %3892 = vrsqrt.f32 %v2224_v21  ;;  %v2113_v57 = vmul.f32 %v3879_v0, %v6283_v60  ;;  %v3881_v45 = vpop.eup %3880  ;;  %v6344_v58 = vmul.f32 3.0, %v1075_v62 }
 0x2c4   : > { %3894 = vrsqrt.f32 %v6330_v1  ;;  %v3883_v38 = vpop.eup %3882  ;;  %v2542_v47 = vmul.f32 %v3881_v45, %v3881_v45  ;;  %v2124_v48 = vand.u32 2147483648, %v6306_v40  ;;  %v6351_v39 = vmul.f32 3.0, %v1139_v30 }
 0x2c5   : > { %2862 = vst [vmem:[%s4738_s4 + $0x1b0] sm:$0xff] %v2734_v10  ;;  %v2115_v12 = vsel %vm2114_vm4, %v6283_v60, %v2113_v57  ;;  %v1672_v19 = vmul.f32 %v3883_v38, %v6289_v37  ;;  %vm1680_vm10 = vcmp.eq.f32.partialorder %v6328_v9, inf  ;;  %3896 = vrsqrt.f32 %v6344_v58 }
 0x2c6   : > { %v2118_v52 = vsel %vm2116_vm5, %v2117_v4, %v2115_v12  ;;  %v3885_v54 = vpop.eup %3884  ;;  %v2670_v61 = vmul.f32 %v2542_v47, %v2542_v47  ;;  %vm1682_vm11 = vcmp.eq.f32.partialorder %v6328_v9, 0.0  ;;  %v1683_v44 = vand.u32 2147483648, %v6328_v9 }
 0x2c7   : > { %v2288_v59 = vadd.f32 1.0, %v2118_v52  ;;  %v1076_v20 = vmax.f32 %v5841_v2, 0.0  ;;  %v3887_v55 = vpop.eup %3886  ;;  %v2479_v63 = vmul.f32 %v3885_v54, %v3885_v54  ;;  %v1674_v60 = vsel %vm1673_vm6, %v6289_v37, %v1672_v19 }
 0x2c8   : > { %vm2128_vm12 = vcmp.eq.f32.partialorder %v6330_v1, inf  ;;  %3898 = vrsqrt.f32 %v6351_v39  ;;  %v3889_v6 = vpop.eup %3888  ;;  %v2798_v8 = vmul.f32 %v3881_v45, %v2670_v61  ;;  %v1677_v22 = vsel %vm1675_vm7, %v1676_v53, %v1674_v60 }
 0x2c9   : > { %3900 = vrsqrt.f32 %v2288_v59  ;;  %v2120_v14 = vmul.f32 %v3887_v55, %v6306_v40  ;;  %v2607_v5 = vmul.f32 %v2479_v63, %v2479_v63  ;;  %v2543_v2 = vmul.f32 %v3889_v6, %v3889_v6 }
 0x2ca   : > { %v2225_v35 = vadd.f32 1.0, %v1677_v22  ;;  %vm2130_vm13 = vcmp.eq.f32.partialorder %v6330_v1, 0.0  ;;  %2926 = vst [vmem:[%s4738_s4 + $0x3b0] sm:$0xff] %v2798_v8  ;;  %v2131_v36 = vand.u32 2147483648, %v6330_v1  ;;  %v6375_v49 = vmul.f32 3.0, %v1076_v20 }
 0x2cb   : > { %v2122_v3 = vsel %vm2121_vm8, %v6306_v40, %v2120_v14  ;;  %v1140_v37 = vmax.f32 %v5843_v31, 0.0  ;;  %v2735_v34 = vmul.f32 %v3885_v54, %v2607_v5  ;;  %v2671_v27 = vmul.f32 %v2543_v2, %v2543_v2 }
 0x2cc   : > { %v3891_v32 = vpop.eup %3890  ;;  %3902 = vrsqrt.f32 %v2225_v35  ;;  %v2125_v17 = vsel %vm2123_vm9, %v2124_v48, %v2122_v3  ;;  %vm1687_vm14 = vcmp.eq.f32.partialorder %v6344_v58, inf  ;;  %vm1689_vm15 = vcmp.eq.f32.partialorder %v6344_v58, 0.0 }
 0x2cd   : > { %v3893_v43 = vpop.eup %3892  ;;  %v2289_v23 = vadd.f32 1.0, %v2125_v17  ;;  %v1679_v13 = vmul.f32 %v3891_v32, %v6328_v9  ;;  %3904 = vrsqrt.f32 %v6375_v49  ;;  %2863 = vst [vmem:[%s4738_s4 + $0x1b8] sm:$0xff] %v2735_v34  ;;  %v2799_v33 = vmul.f32 %v3889_v6, %v2671_v27 }
 0x2ce   : > { %v3895_v51 = vpop.eup %3894  ;;  %v2480_v31 = vmul.f32 %v3893_v43, %v3893_v43  ;;  %v1690_v50 = vand.u32 2147483648, %v6344_v58  ;;  %v6390_v24 = vmul.f32 3.0, %v1140_v37  ;;  %v1077_v56 = vmax.f32 %v5875_v41, 0.0 }
 0x2cf   : > { %3906 = vrsqrt.f32 %v2289_v23  ;;  %v1681_v40 = vsel %vm1680_vm10, %v6328_v9, %v1679_v13  ;;  %v2127_v28 = vmul.f32 %v3895_v51, %v6330_v1  ;;  %v3897_v46 = vpop.eup %3896  ;;  %2927 = vst [vmem:[%s4738_s4 + $0x3b8] sm:$0xff] %v2799_v33  ;;  %v1141_v18 = vmax.f32 %v5886_v26, 0.0 }
 0x2d0   : > { %v2608_v29 = vmul.f32 %v2480_v31, %v2480_v31  ;;  %v1684_v25 = vsel %vm1682_vm11, %v1683_v44, %v1681_v40  ;;  %v1686_v62 = vmul.f32 %v3897_v46, %v6344_v58  ;;  %3908 = vrsqrt.f32 %v6390_v24 }
 0x2d1   : > { %v2226_v15 = vadd.f32 1.0, %v1684_v25  ;;  %v2129_v21 = vsel %vm2128_vm12, %v6330_v1, %v2127_v28  ;;  %vm2135_vm0 = vcmp.eq.f32.partialorder %v6351_v39, inf  ;;  %vm2137_vm1 = vcmp.eq.f32.partialorder %v6351_v39, 0.0 }
 0x2d2   : > { %v3899_v30 = vpop.eup %3898  ;;  %v2736_v0 = vmul.f32 %v3893_v43, %v2608_v29  ;;  %v2132_v9 = vsel %vm2130_vm13, %v2131_v36, %v2129_v21  ;;  %v1688_v4 = vsel %vm1687_vm14, %v6344_v58, %v1686_v62  ;;  %v2138_v1 = vand.u32 2147483648, %v6351_v39 }
 0x2d3   : > { %v3901_v41 = vpop.eup %3900  ;;  %3910 = vrsqrt.f32 %v2226_v15  ;;  %v2290_v26 = vadd.f32 1.0, %v2132_v9  ;;  %v2134_v10 = vmul.f32 %v3899_v30, %v6351_v39  ;;  %v1691_v53 = vsel %vm1689_vm15, %v1690_v50, %v1688_v4 }
 0x2d4   : > { %2864 = vst [vmem:[%s4738_s4 + $0x1c0] sm:$0xff] %v2736_v0  ;;  %v2544_v57 = vmul.f32 %v3901_v41, %v3901_v41  ;;  %v6414_v45 = vmul.f32 3.0, %v1077_v56  ;;  %v2227_v38 = vadd.f32 1.0, %v1691_v53  ;;  %v6417_v12 = vmul.f32 3.0, %v1141_v18 }
 0x2d5   : > { %3912 = vrsqrt.f32 %v2290_v26  ;;  %v2136_v47 = vsel %vm2135_vm0, %v6351_v39, %v2134_v10  ;;  %vm1694_vm2 = vcmp.eq.f32.partialorder %v6375_v49, inf  ;;  %vm1696_vm3 = vcmp.eq.f32.partialorder %v6375_v49, 0.0 }
 0x2d6   : > { %v3903_v48 = vpop.eup %3902  ;;  %v2672_v52 = vmul.f32 %v2544_v57, %v2544_v57  ;;  %v2139_v19 = vsel %vm2137_vm1, %v2138_v1, %v2136_v47  ;;  %3914 = vrsqrt.f32 %v6414_v45  ;;  %v1697_v39 = vand.u32 2147483648, %v6375_v49 }
 0x2d7   : > { %v3905_v58 = vpop.eup %3904  ;;  %v2481_v54 = vmul.f32 %v3903_v48, %v3903_v48  ;;  %3916 = vrsqrt.f32 %v2227_v38  ;;  %v2291_v61 = vadd.f32 1.0, %v2139_v19  ;;  %vm2142_vm4 = vcmp.eq.f32.partialorder %v6390_v24, inf }
 0x2d8   : > { %v2800_v59 = vmul.f32 %v3901_v41, %v2672_v52  ;;  %v1693_v44 = vmul.f32 %v3905_v58, %v6375_v49  ;;  %3918 = vrsqrt.f32 %v6417_v12  ;;  %v1078_v6 = vmax.f32 %v5911_v7, 0.0 }
 0x2d9   : > { %v3907_v20 = vpop.eup %3906  ;;  %v2609_v55 = vmul.f32 %v2481_v54, %v2481_v54  ;;  %3920 = vrsqrt.f32 %v2291_v61  ;;  %v1142_v5 = vmax.f32 %v5925_v16, 0.0  ;;  %v1079_v2 = vmax.f32 %v5940_v11, 0.0 }
 0x2da   : > { %2928 = vst [vmem:[%s4738_s4 + $0x3c0] sm:$0xff] %v2800_v59  ;;  %v2545_v63 = vmul.f32 %v3907_v20, %v3907_v20  ;;  %v1695_v60 = vsel %vm1694_vm2, %v6375_v49, %v1693_v44  ;;  %v3909_v8 = vpop.eup %3908  ;;  %v6434_v37 = vmul.f32 3.0, %v1078_v6  ;;  %vm2144_vm5 = vcmp.eq.f32.partialorder %v6390_v24, 0.0 }
 0x2db   : > { %v2737_v22 = vmul.f32 %v3903_v48, %v2609_v55  ;;  %v1698_v14 = vsel %vm1696_vm3, %v1697_v39, %v1695_v60  ;;  %v2141_v36 = vmul.f32 %v3909_v8, %v6390_v24  ;;  %v2145_v7 = vand.u32 2147483648, %v6390_v24 }
 0x2dc   : > { %v2673_v35 = vmul.f32 %v2545_v63, %v2545_v63  ;;  %v2228_v3 = vadd.f32 1.0, %v1698_v14  ;;  %vm1701_vm6 = vcmp.eq.f32.partialorder %v6414_v45, inf  ;;  %v6440_v49 = vmul.f32 3.0, %v1142_v5 }
 0x2dd   : > { %v3911_v32 = vpop.eup %3910  ;;  %2865 = vst [vmem:[%s4738_s4 + $0x1c8] sm:$0xff] %v2737_v22  ;;  %v2143_v11 = vsel %vm2142_vm4, %v6390_v24, %v2141_v36  ;;  %vm1703_vm7 = vcmp.eq.f32.partialorder %v6414_v45, 0.0  ;;  %v6447_v43 = vmul.f32 3.0, %v1079_v2  ;;  %v1704_v31 = vand.u32 2147483648, %v6414_v45 }
 0x2de   : > { %v2801_v16 = vmul.f32 %v3907_v20, %v2673_v35  ;;  %v2482_v34 = vmul.f32 %v3911_v32, %v3911_v32  ;;  %3922 = vrsqrt.f32 %v2228_v3  ;;  %v2146_v17 = vsel %vm2144_vm5, %v2145_v7, %v2143_v11 }
 0x2df   : > { %v3913_v27 = vpop.eup %3912  ;;  %3924 = vrsqrt.f32 %v6434_v37  ;;  %v2292_v33 = vadd.f32 1.0, %v2146_v17  ;;  %vm2149_vm8 = vcmp.eq.f32.partialorder %v6417_v12, inf  ;;  %v2152_v28 = vand.u32 2147483648, %v6417_v12 }
 0x2e0   : > { %v3915_v23 = vpop.eup %3914  ;;  %2929 = vst [vmem:[%s4738_s4 + $0x3c8] sm:$0xff] %v2801_v16  ;;  %v2610_v13 = vmul.f32 %v2482_v34, %v2482_v34  ;;  %v2546_v51 = vmul.f32 %v3913_v27, %v3913_v27  ;;  %3926 = vrsqrt.f32 %v6440_v49  ;;  %v1143_v21 = vmax.f32 %v5950_v42, 0.0 }
 0x2e1   : > { %v3917_v50 = vpop.eup %3916  ;;  %v1700_v40 = vmul.f32 %v3915_v23, %v6414_v45  ;;  %3928 = vrsqrt.f32 %v2292_v33  ;;  %vm2151_vm9 = vcmp.eq.f32.partialorder %v6417_v12, 0.0  ;;  %vm1708_vm10 = vcmp.eq.f32.partialorder %v6434_v37, inf }
 0x2e2   : > { %v3919_v24 = vpop.eup %3918  ;;  %v2738_v46 = vmul.f32 %v3911_v32, %v2610_v13  ;;  %v2674_v29 = vmul.f32 %v2546_v51, %v2546_v51  ;;  %v2483_v25 = vmul.f32 %v3917_v50, %v3917_v50  ;;  %3930 = vrsqrt.f32 %v6447_v43 }
 0x2e3   : > { %v3921_v56 = vpop.eup %3920  ;;  %v1702_v18 = vsel %vm1701_vm6, %v6414_v45, %v1700_v40  ;;  %v2148_v15 = vmul.f32 %v3919_v24, %v6417_v12  ;;  %v1271_v53 = vmul.f32 3.0, %v1143_v21  ;;  %vm1710_vm11 = vcmp.eq.f32.partialorder %v6434_v37, 0.0 }
 0x2e4   : > { %2866 = vst [vmem:[%s4738_s4 + $0x1d0] sm:$0xff] %v2738_v46  ;;  %v2802_v62 = vmul.f32 %v3913_v27, %v2674_v29  ;;  %v2611_v30 = vmul.f32 %v2483_v25, %v2483_v25  ;;  %v2547_v0 = vmul.f32 %v3921_v56, %v3921_v56  ;;  %v1705_v9 = vsel %vm1703_vm7, %v1704_v31, %v1702_v18 }
 0x2e5   : > { %v2229_v41 = vadd.f32 1.0, %v1705_v9  ;;  %v2150_v26 = vsel %vm2149_vm8, %v6417_v12, %v2148_v15  ;;  %v1711_v12 = vand.u32 2147483648, %v6434_v37  ;;  %vm2156_vm12 = vcmp.eq.f32.partialorder %v6440_v49, inf }
 0x2e6   : > { %2930 = vst [vmem:[%s4738_s4 + $0x3d0] sm:$0xff] %v2802_v62  ;;  %v2739_v4 = vmul.f32 %v3917_v50, %v2611_v30  ;;  %v2675_v10 = vmul.f32 %v2547_v0, %v2547_v0  ;;  %v2153_v42 = vsel %vm2151_vm9, %v2152_v28, %v2150_v26  ;;  %v2159_v39 = vand.u32 2147483648, %v6440_v49 }
 0x2e7   : > { %3932 = vrsqrt.f32 %v2229_v41  ;;  %v2293_v57 = vadd.f32 1.0, %v2153_v42  ;;  %vm2158_vm13 = vcmp.eq.f32.partialorder %v6440_v49, 0.0  ;;  %vm1715_vm14 = vcmp.eq.f32.partialorder %v6447_v43, inf }
 0x2e8   : > { %v3923_v1 = vpop.eup %3922  ;;  %2867 = vst [vmem:[%s4738_s4 + $0x1d8] sm:$0xff] %v2739_v4  ;;  %v2803_v38 = vmul.f32 %v3921_v56, %v2675_v10  ;;  %v1718_v14 = vand.u32 2147483648, %v6447_v43  ;;  %vm1717_vm15 = vcmp.eq.f32.partialorder %v6447_v43, 0.0  ;;  %vm2163_vm0 = vcmp.eq.f32.partialorder %v1271_v53, inf }
 0x2e9   : > { %v3925_v45 = vpop.eup %3924  ;;  %v2484_v47 = vmul.f32 %v3923_v1, %v3923_v1  ;;  %3934 = vrsqrt.f32 %v2293_v57  ;;  %v2166_v23 = vand.u32 2147483648, %v1271_v53  ;;  %vm2165_vm1 = vcmp.eq.f32.partialorder %v1271_v53, 0.0 }
 0x2ea   : > { %2931 = vst [vmem:[%s4738_s4 + $0x3d8] sm:$0xff] %v2803_v38  ;;  %v1707_v48 = vmul.f32 %v3925_v45, %v6434_v37  ;;  %3936 = vrsqrt.f32 %v1271_v53  ;;  %v3927_v52 = vpop.eup %3926 }
 0x2eb   : > { %v2612_v19 = vmul.f32 %v2484_v47, %v2484_v47  ;;  %v3929_v58 = vpop.eup %3928  ;;  %v2155_v61 = vmul.f32 %v3927_v52, %v6440_v49 }
 0x2ec   : > { %v1709_v54 = vsel %vm1708_vm10, %v6434_v37, %v1707_v48  ;;  %v3931_v59 = vpop.eup %3930  ;;  %v2548_v20 = vmul.f32 %v3929_v58, %v3929_v58 }
 0x2ed   : > { %v2740_v44 = vmul.f32 %v3923_v1, %v2612_v19  ;;  %v1712_v55 = vsel %vm1710_vm11, %v1711_v12, %v1709_v54  ;;  %v2157_v60 = vsel %vm2156_vm12, %v6440_v49, %v2155_v61  ;;  %v1714_v6 = vmul.f32 %v3931_v59, %v6447_v43 }
 0x2ee   : > { %v2230_v63 = vadd.f32 1.0, %v1712_v55  ;;  %v2676_v8 = vmul.f32 %v2548_v20, %v2548_v20  ;;  %v2160_v22 = vsel %vm2158_vm13, %v2159_v39, %v2157_v60 }
 0x2ef   : > { %2868 = vst [vmem:[%s4738_s4 + $0x1e0] sm:$0xff] %v2740_v44  ;;  %v2294_v5 = vadd.f32 1.0, %v2160_v22  ;;  %v1716_v2 = vsel %vm1715_vm14, %v6447_v43, %v1714_v6 }
 0x2f0   : > { %3938 = vrsqrt.f32 %v2230_v63  ;;  %v2804_v3 = vmul.f32 %v3929_v58, %v2676_v8  ;;  %v1719_v36 = vsel %vm1717_vm15, %v1718_v14, %v1716_v2 }
 0x2f1   : > { %v3933_v35 = vpop.eup %3932  ;;  %3940 = vrsqrt.f32 %v2294_v5  ;;  %v2231_v32 = vadd.f32 1.0, %v1719_v36 }
 0x2f2   : > { %v2485_v37 = vmul.f32 %v3933_v35, %v3933_v35  ;;  %2932 = vst [vmem:[%s4738_s4 + $0x3e0] sm:$0xff] %v2804_v3 }
 0x2f3   : > { %v3935_v7 = vpop.eup %3934  ;;  %3942 = vrsqrt.f32 %v2231_v32 }
 0x2f4   : > { %v3937_v49 = vpop.eup %3936  ;;  %v2613_v16 = vmul.f32 %v2485_v37, %v2485_v37  ;;  %v2549_v34 = vmul.f32 %v3935_v7, %v3935_v7 }
 0x2f5   : > { %v2162_v11 = vmul.f32 %v3937_v49, %v1271_v53 }
 0x2f6   : > { %v2741_v27 = vmul.f32 %v3933_v35, %v2613_v16  ;;  %v2677_v17 = vmul.f32 %v2549_v34, %v2549_v34 }
 0x2f7   : > { %v2164_v43 = vsel %vm2163_vm0, %v1271_v53, %v2162_v11 }
 0x2f8   : > { %2869 = vst [vmem:[%s4738_s4 + $0x1e8] sm:$0xff] %v2741_v27  ;;  %v2805_v13 = vmul.f32 %v3935_v7, %v2677_v17  ;;  %v2167_v51 = vsel %vm2165_vm1, %v2166_v23, %v2164_v43 }
 0x2f9   : > { %v2295_v33 = vadd.f32 1.0, %v2167_v51 }
 0x2fa   : > { %v3939_v31 = vpop.eup %3938  ;;  %2933 = vst [vmem:[%s4738_s4 + $0x3e8] sm:$0xff] %v2805_v13 }
 0x2fb   : > { %v2486_v50 = vmul.f32 %v3939_v31, %v3939_v31  ;;  %3944 = vrsqrt.f32 %v2295_v33  ;;  %v3941_v40 = vpop.eup %3940 }
 0x2fc   : > { %v2550_v24 = vmul.f32 %v3941_v40, %v3941_v40 }
 0x2fd   : > { %v2614_v28 = vmul.f32 %v2486_v50, %v2486_v50  ;;  %v3943_v46 = vpop.eup %3942 }
 0x2fe   : > { %v2678_v25 = vmul.f32 %v2550_v24, %v2550_v24  ;;  %v2487_v56 = vmul.f32 %v3943_v46, %v3943_v46 }
 0x2ff   : > { %v2742_v29 = vmul.f32 %v3939_v31, %v2614_v28 }
 0x300   : > { %v2806_v18 = vmul.f32 %v3941_v40, %v2678_v25  ;;  %v2615_v15 = vmul.f32 %v2487_v56, %v2487_v56 }
 0x301   : > { %2870 = vst [vmem:[%s4738_s4 + $0x1f0] sm:$0xff] %v2742_v29 }
 0x302   : > { %2934 = vst [vmem:[%s4738_s4 + $0x3f0] sm:$0xff] %v2806_v18  ;;  %v2743_v21 = vmul.f32 %v3943_v46, %v2615_v15 }
 0x304   : > { %2871 = vst [vmem:[%s4738_s4 + $0x1f8] sm:$0xff] %v2743_v21 }
 0x305   : > { %v3945_v62 = vpop.eup %3944 }
 0x306   : > { %v2551_v30 = vmul.f32 %v3945_v62, %v3945_v62 }
 0x308   : > { %v2679_v0 = vmul.f32 %v2551_v30, %v2551_v30 }
 0x30a   : > { %v2807_v9 = vmul.f32 %v3945_v62, %v2679_v0 }
 0x30c   : > { %2935 = vst [vmem:[%s4738_s4 + $0x3f8] sm:$0xff] %v2807_v9 }
 0x30d   : > { %3959 = shalt.err (!%p3956_p5)
}
 0x30e   : > { %s3960_s24 = scalar_lea.hbm %s6498_s15, 16384  ;;  %s3964_s27 = scalar_lea.hbm %s6553_s2, 32768 }
 0x30f   : > { %p3961_p6 = scmp.ne.s32.totalorder %s6498_s15, %s3960_s24  ;;  %p3965_p10 = scmp.lt.u32.totalorder %s6498_s15, %s6553_s2 }
 0x310   : > { %p3966_p11 = scmp.lt.u32.totalorder %s3964_s27, %s3960_s24  ;;  %p3968_p13 = scmp.lt.u32.totalorder %s3960_s24, %s6498_s15 }
 0x311   : > { %p3962_p7 = pnand %p3961_p6, %p4085_p4 }
 0x312   : > { %p3967_p12 = por %p3966_p11, %p3965_p10 }
 0x313   : > { %p3963_p9 = pneg %p3962_p7 }
 0x314   : > { %p3969_p0 = por %p3968_p13, %p3967_p12 }
 0x316   : > { %p3970_p1 = pnand %p3969_p0, %p3963_p9 }
 0x318   : > { %3973 = shalt.err (!%p3970_p1)
}
 0x319   : > { %s4027_s30 = smov 256   ;;  %s4028_s3 = smov 512  }
 0x31a   : > { %s4029_s4 = smov 16  }
 0x31b   : > { %3376 = dma.vmem_to_hbm [thread:$0]  (%p4085_p4), %s6500_s6, 16384, %s6498_s15, %s6505_s16, %s4027_s30, %s4028_s3, %s4029_s4  }
 0x31c PF: > { %p3382_p2 = scmp.ge.s32.totalorder %s4024_s14, 2  ;;  %s2968_s5 = sand.u32 1, %s4004_s9  }
 0x31d   : > { %s2969_s7 = scalar_lea.sflag [#allocation3], %s2968_s5 }
 0x31e   : > { %p3379_p3 = pnand %p3382_p2, %p4092_p8 }
 0x320   : > { %3999 = dma.done.wait (!%p3379_p3), %s2969_s7, 16384  }
 0x321   : > { %4001 = vsyncadd (!%p3379_p3), %s2969_s7, 4294950912  ;;  %s15_s14 = sadd.s32 1, %s4024_s14   ;;  %s6562_s9 = smov %s4008_s10 }
 0x322   : > { %p12_p5 = scmp.ge.s32.totalorder %s15_s14, 4   ;;  %s6563_s10 = smov %s4012_s11 }
 0x323   : > { %s6564_s11 = smov %s4098_s22  ;;  %s6565_s12 = smov %s4020_s13 }
 0x324   : > { %s6566_s13 = smov %s6568_s17  ;;  %14 = sbr.rel (!%p12_p5) target bundleno = 4 (0x4), region = 66 }
 0x32b   :  { %2974 = vsyncpa [#allocation3], 1 }
 0x32c   :  { %2976 = vsyncpa [#allocation3 + $0x1], 1 }

</bundles_post_ra>
